<compile_context>
chip_gen: v6e
topology: v6e:2x2x1
jax: 0.10.0
libtpu: 0.0.40
codegen_flags: <defaults>
</compile_context>

<pallas_src>
import jax
import jax.numpy as jnp
import numpy as np
from jax import lax
from jax.experimental import pallas as pl
from jax.experimental.pallas import tpu as pltpu


def basic_block_kernel(x_ref, w1_ref, b1_ref, w2_ref, b2_ref, o_ref):
    _, H, W, C = x_ref.shape

    def conv3x3(h_hwc, w_ref):
        """SAME 3x3 conv as a single im2col matmul.  h_hwc: (H, W, C) f32."""
        zrow = jnp.zeros((1, W, C), jnp.float32)
        zcol = jnp.zeros((H + 2, 1, C), jnp.float32)
        hp = jnp.concatenate([zrow, h_hwc, zrow], axis=0)        # (H+2, W,   C)
        hp = jnp.concatenate([zcol, hp, zcol], axis=1)           # (H+2, W+2, C)
        cols = [lax.slice(hp, (dy, dx, 0), (dy + H, dx + W, C))
                for dy in range(3) for dx in range(3)]
        patches = jnp.concatenate(cols, axis=2)                  # (H, W, 9*C)
        patches = patches.reshape(H * W, 9 * C).astype(jnp.bfloat16)
        return jnp.dot(patches, w_ref[...],
                       preferred_element_type=jnp.float32)       # (H*W, C) f32

    x = x_ref[0]                                                 # (H, W, C) f32

    # conv1 (+ folded bn1 scale) + bias + relu
    h = conv3x3(x, w1_ref)
    h = jnp.maximum(h + b1_ref[...], 0.0)

    # conv2 (+ folded bn2 scale) + bias
    h = conv3x3(h.reshape(H, W, C), w2_ref)
    h = h + b2_ref[...]

    # residual add + relu  (identity = x since downsample is None)
    out = jnp.maximum(h + x.reshape(H * W, C), 0.0)
    o_ref[0] = out.reshape(H, W, C)


@jax.jit
def basic_block_forward(x_nchw, params):
    """x_nchw: (N, C, H, W) float32.  Returns (N, C, H, W) float32."""
    N, C, H, W = x_nchw.shape
    x = jnp.transpose(x_nchw, (0, 2, 3, 1)).astype(jnp.float32)   # NHWC

    # Fold BN scale into the conv weights (per output channel), keep bias separate.
    # (3,3,Cin,Cout) HWIO -> (9*Cin, Cout); row order matches the kernel's
    # (dy, dx, cin) patch concatenation.  Cast once to bf16 for the MXU.
    w1 = (params["w1"] * params["s1"][0]).reshape(9 * C, C).astype(jnp.bfloat16)
    w2 = (params["w2"] * params["s2"][0]).reshape(9 * C, C).astype(jnp.bfloat16)

    wfull = lambda r, c: pl.BlockSpec((r, c), lambda n: (0, 0))

    out = pl.pallas_call(
        basic_block_kernel,
        out_shape=jax.ShapeDtypeStruct((N, H, W, C), jnp.float32),
        grid=(N,),
        in_specs=[
            pl.BlockSpec((1, H, W, C), lambda n: (n, 0, 0, 0)),
            wfull(9 * C, C), wfull(1, C),
            wfull(9 * C, C), wfull(1, C),
        ],
        out_specs=pl.BlockSpec((1, H, W, C), lambda n: (n, 0, 0, 0)),
        compiler_params=pltpu.CompilerParams(
            dimension_semantics=("parallel",)),
    )(x, w1, params["b1"], w2, params["b2"])

    return jnp.transpose(out, (0, 3, 1, 2))


def ref_forward(x_nchw, p):
    """Pure-JAX f32 reference (true module semantics), for correctness checking."""
    x = jnp.transpose(x_nchw, (0, 2, 3, 1)).astype(jnp.float32)
    conv = lambda h, w: lax.conv_general_dilated(
        h, w, (1, 1), "SAME", dimension_numbers=("NHWC", "HWIO", "NHWC"))
    h = jax.nn.relu(conv(x, p["w1"]) * p["s1"][0] + p["b1"][0])
    h = conv(h, p["w2"]) * p["s2"][0] + p["b2"][0]
    out = jax.nn.relu(h + x)
    return jnp.transpose(out, (0, 3, 1, 2))


def make_params(key, C):
    ks = jax.random.split(key, 10)

    def bn_fold(kg, kb, km, kv, c):
        gamma = 1.0 + 0.05 * jax.random.normal(kg, (c,), jnp.float32)
        beta = 0.05 * jax.random.normal(kb, (c,), jnp.float32)
        mean = 0.05 * jax.random.normal(km, (c,), jnp.float32)
        var = 1.0 + 0.5 * jax.random.uniform(kv, (c,), jnp.float32)
        scale = gamma / jnp.sqrt(var + 1e-5)
        bias = beta - mean * scale
        return scale[None, :], bias[None, :]

    s1, b1 = bn_fold(ks[0], ks[1], ks[2], ks[3], C)
    s2, b2 = bn_fold(ks[4], ks[5], ks[6], ks[7], C)
    wstd = (2.0 / (9 * C)) ** 0.5   # He init for a 3x3 conv
    return {
        "w1": wstd * jax.random.normal(ks[8], (3, 3, C, C), jnp.float32),  # HWIO
        "w2": wstd * jax.random.normal(ks[9], (3, 3, C, C), jnp.float32),  # HWIO
        "s1": s1, "b1": b1, "s2": s2, "b2": b2,
    }


if __name__ == "__main__":
    # inplanes == planes (required for the residual with downsample=None), stride=1.
    # C=128 fills the 128-lane vreg (lane-dense stores); N=4 gives the auto-pipeline
    # multiple grid steps so DMA overlaps compute.
    N, C, H, W = 4, 128, 16, 16

    key = jax.random.PRNGKey(0)
    kx, kp = jax.random.split(key)
    x = jax.random.normal(kx, (N, C, H, W), jnp.float32)
    params = make_params(kp, C)

    out = basic_block_forward(x, params)
    out = jax.block_until_ready(out)

    ref = ref_forward(x, params)
    # Tolerance reflects bf16 MXU operands (f32 accumulation) over two K=1152 convs
    # versus the f32 reference; typical per-element error is a few 1e-3.
    np.testing.assert_allclose(np.asarray(out), np.asarray(ref), rtol=5e-2, atol=5e-2)

    print("KERNEL_OK")
</pallas_src>

<mosaic_0001>
module attributes {stable_mosaic.version = 11 : i64} {
  func.func @basic_block_kernel(%arg0: i32, %arg1: memref<1x16x16x128xf32, #tpu.memory_space<vmem>>, %arg2: memref<1152x128xbf16, #tpu.memory_space<vmem>>, %arg3: memref<1x128xf32, #tpu.memory_space<vmem>>, %arg4: memref<1152x128xbf16, #tpu.memory_space<vmem>>, %arg5: memref<1x128xf32, #tpu.memory_space<vmem>>, %arg6: memref<1x16x16x128xf32, #tpu.memory_space<vmem>>) attributes {dimension_semantics = [#tpu.dimension_semantics<parallel>], iteration_bounds = array<i64: 4>, scalar_prefetch = 0 : i64, scratch_operands = 0 : i64, tpu.core_type = #tpu.core_type<tc>, window_params = [{transform_indices = @transform_0, window_bounds = array<i64: 1, 16, 16, 128>}, {pipeline_mode = #tpu.pipeline_mode<synchronous>, transform_indices = @transform_1, window_bounds = array<i64: 1152, 128>}, {pipeline_mode = #tpu.pipeline_mode<synchronous>, transform_indices = @transform_2, window_bounds = array<i64: 1, 128>}, {pipeline_mode = #tpu.pipeline_mode<synchronous>, transform_indices = @transform_3, window_bounds = array<i64: 1152, 128>}, {pipeline_mode = #tpu.pipeline_mode<synchronous>, transform_indices = @transform_4, window_bounds = array<i64: 1, 128>}, {transform_indices = @transform_5, window_bounds = array<i64: 1, 16, 16, 128>}]} {
    %c0 = arith.constant 0 : index
    %c0_0 = arith.constant 0 : index
    %c0_1 = arith.constant 0 : index
    %c0_2 = arith.constant 0 : index
    %0 = vector.load %arg1[%c0, %c0_0, %c0_1, %c0_2] : memref<1x16x16x128xf32, #tpu.memory_space<vmem>>, vector<1x16x16x128xf32>
    %1 = vector.shape_cast %0 : vector<1x16x16x128xf32> to vector<16x16x128xf32>
    %cst = arith.constant 0.000000e+00 : f32
    %2 = vector.broadcast %cst : f32 to vector<1x16x128xf32>
    %cst_3 = arith.constant 0.000000e+00 : f32
    %3 = vector.broadcast %cst_3 : f32 to vector<18x1x128xf32>
    %4 = tpu.concatenate %2, %1, %2 in 0 : vector<1x16x128xf32>, vector<16x16x128xf32>, vector<1x16x128xf32> -> vector<18x16x128xf32>
    %5 = tpu.concatenate %3, %4, %3 in 1 : vector<18x1x128xf32>, vector<18x16x128xf32>, vector<18x1x128xf32> -> vector<18x18x128xf32>
    %6 = vector.extract_strided_slice %5 {offsets = [0, 0, 0], sizes = [16, 16, 128], strides = [1, 1, 1]} : vector<18x18x128xf32> to vector<16x16x128xf32>
    %7 = vector.extract_strided_slice %5 {offsets = [0, 1, 0], sizes = [16, 16, 128], strides = [1, 1, 1]} : vector<18x18x128xf32> to vector<16x16x128xf32>
    %8 = vector.extract_strided_slice %5 {offsets = [0, 2, 0], sizes = [16, 16, 128], strides = [1, 1, 1]} : vector<18x18x128xf32> to vector<16x16x128xf32>
    %9 = vector.extract_strided_slice %5 {offsets = [1, 0, 0], sizes = [16, 16, 128], strides = [1, 1, 1]} : vector<18x18x128xf32> to vector<16x16x128xf32>
    %10 = vector.extract_strided_slice %5 {offsets = [1, 1, 0], sizes = [16, 16, 128], strides = [1, 1, 1]} : vector<18x18x128xf32> to vector<16x16x128xf32>
    %11 = vector.extract_strided_slice %5 {offsets = [1, 2, 0], sizes = [16, 16, 128], strides = [1, 1, 1]} : vector<18x18x128xf32> to vector<16x16x128xf32>
    %12 = vector.extract_strided_slice %5 {offsets = [2, 0, 0], sizes = [16, 16, 128], strides = [1, 1, 1]} : vector<18x18x128xf32> to vector<16x16x128xf32>
    %13 = vector.extract_strided_slice %5 {offsets = [2, 1, 0], sizes = [16, 16, 128], strides = [1, 1, 1]} : vector<18x18x128xf32> to vector<16x16x128xf32>
    %14 = vector.extract_strided_slice %5 {offsets = [2, 2, 0], sizes = [16, 16, 128], strides = [1, 1, 1]} : vector<18x18x128xf32> to vector<16x16x128xf32>
    %15 = tpu.concatenate %6, %7, %8, %9, %10, %11, %12, %13, %14 in 2 : vector<16x16x128xf32>, vector<16x16x128xf32>, vector<16x16x128xf32>, vector<16x16x128xf32>, vector<16x16x128xf32>, vector<16x16x128xf32>, vector<16x16x128xf32>, vector<16x16x128xf32>, vector<16x16x128xf32> -> vector<16x16x1152xf32>
    %16 = vector.shape_cast %15 : vector<16x16x1152xf32> to vector<256x1152xf32>
    %17 = arith.truncf %16 : vector<256x1152xf32> to vector<256x1152xbf16>
    %c0_4 = arith.constant 0 : index
    %c0_5 = arith.constant 0 : index
    %18 = vector.load %arg2[%c0_4, %c0_5] : memref<1152x128xbf16, #tpu.memory_space<vmem>>, vector<1152x128xbf16>
    %cst_6 = arith.constant dense<0.000000e+00> : vector<256x128xf32>
    %19 = tpu.matmul %17, %18, %cst_6 {dimension_numbers = #tpu.dot_dimension_numbers<[1], [0], [0], [1], [0, 0, 1, 1], [], []>} : vector<256x1152xbf16>, vector<1152x128xbf16>, vector<256x128xf32> -> vector<256x128xf32>
    %c0_7 = arith.constant 0 : index
    %c0_8 = arith.constant 0 : index
    %20 = vector.load %arg3[%c0_7, %c0_8] : memref<1x128xf32, #tpu.memory_space<vmem>>, vector<1x128xf32>
    %21 = vector.broadcast %20 : vector<1x128xf32> to vector<256x128xf32>
    %22 = arith.addf %19, %21 : vector<256x128xf32>
    %cst_9 = arith.constant 0.000000e+00 : f32
    %23 = vector.broadcast %cst_9 : f32 to vector<256x128xf32>
    %24 = arith.maximumf %22, %23 : vector<256x128xf32>
    %25 = vector.shape_cast %24 : vector<256x128xf32> to vector<16x16x128xf32>
    %cst_10 = arith.constant 0.000000e+00 : f32
    %26 = vector.broadcast %cst_10 : f32 to vector<1x16x128xf32>
    %cst_11 = arith.constant 0.000000e+00 : f32
    %27 = vector.broadcast %cst_11 : f32 to vector<18x1x128xf32>
    %28 = tpu.concatenate %26, %25, %26 in 0 : vector<1x16x128xf32>, vector<16x16x128xf32>, vector<1x16x128xf32> -> vector<18x16x128xf32>
    %29 = tpu.concatenate %27, %28, %27 in 1 : vector<18x1x128xf32>, vector<18x16x128xf32>, vector<18x1x128xf32> -> vector<18x18x128xf32>
    %30 = vector.extract_strided_slice %29 {offsets = [0, 0, 0], sizes = [16, 16, 128], strides = [1, 1, 1]} : vector<18x18x128xf32> to vector<16x16x128xf32>
    %31 = vector.extract_strided_slice %29 {offsets = [0, 1, 0], sizes = [16, 16, 128], strides = [1, 1, 1]} : vector<18x18x128xf32> to vector<16x16x128xf32>
    %32 = vector.extract_strided_slice %29 {offsets = [0, 2, 0], sizes = [16, 16, 128], strides = [1, 1, 1]} : vector<18x18x128xf32> to vector<16x16x128xf32>
    %33 = vector.extract_strided_slice %29 {offsets = [1, 0, 0], sizes = [16, 16, 128], strides = [1, 1, 1]} : vector<18x18x128xf32> to vector<16x16x128xf32>
    %34 = vector.extract_strided_slice %29 {offsets = [1, 1, 0], sizes = [16, 16, 128], strides = [1, 1, 1]} : vector<18x18x128xf32> to vector<16x16x128xf32>
    %35 = vector.extract_strided_slice %29 {offsets = [1, 2, 0], sizes = [16, 16, 128], strides = [1, 1, 1]} : vector<18x18x128xf32> to vector<16x16x128xf32>
    %36 = vector.extract_strided_slice %29 {offsets = [2, 0, 0], sizes = [16, 16, 128], strides = [1, 1, 1]} : vector<18x18x128xf32> to vector<16x16x128xf32>
    %37 = vector.extract_strided_slice %29 {offsets = [2, 1, 0], sizes = [16, 16, 128], strides = [1, 1, 1]} : vector<18x18x128xf32> to vector<16x16x128xf32>
    %38 = vector.extract_strided_slice %29 {offsets = [2, 2, 0], sizes = [16, 16, 128], strides = [1, 1, 1]} : vector<18x18x128xf32> to vector<16x16x128xf32>
    %39 = tpu.concatenate %30, %31, %32, %33, %34, %35, %36, %37, %38 in 2 : vector<16x16x128xf32>, vector<16x16x128xf32>, vector<16x16x128xf32>, vector<16x16x128xf32>, vector<16x16x128xf32>, vector<16x16x128xf32>, vector<16x16x128xf32>, vector<16x16x128xf32>, vector<16x16x128xf32> -> vector<16x16x1152xf32>
    %40 = vector.shape_cast %39 : vector<16x16x1152xf32> to vector<256x1152xf32>
    %41 = arith.truncf %40 : vector<256x1152xf32> to vector<256x1152xbf16>
    %c0_12 = arith.constant 0 : index
    %c0_13 = arith.constant 0 : index
    %42 = vector.load %arg4[%c0_12, %c0_13] : memref<1152x128xbf16, #tpu.memory_space<vmem>>, vector<1152x128xbf16>
    %cst_14 = arith.constant dense<0.000000e+00> : vector<256x128xf32>
    %43 = tpu.matmul %41, %42, %cst_14 {dimension_numbers = #tpu.dot_dimension_numbers<[1], [0], [0], [1], [0, 0, 1, 1], [], []>} : vector<256x1152xbf16>, vector<1152x128xbf16>, vector<256x128xf32> -> vector<256x128xf32>
    %c0_15 = arith.constant 0 : index
    %c0_16 = arith.constant 0 : index
    %44 = vector.load %arg5[%c0_15, %c0_16] : memref<1x128xf32, #tpu.memory_space<vmem>>, vector<1x128xf32>
    %45 = vector.broadcast %44 : vector<1x128xf32> to vector<256x128xf32>
    %46 = arith.addf %43, %45 : vector<256x128xf32>
    %47 = vector.shape_cast %1 : vector<16x16x128xf32> to vector<256x128xf32>
    %48 = arith.addf %46, %47 : vector<256x128xf32>
    %cst_17 = arith.constant 0.000000e+00 : f32
    %49 = vector.broadcast %cst_17 : f32 to vector<256x128xf32>
    %50 = arith.maximumf %48, %49 : vector<256x128xf32>
    %51 = vector.shape_cast %50 : vector<256x128xf32> to vector<16x16x128xf32>
    %c0_18 = arith.constant 0 : index
    %c0_19 = arith.constant 0 : index
    %c0_20 = arith.constant 0 : index
    %c0_21 = arith.constant 0 : index
    %52 = vector.load %arg6[%c0_18, %c0_19, %c0_20, %c0_21] : memref<1x16x16x128xf32, #tpu.memory_space<vmem>>, vector<1x16x16x128xf32>
    %53 = vector.shape_cast %52 : vector<1x16x16x128xf32> to vector<16x16x128xf32>
    %54 = vector.shape_cast %51 : vector<16x16x128xf32> to vector<1x16x16x128xf32>
    tpu.vector_store %arg6[%c0_18, %c0_19, %c0_20, %c0_21], %54 {strides = array<i32>} : memref<1x16x16x128xf32, #tpu.memory_space<vmem>>, vector<1x16x16x128xf32>,
    return
  }
  func.func @transform_0(%arg0: i32) -> (i32, i32, i32, i32) {
    %c0_i32 = arith.constant 0 : i32
    %c0_i32_0 = arith.constant 0 : i32
    %c0_i32_1 = arith.constant 0 : i32
    %c0_i32_2 = arith.constant 0 : i32
    return %arg0, %c0_i32, %c0_i32_0, %c0_i32_1 : i32, i32, i32, i32
  }
  func.func @transform_1(%arg0: i32) -> (i32, i32) {
    %c0_i32 = arith.constant 0 : i32
    %c0_i32_0 = arith.constant 0 : i32
    %c0_i32_1 = arith.constant 0 : i32
    return %c0_i32, %c0_i32_0 : i32, i32
  }
  func.func @transform_2(%arg0: i32) -> (i32, i32) {
    %c0_i32 = arith.constant 0 : i32
    %c0_i32_0 = arith.constant 0 : i32
    %c0_i32_1 = arith.constant 0 : i32
    return %c0_i32, %c0_i32_0 : i32, i32
  }
  func.func @transform_3(%arg0: i32) -> (i32, i32) {
    %c0_i32 = arith.constant 0 : i32
    %c0_i32_0 = arith.constant 0 : i32
    %c0_i32_1 = arith.constant 0 : i32
    return %c0_i32, %c0_i32_0 : i32, i32
  }
  func.func @transform_4(%arg0: i32) -> (i32, i32) {
    %c0_i32 = arith.constant 0 : i32
    %c0_i32_0 = arith.constant 0 : i32
    %c0_i32_1 = arith.constant 0 : i32
    return %c0_i32, %c0_i32_0 : i32, i32
  }
  func.func @transform_5(%arg0: i32) -> (i32, i32, i32, i32) {
    %c0_i32 = arith.constant 0 : i32
    %c0_i32_0 = arith.constant 0 : i32
    %c0_i32_1 = arith.constant 0 : i32
    %c0_i32_2 = arith.constant 0 : i32
    return %arg0, %c0_i32, %c0_i32_0, %c0_i32_1 : i32, i32, i32, i32
  }
}

</mosaic_0001>

<bundles_post_ra>
// kernel: basic_block_forward.1
= control target key start
LH: loop header
LB: loop body
LE: loop exit
PB: predicated region body
PF: predicated region fallthrough
CT: control target
= control target key end

     0   :  { %10 = vsyncpa [#allocation3], 0  ;;  %s9336_s0 = inlined_call_operand.vmem [shape: f32[4,16,16,128], index: 0, kind: input, shape index: {}]   ;;  %s9337_s1 = inlined_call_operand.vmem [shape: bf16[1152,128], index: 1, kind: input, shape index: {}]   ;;  %s9338_s2 = inlined_call_operand.vmem [shape: f32[1,128], index: 2, kind: input, shape index: {}]   ;;  %s9339_s3 = inlined_call_operand.vmem [shape: bf16[1152,128], index: 3, kind: input, shape index: {}]   ;;  %s9340_s4 = inlined_call_operand.vmem [shape: f32[1,128], index: 4, kind: input, shape index: {}]   ;;  %s9341_s5 = inlined_call_operand.hbm [shape: f32[4,16,16,128], index: 5, kind: output, shape index: {}]  }
   0x1   :  { %12 = vsyncpa [#allocation3 + $0x1], 0  ;;  %s6093_s18 = smov 0   ;;  %s6095_s19 = smov 0  }
   0x2   :  { %s6097_s20 = smov 0   ;;  %s6099_s21 = smov 0  }
   0x3 LB: > { %s6114_s22 = sadd.s32 4294967295, %s6056_s21   ;;  %s4193_s23 = sadd.s32 4294967294, %s6056_s21   ;;  %s6056_s21 = sphi %s6099_s21, %s9684_s21   ;;  %s6052_s20 = sphi %s6097_s20, %s9683_s20   ;;  %s6048_s19 = sphi %s6095_s19, %s9682_s19   ;;  %s6044_s18 = sphi %s6093_s18, %s9681_s18  }
   0x4   : > { %s6118_s24 = sadd.s32 1, %s6056_s21   ;;  %s135_s25 = sadd.s32 1, %s6052_s20 }
   0x5   : > { %s132_s26 = ssub.s32 %s6056_s21, %s6118_s24  ;;  %p145_p0 = scmp.ne.s32.totalorder %s6052_s20, %s6048_s19 }
   0x6   : > { %p133_p1 = scmp.eq.s32.totalorder %s132_s26, 0  ;;  %p146_p2 = scmp.eq.s32.totalorder %s6114_s22, 3 }
   0x7   : > { %p151_p3 = scmp.ne.s32.totalorder %s6048_s19, %s6044_s18  ;;  %p152_p4 = scmp.eq.s32.totalorder %s4193_s23, 3 }
   0x8   : > { %s6129_s27 = scalar_select %p133_p1, %s6052_s20, %s135_s25  }
   0x9   : > { %p6131_p5 = por %p146_p2, %p145_p0  ;;  %p6135_p6 = por %p152_p4, %p151_p3 }
   0xa   : > { %p4196_p7 = scmp.ge.s32.totalorder %s6056_s21, 1  ;;  %p190_p8 = scmp.lt.s32.totalorder %s6056_s21, 5 }
   0xc   : > { %p191_p9 = pnand %p4196_p7, %p190_p8 }
   0xe   : > { %194 = sbr.rel (%p191_p9) target bundleno = 1048 (0x418), region = 40 }
  0x13   : > { %v5820_v0 = vld [vmem:[%s9337_s1 + $0x78] sm:$0xff]   ;;  %vm289_vm0 = vcmask 1040384   ;;  %v6058_v3 = vmov 0.0   ;;  %vm456_vm1 = vcmask 1046528   ;;  %v5824_v6 = vld [vmem:[%s9337_s1 + $0x70] sm:$0xff]   ;;  %v5828_v14 = vld [vmem:[%s9337_s1 + $0x68] sm:$0xff]  }
  0x14   : > { %v5821_v1 = vld [vmem:[%s9337_s1 + $0x38] sm:$0xff]   ;;  %4737 = vmatprep.subr.bf16.mxu0 %v5820_v0  ;;  %v6150_v4 = vrot.slane %v6058_v3, 7  ;;  %v5825_v8 = vld [vmem:[%s9337_s1 + $0x30] sm:$0xff]   ;;  %v5829_v16 = vld [vmem:[%s9337_s1 + $0x28] sm:$0xff]   ;;  %p218_p10 = scmp.lt.s32.totalorder %s6114_s22, 3  ;;  %vm569_vm2 = vcmask 1045504  }
  0x15   : > { %v5822_v2 = vld [vmem:[%s9337_s1 + $0xf8] sm:$0xff]   ;;  %4738 = vmatpush3.bf16.msra.mxu0 %v5821_v1  ;;  %v5826_v10 = vld [vmem:[%s9337_s1 + $0xf0] sm:$0xff]   ;;  %v5830_v18 = vld [vmem:[%s9337_s1 + $0xe8] sm:$0xff]   ;;  %vm6059_vm4 = vmmov 1   ;;  %v9375_v46 = vmov 0  ;;  %s215_s13 = sand.u32 1, %s6048_s19  }
  0x16   : > { %v5823_v5 = vld [vmem:[%s9337_s1 + $0xb8] sm:$0xff]   ;;  %4849 = vmatprep.subr.bf16.mxu1 %v5822_v2  ;;  %v6160_v7 = vsel %vm289_vm0, 0.0, %v6150_v4  ;;  %v6167_v9 = vsel %vm289_vm0, %v6150_v4, 0.0  ;;  %4739 = vmatprep.subr.bf16.mxu0 %v5824_v6  ;;  %v5827_v12 = vld [vmem:[%s9337_s1 + $0xb0] sm:$0xff]   ;;  %v458_v13 = vrot.slane %v6150_v4, 1  ;;  %v5831_v20 = vld [vmem:[%s9337_s1 + $0xa8] sm:$0xff]   ;;  %v6259_v44 = vpack.c.bf16 %v6150_v4, %v6150_v4 }
  0x17   : > { %4850 = vmatpush3.bf16.msra.mxu1 %v5823_v5  ;;  %v457_v11 = vrot.slane %v6160_v7, 1  ;;  %v460_v15 = vrot.slane %v6167_v9, 1  ;;  %v5832_v22 = vld [vmem:[%s9337_s1 + $0x60] sm:$0xff]   ;;  %v5836_v26 = vld [vmem:[%s9337_s1 + $0x58] sm:$0xff]   ;;  %v5840_v30 = vld [vmem:[%s9337_s1 + $0x50] sm:$0xff]   ;;  %s219_s30 = scalar_select %p218_p10, %s6114_s22, 3 }
  0x18   : > { %4851 = vmatprep.subr.bf16.mxu1 %v5826_v10  ;;  %v5833_v23 = vld [vmem:[%s9337_s1 + $0x20] sm:$0xff]   ;;  %v5837_v27 = vld [vmem:[%s9337_s1 + $0x18] sm:$0xff]   ;;  %v5841_v31 = vld [vmem:[%s9337_s1 + $0x10] sm:$0xff]   ;;  %v570_v37 = vrot.slane %v6160_v7, 2  ;;  %v571_v40 = vrot.slane %v6150_v4, 2  ;;  %v573_v42 = vrot.slane %v6167_v9, 2 }
  0x19   : > { %4740 = vmatpush3.bf16.msra.mxu0 %v5825_v8  ;;  %v459_v17 = vsel %vm456_vm1, %v457_v11, %v458_v13  ;;  %v461_v19 = vsel %vm456_vm1, %v458_v13, %v460_v15  ;;  %v5834_v24 = vld [vmem:[%s9337_s1 + $0xe0] sm:$0xff]   ;;  %v5838_v28 = vld [vmem:[%s9337_s1 + $0xd8] sm:$0xff]   ;;  %v5842_v32 = vld [vmem:[%s9337_s1 + $0xd0] sm:$0xff]   ;;  %s4735_s14 = sshll.u32 %s219_s30, 8  ;;  %9374 = vst [vmem:[#allocation6_spill] sm:$0xff] %v6259_v44  ;;  %s4736_s16 = sshll.u32 %s6114_s22, 12 }
  0x1a   : > { %4741 = vmatprep.subr.bf16.mxu0 %v5828_v14  ;;  %v6192_v21 = vpack.c.bf16 %v461_v19, %v459_v17  ;;  %v5835_v25 = vld [vmem:[%s9337_s1 + $0xa0] sm:$0xff]   ;;  %v5839_v29 = vld [vmem:[%s9337_s1 + $0x98] sm:$0xff]   ;;  %v5843_v33 = vld [vmem:[%s9337_s1 + $0x90] sm:$0xff]   ;;  %s6264_s7 = scalar_lea.vmem %s9336_s0, %s4735_s14  ;;  %v572_v49 = vsel %vm569_vm2, %v570_v37, %v571_v40  ;;  %v574_v50 = vsel %vm569_vm2, %v571_v40, %v573_v42  ;;  %s4197_s14 = sshll.u32 %s215_s13, 8 }
  0x1b   : > { %4852 = vmatpush3.bf16.msra.mxu1 %v5827_v12  ;;  %v5844_v34 = vld [vmem:[%s9337_s1 + $0x48] sm:$0xff]   ;;  %v5848_v39 = vld [vmem:[%s9337_s1 + $0x40] sm:$0xff]   ;;  %vm4273_vm3 = vmneg %vm289_vm0  ;;  %v6289_v57 = vpack.c.bf16 %v574_v50, %v572_v49  ;;  %s9127_s15 = scalar_lea.vmem [#allocation2], %s4197_s14  ;;  %s9288_s26 = scalar_lea.hbm %s9341_s5, %s4736_s16 }
  0x1c   : > { %9373 = vst [vmem:[#allocation5_spill] sm:$0xff] %v6192_v21  ;;  %4853 = vmatprep.subr.bf16.mxu1 %v5830_v18  ;;  %1364 = vmatprep.mubr.bf16.mxu0 %v6192_v21  ;;  %v5845_v35 = vld [vmem:[%s9337_s1 + $0x8] sm:$0xff]   ;;  %v5849_v41 = vld [vmem:[%s9337_s1] sm:$0xff]   ;;  %vm6270_vm5 = vmpackc.low %vm6059_vm4, %vm4273_vm3  ;;  %s4131_s17 = sshll.u32 %s9127_s15, 4  ;;  %s9296_s22 = scalar_lea.sflag [#allocation3], %s215_s13  ;;  %s9290_s17 = int_to_ptr.vmem [resolvable:$true] %s4131_s17 }
  0x1d   : > { %4742 = vmatpush3.bf16.msra.mxu0 %v5829_v16  ;;  %v5846_v36 = vld [vmem:[%s9337_s1 + $0xc8] sm:$0xff]   ;;  %v5850_v43 = vld [vmem:[%s9337_s1 + $0xc0] sm:$0xff]   ;;  %v9376_v46 = vsel %vm6270_vm5, 4294967295, %v9375_v46  ;;  %v5852_v47 = vld [vmem:[%s9337_s1 + $0x178] sm:$0xff]   ;;  %9378 = vst [vmem:[#allocation8_spill] sm:$0xff] %v6289_v57  ;;  %s5996_s30 = scalar_lea.vmem %s9290_s17, 4096 }
  0x1e   : > { %4743 = vmatprep.subr.bf16.mxu0 %v5832_v22  ;;  %v5847_v38 = vld [vmem:[%s9337_s1 + $0x88] sm:$0xff]   ;;  %v5851_v45 = vld [vmem:[%s9337_s1 + $0x80] sm:$0xff]   ;;  %9377 = vst [vmem:[#allocation7_spill] sm:$0xff] %v9376_v46  ;;  %v5853_v54 = vld [vmem:[%s9337_s1 + $0x138] sm:$0xff]   ;;  %p5997_p11 = scmp.ne.s32.totalorder %s9290_s17, %s5996_s30 }
  0x1f   : > { %4854 = vmatpush3.bf16.msra.mxu1 %v5831_v20  ;;  %v224_v48 = vld [vmem:[%s6264_s7] sm:$0xff]  ;;  %v225_v51 = vld [vmem:[%s6264_s7 + $0x8] sm:$0xff]  ;;  %v226_v55 = vld [vmem:[%s6264_s7 + $0x10] sm:$0xff] }
  0x20   : > { %4855 = vmatprep.subr.bf16.mxu1 %v5834_v24  ;;  %v292_v52 = vrot.slane %v224_v48, 7  ;;  %v293_v53 = vrot.slane %v225_v51, 7  ;;  %v227_v56 = vld [vmem:[%s6264_s7 + $0x18] sm:$0xff]  ;;  %v295_v59 = vrot.slane %v226_v55, 7  ;;  %v5854_v61 = vld [vmem:[%s9337_s1 + $0x170] sm:$0xff]   ;;  %v228_v2 = vld [vmem:[%s6264_s7 + $0x20] sm:$0xff]  ;;  %p5998_p12 = pnand %p5997_p11, %p6131_p5 }
  0x21   : > { %4744 = vmatpush3.bf16.msra.mxu0 %v5833_v23  ;;  %v296_v60 = vrot.slane %v227_v56, 7  ;;  %v229_v7 = vld [vmem:[%s6264_s7 + $0x28] sm:$0xff]  ;;  %v5855_v12 = vld [vmem:[%s9337_s1 + $0x130] sm:$0xff]   ;;  %v298_v24 = vrot.slane %v228_v2, 7  ;;  %v232_v50 = vld [vmem:[%s6264_s7 + $0x40] sm:$0xff] }
  0x22   : > { %4745 = vmatprep.subr.bf16.mxu0 %v5836_v26  ;;  %v391_v58 = vsel %vm289_vm0, 0.0, %v292_v52  ;;  %v294_v62 = vsel %vm289_vm0, %v292_v52, %v293_v53  ;;  %v408_v63 = vsel %vm289_vm0, %v293_v53, 0.0  ;;  %v392_v10 = vsel %vm289_vm0, 0.0, %v295_v59  ;;  %v5856_v22 = vld [vmem:[%s9337_s1 + $0x168] sm:$0xff]   ;;  %v5859_v51 = vld [vmem:[%s9337_s1 + $0x120] sm:$0xff]   ;;  %v5860_v55 = vld [vmem:[%s9337_s1 + $0x158] sm:$0xff]   ;;  %p5999_p13 = pneg %p5998_p12 }
  0x23   : > { %4856 = vmatpush3.bf16.msra.mxu1 %v5835_v25  ;;  %v462_v0 = vrot.slane %v391_v58, 1  ;;  %v575_v1 = vrot.slane %v391_v58, 2  ;;  %v463_v3 = vrot.slane %v294_v62, 1  ;;  %v576_v4 = vrot.slane %v294_v62, 2 }
  0x24   : > { %4857 = vmatprep.subr.bf16.mxu1 %v5838_v28  ;;  %v4279_v5 = vpack.c.bf16 %v294_v62, %v292_v52  ;;  %v465_v6 = vrot.slane %v408_v63, 1  ;;  %v297_v8 = vsel %vm289_vm0, %v295_v59, %v296_v60  ;;  %v578_v9 = vrot.slane %v408_v63, 2  ;;  %v5857_v28 = vld [vmem:[%s9337_s1 + $0x128] sm:$0xff]  }
  0x25   : > { %4746 = vmatpush3.bf16.msra.mxu0 %v5837_v27  ;;  %v409_v11 = vsel %vm289_vm0, %v296_v60, 0.0  ;;  %v464_v13 = vsel %vm456_vm1, %v462_v0, %v463_v3  ;;  %v6309_v15 = vpack.c.bf16 %v297_v8, %v295_v59  ;;  %v577_v16 = vsel %vm569_vm2, %v575_v1, %v576_v4  ;;  %v5861_v0 = vld [vmem:[%s9337_s1 + $0x118] sm:$0xff]  }
  0x26   : > { %4747 = vmatprep.subr.bf16.mxu0 %v5840_v30  ;;  %4340 = vmatprep.mubr.msk.bf16.mxu1 %vm6270_vm5, %v4279_v5  ;;  %v466_v14 = vsel %vm456_vm1, %v463_v3, %v465_v6  ;;  %v579_v18 = vsel %vm569_vm2, %v576_v4, %v578_v9  ;;  %v467_v19 = vrot.slane %v392_v10, 1  ;;  %v468_v20 = vrot.slane %v297_v8, 1 }
  0x27   : > { %4858 = vmatpush3.bf16.msra.mxu1 %v5839_v29  ;;  %v6313_v17 = vpack.c.bf16 %v466_v14, %v464_v13  ;;  %v470_v23 = vrot.slane %v409_v11, 1  ;;  %v299_v25 = vrot.slane %v229_v7, 7  ;;  %v6323_v26 = vpack.c.bf16 %v579_v18, %v577_v16  ;;  %v5862_v7 = vld [vmem:[%s9337_s1 + $0x150] sm:$0xff]  }
  0x28   : > { %4859 = vmatprep.subr.bf16.mxu1 %v5842_v32  ;;  %v469_v27 = vsel %vm456_vm1, %v467_v19, %v468_v20  ;;  %v581_v37 = vrot.slane %v297_v8, 2  ;;  %v304_v4 = vrot.slane %v232_v50, 7  ;;  %v5863_v13 = vld [vmem:[%s9337_s1 + $0x110] sm:$0xff]  }
  0x29   : > { %4748 = vmatpush3.bf16.msra.mxu0 %v5841_v31  ;;  %v471_v29 = vsel %vm456_vm1, %v468_v20, %v470_v23  ;;  %v300_v30 = vsel %vm289_vm0, %v298_v24, %v299_v25  ;;  %v393_v31 = vsel %vm289_vm0, 0.0, %v298_v24  ;;  %v410_v32 = vsel %vm289_vm0, %v299_v25, 0.0  ;;  %v234_v14 = vld [vmem:[%s6264_s7 + $0x50] sm:$0xff] }
  0x2a   : > { %4749 = vmatprep.subr.bf16.mxu0 %v5844_v34  ;;  %v231_v34 = vld [vmem:[%s6264_s7 + $0x38] sm:$0xff]  ;;  %v6342_v40 = vpack.c.bf16 %v300_v30, %v298_v24  ;;  %v473_v42 = vrot.slane %v300_v30, 1  ;;  %v585_v1 = vrot.slane %v393_v31, 2  ;;  %v586_v2 = vrot.slane %v300_v30, 2 }
  0x2b   : > { %4860 = vmatpush3.bf16.msra.mxu1 %v5843_v33  ;;  %v230_v33 = vld [vmem:[%s6264_s7 + $0x30] sm:$0xff]  ;;  %v588_v3 = vrot.slane %v410_v32, 2 }
  0x2c   : > { %4861 = vmatprep.subr.bf16.mxu1 %v5846_v36  ;;  %v580_v36 = vrot.slane %v392_v10, 2  ;;  %v587_v16 = vsel %vm569_vm2, %v585_v1, %v586_v2 }
  0x2d   : > { %4750 = vmatpush3.bf16.msra.mxu0 %v5845_v35  ;;  %v6337_v35 = vpack.c.bf16 %v471_v29, %v469_v27  ;;  %v589_v18 = vsel %vm569_vm2, %v586_v2, %v588_v3  ;;  %v5864_v27 = vld [vmem:[%s9337_s1 + $0x148] sm:$0xff]  }
  0x2e   : > { %4751 = vmatprep.subr.bf16.mxu0 %v5848_v39  ;;  %v5858_v39 = vld [vmem:[%s9337_s1 + $0x160] sm:$0xff]   ;;  %v582_v52 = vsel %vm569_vm2, %v580_v36, %v581_v37  ;;  %v6423_v29 = vpack.c.bf16 %v589_v18, %v587_v16 }
  0x2f   : > { %4862 = vmatpush3.bf16.msra.mxu1 %v5847_v38  ;;  %v583_v38 = vrot.slane %v409_v11, 2  ;;  %v6393_v11 = vsel %vm289_vm0, 0.0, %v304_v4  ;;  %v240_v18 = vld [vmem:[%s6264_s7 + $0x80] sm:$0xff] }
  0x30   : > { %4863 = vmatprep.subr.bf16.mxu1 %v5850_v43  ;;  %v475_v43 = vrot.slane %v410_v32, 1  ;;  %v482_v23 = vrot.slane %v6393_v11, 1 }
  0x31   : > { %4752 = vmatpush3.bf16.msra.mxu0 %v5849_v41  ;;  %v472_v41 = vrot.slane %v393_v31, 1  ;;  %v584_v56 = vsel %vm569_vm2, %v581_v37, %v583_v38  ;;  %v5865_v31 = vld [vmem:[%s9337_s1 + $0x108] sm:$0xff]  }
  0x32   : > { %4961 = vmatprep.subr.bf16.mxu0 %v5852_v47  ;;  %v302_v47 = vrot.slane %v231_v34, 7  ;;  %v476_v49 = vsel %vm456_vm1, %v473_v42, %v475_v43  ;;  %v5867_v43 = vld [vmem:[%s9337_s1 + $0x1b8] sm:$0xff]  }
  0x33   : > { %4864 = vmatpush3.bf16.msra.mxu1 %v5851_v45  ;;  %v301_v45 = vrot.slane %v230_v33, 7  ;;  %v474_v48 = vsel %vm456_vm1, %v472_v41, %v473_v42  ;;  %v5866_v42 = vld [vmem:[%s9337_s1 + $0x1f8] sm:$0xff]  }
  0x34   : > { %4276 = vmatmul.mubr.msk.bf16.vlgmr.msra.gmra.mxu0 %vm6270_vm5, %v6259_v44  ;;  %v6353_v53 = vpack.c.bf16 %v476_v49, %v474_v48  ;;  %v6369_v59 = vsel %vm289_vm0, %v302_v47, 0.0  ;;  %5073 = vmatprep.subr.bf16.mxu1 %v5866_v42  ;;  %v5868_v48 = vld [vmem:[%s9337_s1 + $0x1f0] sm:$0xff]   ;;  %v243_v42 = vld [vmem:[%s6264_s7 + $0x98] sm:$0xff] }
  0x35   : > { %4962 = vmatpush3.bf16.msra.mxu0 %v5853_v54  ;;  %1372 = vmatprep.mubr.bf16.mxu0 %v6313_v17  ;;  %v6356_v54 = vsel %vm289_vm0, 0.0, %v301_v45  ;;  %v6366_v58 = vsel %vm289_vm0, %v301_v45, %v302_v47  ;;  %v480_v63 = vrot.slane %v6369_v59, 1  ;;  %v593_v34 = vrot.slane %v6369_v59, 2  ;;  %v236_v47 = vld [vmem:[%s6264_s7 + $0x60] sm:$0xff] }
  0x36   : > { %4963 = vmatprep.subr.bf16.mxu0 %v5854_v61  ;;  %1526 = vmatmul.mubr.bf16.vlgmr.msra.gmra.mxu1 %v6289_v57  ;;  %v477_v60 = vrot.slane %v6356_v54, 1  ;;  %v233_v61 = vld [vmem:[%s6264_s7 + $0x48] sm:$0xff]  ;;  %v478_v62 = vrot.slane %v6366_v58, 1  ;;  %v6388_v8 = vpack.c.bf16 %v6366_v58, %v301_v45  ;;  %v590_v32 = vrot.slane %v6356_v54, 2  ;;  %v252_v57 = vld [vmem:[%s6264_s7 + $0xe0] sm:$0xff] }
  0x37   : > { %4344 = vmatprep.mubr.msk.bf16.mxu1 %vm6270_vm5, %v6309_v15  ;;  %v305_v6 = vrot.slane %v233_v61, 7  ;;  %v591_v33 = vrot.slane %v6366_v58, 2  ;;  %v237_v54 = vld [vmem:[%s6264_s7 + $0x68] sm:$0xff]  ;;  %v595_v58 = vrot.slane %v6393_v11, 2  ;;  %5074 = vmatpush3.bf16.msra.mxu1 %v5867_v43  ;;  %v5869_v61 = vld [vmem:[%s9337_s1 + $0x1b0] sm:$0xff]   ;;  %v5873_v43 = vld [vmem:[%s9337_s1 + $0x1a0] sm:$0xff]  }
  0x38   : > { %v479_v9 = vsel %vm456_vm1, %v477_v60, %v478_v62  ;;  %v481_v10 = vsel %vm456_vm1, %v478_v62, %v480_v63  ;;  %v238_v60 = vld [vmem:[%s6264_s7 + $0x70] sm:$0xff]  ;;  %5075 = vmatprep.subr.bf16.mxu1 %v5868_v48  ;;  %v5870_v63 = vld [vmem:[%s9337_s1 + $0x1e8] sm:$0xff]   ;;  %v311_v1 = vrot.slane %v237_v54, 7  ;;  %v5876_v48 = vld [vmem:[%s9337_s1 + $0x1d8] sm:$0xff]   ;;  %v6557_v54 = vrot.slane %v240_v18, 7 }
  0x39   : > { %4964 = vmatpush3.bf16.msra.mxu0 %v5855_v12  ;;  %v6396_v12 = vsel %vm289_vm0, %v305_v6, 0.0  ;;  %v6405_v19 = vpack.c.bf16 %v481_v10, %v479_v9  ;;  %v6408_v20 = vsel %vm289_vm0, %v304_v4, %v305_v6  ;;  %v239_v6 = vld [vmem:[%s6264_s7 + $0x78] sm:$0xff]  ;;  %v6502_v16 = vrot.slane %v238_v60, 7 }
  0x3a   : > { %4965 = vmatprep.subr.bf16.mxu0 %v5856_v22  ;;  %v235_v22 = vld [vmem:[%s6264_s7 + $0x58] sm:$0xff]  ;;  %v483_v24 = vrot.slane %v6408_v20, 1  ;;  %v485_v25 = vrot.slane %v6396_v12, 1  ;;  %v6436_v37 = vpack.c.bf16 %v6408_v20, %v304_v4  ;;  %v596_v59 = vrot.slane %v6408_v20, 2  ;;  %v5872_v20 = vld [vmem:[%s9337_s1 + $0x1e0] sm:$0xff]  }
  0x3b   : > { %v308_v30 = vrot.slane %v235_v22, 7  ;;  %v598_v62 = vrot.slane %v6396_v12, 2  ;;  %v6495_v11 = vsel %vm289_vm0, %v311_v1, 0.0  ;;  %5076 = vmatpush3.bf16.msra.mxu1 %v5869_v61  ;;  %v5871_v12 = vld [vmem:[%s9337_s1 + $0x1a8] sm:$0xff]  }
  0x3c   : > { %4280 = vmatmul.mubr.msk.bf16.gmra.mxu0 %vm6270_vm5, %v4279_v5  ;;  %v6381_v5 = vpack.c.bf16 %v584_v56, %v582_v52  ;;  %v484_v38 = vsel %vm456_vm1, %v482_v23, %v483_v24  ;;  %v594_v56 = vsel %vm569_vm2, %v591_v33, %v593_v34  ;;  %5077 = vmatprep.subr.bf16.mxu1 %v5870_v63  ;;  %v6570_v63 = vsel %vm289_vm0, 0.0, %v6557_v54 }
  0x3d   : > { %4966 = vmatpush3.bf16.msra.mxu0 %v5857_v28  ;;  %1380 = vmatprep.mubr.bf16.mxu0 %v6337_v35  ;;  %v307_v28 = vrot.slane %v234_v14, 7  ;;  %v6441_v41 = vsel %vm289_vm0, %v308_v30, 0.0  ;;  %v599_v14 = vsel %vm569_vm2, %v596_v59, %v598_v62 }
  0x3e   : > { %4967 = vmatprep.subr.bf16.mxu0 %v5858_v39  ;;  %1534 = vmatmul.mubr.bf16.gmra.mxu1 %v6323_v26  ;;  %v486_v39 = vsel %vm456_vm1, %v483_v24, %v485_v25  ;;  %v490_v52 = vrot.slane %v6441_v41, 1  ;;  %v314_v25 = vrot.slane %v239_v6, 7  ;;  %v603_v34 = vrot.slane %v6441_v41, 2  ;;  %v5875_v41 = vld [vmem:[%s9337_s1 + $0x100] sm:$0xff]  }
  0x3f   : > { %4348 = vmatprep.mubr.msk.bf16.mxu1 %vm6270_vm5, %v6342_v40  ;;  %v6433_v36 = vsel %vm289_vm0, 0.0, %v307_v28  ;;  %v6450_v45 = vsel %vm289_vm0, %v307_v28, %v308_v30  ;;  %v6457_v49 = vpack.c.bf16 %v486_v39, %v484_v38  ;;  %v495_v30 = vrot.slane %v6495_v11, 1  ;;  %v242_v39 = vld [vmem:[%s6264_s7 + $0x90] sm:$0xff]  ;;  %5078 = vmatpush3.bf16.msra.mxu1 %v5871_v12 }
  0x40   : > { %v487_v50 = vrot.slane %v6433_v36, 1  ;;  %v600_v9 = vrot.slane %v6433_v36, 2  ;;  %v601_v24 = vrot.slane %v6450_v45, 2  ;;  %5079 = vmatprep.subr.bf16.mxu1 %v5872_v20  ;;  %v320_v12 = vrot.slane %v243_v42, 7  ;;  %v249_v42 = vld [vmem:[%s6264_s7 + $0xc8] sm:$0xff] }
  0x41   : > { %4968 = vmatpush3.bf16.msra.mxu0 %v5859_v51  ;;  %v488_v51 = vrot.slane %v6450_v45, 1  ;;  %v329_v20 = vrot.slane %v249_v42, 7 }
  0x42   : > { %4969 = vmatprep.subr.bf16.mxu0 %v5860_v55  ;;  %v592_v55 = vsel %vm569_vm2, %v590_v32, %v591_v33  ;;  %v241_v32 = vld [vmem:[%s6264_s7 + $0x88] sm:$0xff]  ;;  %v5874_v33 = vld [vmem:[%s9337_s1 + $0x140] sm:$0xff]  }
  0x43   : > { %v6481_v2 = vpack.c.bf16 %v594_v56, %v592_v55  ;;  %v489_v3 = vsel %vm456_vm1, %v487_v50, %v488_v51  ;;  %v491_v4 = vsel %vm456_vm1, %v488_v51, %v490_v52  ;;  %v6554_v51 = vsel %vm289_vm0, %v6502_v16, %v314_v25  ;;  %5080 = vmatpush3.bf16.msra.mxu1 %v5873_v43  ;;  %v246_v43 = vld [vmem:[%s6264_s7 + $0xb0] sm:$0xff] }
  0x44   : > { %4284 = vmatmul.mubr.msk.bf16.gmra.mxu0 %vm6270_vm5, %v6309_v15  ;;  %v6508_v22 = vpack.c.bf16 %v491_v4, %v489_v3  ;;  %v245_v3 = vld [vmem:[%s6264_s7 + $0xa8] sm:$0xff]  ;;  %v5877_v4 = vld [vmem:[%s9337_s1 + $0x198] sm:$0xff]   ;;  %5081 = vmatprep.subr.bf16.mxu1 %v5876_v48  ;;  %v5879_v48 = vld [vmem:[%s9337_s1 + $0x190] sm:$0xff]  }
  0x45   : > { %1388 = vmatprep.mubr.bf16.mxu0 %v6353_v53  ;;  %4970 = vmatpush3.bf16.msra.mxu0 %v5861_v0  ;;  %v310_v0 = vrot.slane %v236_v47, 7  ;;  %v6539_v47 = vsel %vm289_vm0, %v314_v25, 0.0 }
  0x46   : > { %4971 = vmatprep.subr.bf16.mxu0 %v5862_v7  ;;  %1542 = vmatmul.mubr.bf16.gmra.mxu1 %v6381_v5  ;;  %v6488_v7 = vpack.c.bf16 %v6450_v45, %v307_v28  ;;  %v608_v45 = vrot.slane %v6495_v11, 2  ;;  %v500_v61 = vrot.slane %v6539_v47, 1 }
  0x47   : > { %4352 = vmatprep.mubr.msk.bf16.mxu1 %vm6270_vm5, %v6388_v8  ;;  %v6492_v10 = vsel %vm289_vm0, 0.0, %v310_v0  ;;  %v6511_v23 = vsel %vm289_vm0, %v310_v0, %v311_v1  ;;  %v244_v1 = vld [vmem:[%s6264_s7 + $0xa0] sm:$0xff]  ;;  %5082 = vmatpush3.bf16.msra.mxu1 %v5877_v4 }
  0x48   : > { %v493_v28 = vrot.slane %v6511_v23, 1  ;;  %v605_v36 = vrot.slane %v6492_v10, 2  ;;  %v606_v38 = vrot.slane %v6511_v23, 2  ;;  %v6564_v60 = vpack.c.bf16 %v6511_v23, %v310_v0 }
  0x49   : > { %4972 = vmatpush3.bf16.msra.mxu0 %v5863_v13  ;;  %v597_v13 = vsel %vm569_vm2, %v595_v58, %v596_v59  ;;  %v498_v58 = vrot.slane %v6554_v51, 1  ;;  %v317_v59 = vrot.slane %v241_v32, 7  ;;  %v6580_v0 = vrot.slane %v242_v39, 7 }
  0x4a   : > { %4973 = vmatprep.subr.bf16.mxu0 %v5864_v27  ;;  %v492_v27 = vrot.slane %v6492_v10, 1  ;;  %v6550_v50 = vpack.c.bf16 %v599_v14, %v597_v13  ;;  %v496_v56 = vsel %vm456_vm1, %v493_v28, %v495_v30  ;;  %9379 = vst [vmem:[#allocation9_spill] sm:$0xff] %v6564_v60  ;;  %v5878_v13 = vld [vmem:[%s9337_s1 + $0x1d0] sm:$0xff]   ;;  %v602_v14 = vsel %vm569_vm2, %v600_v9, %v601_v24 }
  0x4b   : > { %v6578_v6 = vsel %vm289_vm0, %v317_v59, 0.0  ;;  %v6598_v30 = vsel %vm289_vm0, 0.0, %v6580_v0  ;;  %v6601_v9 = vsel %vm289_vm0, %v320_v12, 0.0  ;;  %v604_v32 = vsel %vm569_vm2, %v601_v24, %v603_v34  ;;  %5083 = vmatprep.subr.bf16.mxu1 %v5878_v13 }
  0x4c   : > { %4288 = vmatmul.mubr.msk.bf16.gmra.mxu0 %vm6270_vm5, %v6342_v40  ;;  %v494_v55 = vsel %vm456_vm1, %v492_v27, %v493_v28  ;;  %v6593_v27 = vsel %vm289_vm0, %v6557_v54, %v317_v59  ;;  %v502_v28 = vrot.slane %v6570_v63, 1  ;;  %v505_v39 = vrot.slane %v6578_v6, 1  ;;  %v5880_v59 = vld [vmem:[%s9337_s1 + $0x1c8] sm:$0xff]   ;;  %5084 = vmatpush3.bf16.msra.mxu1 %v5879_v48 }
  0x4d   : > { %1396 = vmatprep.mubr.bf16.mxu0 %v6405_v19  ;;  %4974 = vmatpush3.bf16.msra.mxu0 %v5865_v31  ;;  %v6520_v31 = vsel %vm289_vm0, 0.0, %v6502_v16  ;;  %v6586_v18 = vpack.c.bf16 %v496_v56, %v494_v55  ;;  %v6617_v55 = vsel %vm289_vm0, %v6580_v0, %v320_v12  ;;  %v6620_v24 = vrot.slane %v244_v1, 7 }
  0x4e   : > { %1550 = vmatmul.mubr.bf16.gmra.mxu1 %v6423_v29  ;;  %4975 = vmatprep.subr.bf16.mxu0 %v5874_v33  ;;  %v497_v52 = vrot.slane %v6520_v31, 1  ;;  %v503_v33 = vrot.slane %v6593_v27, 1  ;;  %v323_v34 = vrot.slane %v245_v3, 7  ;;  %v6632_v3 = vpack.c.bf16 %v604_v32, %v602_v14  ;;  %v248_v32 = vld [vmem:[%s6264_s7 + $0xc0] sm:$0xff] }
  0x4f   : > { %4356 = vmatprep.mubr.msk.bf16.mxu1 %vm6270_vm5, %v6436_v37  ;;  %v6637_v13 = vpack.c.bf16 %v6554_v51, %v6502_v16  ;;  %v6642_v25 = vsel %vm289_vm0, 0.0, %v6620_v24  ;;  %v501_v12 = vsel %vm456_vm1, %v498_v58, %v500_v61  ;;  %v6656_v56 = vrot.slane %v246_v43, 7  ;;  %5085 = vmatprep.subr.bf16.mxu1 %v5880_v59 }
  0x50   : > { %v499_v4 = vsel %vm456_vm1, %v497_v52, %v498_v58  ;;  %v6648_v14 = vsel %vm289_vm0, %v323_v34, 0.0  ;;  %v6654_v16 = vsel %vm289_vm0, %v6620_v24, %v323_v34  ;;  %v5881_v52 = vld [vmem:[%s9337_s1 + $0x188] sm:$0xff]   ;;  %v6664_v58 = vld [vmem:[%s9337_s1 + $0x238] sm:$0xff]   ;;  %v607_v61 = vsel %vm569_vm2, %v605_v36, %v606_v38  ;;  %v5882_v34 = vld [vmem:[%s9337_s1 + $0x1c0] sm:$0xff]  }
  0x51   : > { %4976 = vmatpush3.bf16.msra.mxu0 %v5875_v41  ;;  %v247_v41 = vld [vmem:[%s6264_s7 + $0xb8] sm:$0xff]  ;;  %9380 = vst [vmem:[#allocation10_spill] sm:$0xff] %v6637_v13  ;;  %v609_v10 = vsel %vm569_vm2, %v606_v38, %v608_v45  ;;  %v6683_v36 = vpack.c.bf16 %v501_v12, %v499_v4  ;;  %v6687_v59 = vsel %vm289_vm0, 0.0, %v6656_v56  ;;  %v504_v11 = vsel %vm456_vm1, %v502_v28, %v503_v33  ;;  %v250_v4 = vld [vmem:[%s6264_s7 + $0xd0] sm:$0xff]  ;;  %v5883_v28 = vld [vmem:[%s9337_s1 + $0x180] sm:$0xff]  }
  0x52   : > { %v326_v62 = vrot.slane %v247_v41, 7  ;;  %5681 = vmatprep.subr.bf16.mxu0 %v6664_v58  ;;  %v506_v23 = vsel %vm456_vm1, %v503_v33, %v505_v39  ;;  %v251_v12 = vld [vmem:[%s6264_s7 + $0xd8] sm:$0xff]  ;;  %v6707_v48 = vrot.slane %v248_v32, 7  ;;  %5086 = vmatpush3.bf16.msra.mxu1 %v5881_v52  ;;  %v6720_v42 = vpack.c.bf16 %v609_v10, %v607_v61 }
  0x53   : > { %9381 = vst [vmem:[#allocation11_spill] sm:$0xff] %v6683_v36  ;;  %5087 = vmatprep.subr.bf16.mxu1 %v5882_v34  ;;  %v6725_v52 = vpack.c.bf16 %v6593_v27, %v6557_v54  ;;  %v9382_v41 = vrot.slane %v6554_v51, 2  ;;  %v9384_v61 = vrot.slane %v6539_v47, 2  ;;  %v6744_v45 = vsel %vm289_vm0, %v329_v20, 0.0 }
  0x54   : > { %4292 = vmatmul.mubr.msk.bf16.gmra.mxu0 %vm6270_vm5, %v6388_v8  ;;  %v6690_v43 = vsel %vm289_vm0, %v326_v62, 0.0  ;;  %v6704_v1 = vsel %vm289_vm0, %v6656_v56, %v326_v62  ;;  %v6730_v33 = vsel %vm289_vm0, 0.0, %v6707_v48  ;;  %v9383_v62 = vrot.slane %v6520_v31, 2 }
  0x55   : > { %1404 = vmatprep.mubr.bf16.mxu0 %v6457_v49  ;;  %v9385_v10 = vmov %v9382_v41  ;;  %v6746_v39 = vpack.c.bf16 %v506_v23, %v504_v11  ;;  %v6750_v38 = vsel %vm289_vm0, %v6707_v48, %v329_v20  ;;  %v6752_v31 = vrot.slane %v250_v4, 7 }
  0x56   : > { %1558 = vmatmul.mubr.bf16.gmra.mxu1 %v6481_v2  ;;  %v612_v34 = vsel %vm569_vm2, %v9383_v62, %v9382_v41  ;;  %v614_v32 = vsel %vm569_vm2, %v9385_v10, %v9384_v61  ;;  %v332_v41 = vrot.slane %v251_v12, 7  ;;  %v253_v62 = vld [vmem:[%s6264_s7 + $0xe8] sm:$0xff]  ;;  %v6758_v10 = vrot.slane %v252_v57, 7 }
  0x57   : > { %4360 = vmatprep.mubr.msk.bf16.mxu1 %vm6270_vm5, %v6488_v7  ;;  %9386 = vst [vmem:[#allocation12_spill] sm:$0xff] %v6746_v39  ;;  %5088 = vmatpush3.bf16.msra.mxu1 %v5883_v28  ;;  %v525_v11 = vrot.slane %v6744_v45, 1  ;;  %v6766_v4 = vsel %vm289_vm0, 0.0, %v6752_v31  ;;  %v6778_v28 = vpack.c.bf16 %v614_v32, %v612_v34  ;;  %v6782_v20 = vpack.c.bf16 %v6617_v55, %v6580_v0 }
  0x58   : > { %v6772_v12 = vsel %vm289_vm0, %v332_v41, 0.0  ;;  %v6776_v57 = vsel %vm289_vm0, 0.0, %v6758_v10  ;;  %v6786_v23 = vsel %vm289_vm0, %v6752_v31, %v332_v41  ;;  %v527_v54 = vrot.slane %v6766_v4, 1 }
  0x59   : > { %v528_v51 = vrot.slane %v6786_v23, 1  ;;  %v335_v32 = vrot.slane %v253_v62, 7  ;;  %v530_v0 = vrot.slane %v6772_v12, 1  ;;  %v9387_v44 = vrot.slane %v6617_v55, 1 }
  0x5a   : > { %v9388_v21 = vrot.slane %v6598_v30, 1  ;;  %v532_v34 = vrot.slane %v6776_v57, 1 }
  0x5b   : > { %v9390_v62 = vmov %v9387_v44 }
  0x5c   : > { %4296 = vmatmul.mubr.msk.bf16.gmra.mxu0 %vm6270_vm5, %v6436_v37  ;;  %v509_v47 = vsel %vm456_vm1, %v9388_v21, %v9387_v44  ;;  %v9391_v21 = vrot.slane %v6593_v27, 2  ;;  %v9392_v44 = vrot.slane %v6570_v63, 2  ;;  %v9395_v63 = vrot.slane %v6654_v16, 1 }
  0x5d   : > { %1412 = vmatprep.mubr.bf16.mxu0 %v6508_v22 }
  0x5e   : > { %1566 = vmatmul.mubr.bf16.gmra.mxu1 %v6550_v50  ;;  %v617_v41 = vsel %vm569_vm2, %v9392_v44, %v9391_v21  ;;  %v9398_v44 = vmov %v9395_v63 }
  0x5f   : > { %4364 = vmatprep.mubr.msk.bf16.mxu1 %vm6270_vm5, %v6564_v60 }
  0x64   : > { %4300 = vmatmul.mubr.msk.bf16.gmra.mxu0 %vm6270_vm5, %v6488_v7 }
  0x65   : > { %1420 = vmatprep.mubr.bf16.mxu0 %v6586_v18 }
  0x66   : > { %1574 = vmatmul.mubr.bf16.gmra.mxu1 %v6632_v3 }
  0x67   : > { %4368 = vmatprep.mubr.msk.bf16.mxu1 %vm6270_vm5, %v6637_v13 }
  0x6c   : > { %4304 = vmatmul.mubr.msk.bf16.gmra.mxu0 %vm6270_vm5, %v6564_v60 }
  0x6d   : > { %1428 = vmatprep.mubr.bf16.mxu0 %v6683_v36  ;;  %v6810_v36 = vsel %vm289_vm0, %v335_v32, 0.0 }
  0x6e   : > { %1582 = vmatmul.mubr.bf16.gmra.mxu1 %v6720_v42 }
  0x6f   : > { %4372 = vmatprep.mubr.msk.bf16.mxu1 %vm6270_vm5, %v6725_v52 }
  0x74   : > { %4308 = vmatmul.mubr.msk.bf16.gmra.mxu0 %vm6270_vm5, %v6637_v13  ;;  %v9389_v13 = vrot.slane %v6601_v9, 1 }
  0x75   : > { %1436 = vmatprep.mubr.bf16.mxu0 %v6746_v39 }
  0x76   : > { %v511_v39 = vsel %vm456_vm1, %v9390_v62, %v9389_v13  ;;  %1590 = vmatmul.mubr.bf16.gmra.mxu1 %v6778_v28  ;;  %v9393_v13 = vrot.slane %v6578_v6, 2  ;;  %v9394_v62 = vmov %v9391_v21  ;;  %v9396_v6 = vrot.slane %v6642_v25, 1 }
  0x77   : > { %v6814_v61 = vpack.c.bf16 %v511_v39, %v509_v47  ;;  %4376 = vmatprep.mubr.msk.bf16.mxu1 %vm6270_vm5, %v6782_v20  ;;  %v6837_v47 = vpack.c.bf16 %v6654_v16, %v6620_v24  ;;  %v9397_v21 = vrot.slane %v6648_v14, 1  ;;  %v9399_v24 = vrot.slane %v6617_v55, 2 }
  0x78   : > { %v619_v60 = vsel %vm569_vm2, %v9394_v62, %v9393_v13  ;;  %v514_v27 = vsel %vm456_vm1, %v9396_v6, %v9395_v63  ;;  %v9401_v63 = vrot.slane %v6601_v9, 2  ;;  %v9404_v9 = vrot.slane %v6687_v59, 1 }
  0x79   : > { %v6832_v39 = vpack.c.bf16 %v619_v60, %v617_v41  ;;  %v516_v13 = vsel %vm456_vm1, %v9398_v44, %v9397_v21  ;;  %v9400_v41 = vrot.slane %v6598_v30, 2  ;;  %v9402_v6 = vmov %v9399_v24 }
  0x7a   : > { %v6850_v60 = vpack.c.bf16 %v516_v13, %v514_v27  ;;  %v624_v21 = vsel %vm569_vm2, %v9402_v6, %v9401_v63  ;;  %v6873_v44 = vpack.c.bf16 %v6704_v1, %v6656_v56  ;;  %v9403_v30 = vrot.slane %v6704_v1, 1 }
  0x7b   : > { %v622_v62 = vsel %vm569_vm2, %v9400_v41, %v9399_v24  ;;  %v9405_v13 = vrot.slane %v6690_v43, 1  ;;  %v6890_v56 = vsel %vm289_vm0, %v6758_v10, %v335_v32  ;;  %v9407_v63 = vrot.slane %v6654_v16, 2 }
  0x7c   : > { %4312 = vmatmul.mubr.msk.bf16.gmra.mxu0 %vm6270_vm5, %v6725_v52  ;;  %v6868_v27 = vpack.c.bf16 %v624_v21, %v622_v62  ;;  %v519_v55 = vsel %vm456_vm1, %v9404_v9, %v9403_v30  ;;  %v9406_v24 = vmov %v9403_v30  ;;  %v9408_v6 = vrot.slane %v6642_v25, 2 }
  0x7d   : > { %1444 = vmatprep.mubr.bf16.mxu0 %v6814_v61  ;;  %v521_v41 = vsel %vm456_vm1, %v9406_v24, %v9405_v13  ;;  %v9409_v30 = vrot.slane %v6648_v14, 2  ;;  %v9410_v9 = vmov %v9407_v63  ;;  %v533_v13 = vrot.slane %v6890_v56, 1 }
  0x7e   : > { %1598 = vmatmul.mubr.bf16.gmra.mxu1 %v6832_v39  ;;  %v6886_v62 = vpack.c.bf16 %v521_v41, %v519_v55  ;;  %v627_v21 = vsel %vm569_vm2, %v9408_v6, %v9407_v63  ;;  %v535_v32 = vrot.slane %v6810_v36, 1  ;;  %v6915_v25 = vpack.c.bf16 %v6750_v38, %v6707_v48 }
  0x7f   : > { %4380 = vmatprep.mubr.msk.bf16.mxu1 %vm6270_vm5, %v6837_v47  ;;  %v629_v55 = vsel %vm569_vm2, %v9410_v9, %v9409_v30  ;;  %v9411_v14 = vrot.slane %v6750_v38, 1  ;;  %v9412_v16 = vrot.slane %v6730_v33, 1  ;;  %v9414_v48 = vrot.slane %v6704_v1, 2 }
  0x80   : > { %v6910_v24 = vpack.c.bf16 %v629_v55, %v627_v21  ;;  %v9415_v30 = vrot.slane %v6687_v59, 2  ;;  %v9416_v55 = vrot.slane %v6690_v43, 2  ;;  %v6951_v59 = vpack.c.bf16 %v6786_v23, %v6752_v31 }
  0x81   : > { %v524_v41 = vsel %vm456_vm1, %v9412_v16, %v9411_v14  ;;  %v9413_v63 = vmov %v9411_v14  ;;  %v9417_v14 = vmov %v9414_v48  ;;  %v529_v43 = vsel %vm456_vm1, %v527_v54, %v528_v51 }
  0x82   : > { %v526_v6 = vsel %vm456_vm1, %v9413_v63, %v525_v11  ;;  %v632_v9 = vsel %vm569_vm2, %v9415_v30, %v9414_v48  ;;  %v634_v11 = vsel %vm569_vm2, %v9417_v14, %v9416_v55  ;;  %v255_v63 = vld [vmem:[%s6264_s7 + $0xf8] sm:$0xff]  ;;  %v531_v1 = vsel %vm456_vm1, %v528_v51, %v530_v0 }
  0x83   : > { %v6926_v21 = vpack.c.bf16 %v526_v6, %v524_v41  ;;  %v6944_v16 = vpack.c.bf16 %v634_v11, %v632_v9  ;;  %v254_v41 = vld [vmem:[%s6264_s7 + $0xf0] sm:$0xff]  ;;  %v6956_v6 = vpack.c.bf16 %v531_v1, %v529_v43  ;;  %v9418_v48 = vrot.slane %v6750_v38, 2 }
  0x84   : > { %4316 = vmatmul.mubr.msk.bf16.gmra.mxu0 %vm6270_vm5, %v6782_v20  ;;  %v9419_v30 = vrot.slane %v6730_v33, 2  ;;  %v9420_v31 = vrot.slane %v6744_v45, 2  ;;  %v337_v0 = vrot.slane %v254_v41, 7  ;;  %v338_v55 = vrot.slane %v255_v63, 7 }
  0x85   : > { %1452 = vmatprep.mubr.bf16.mxu0 %v6850_v60  ;;  %v9421_v54 = vmov %v9418_v48  ;;  %v6979_v33 = vpack.c.bf16 %v6890_v56, %v6758_v10  ;;  %v534_v45 = vsel %vm456_vm1, %v532_v34, %v533_v13  ;;  %v536_v38 = vsel %vm456_vm1, %v533_v13, %v535_v32 }
  0x86   : > { %1606 = vmatmul.mubr.bf16.gmra.mxu1 %v6868_v27  ;;  %v637_v9 = vsel %vm569_vm2, %v9419_v30, %v9418_v48  ;;  %v639_v51 = vsel %vm569_vm2, %v9421_v54, %v9420_v31  ;;  %v9422_v11 = vrot.slane %v6786_v23, 2  ;;  %v9423_v41 = vrot.slane %v6766_v4, 2 }
  0x87   : > { %4384 = vmatprep.mubr.msk.bf16.mxu1 %vm6270_vm5, %v6873_v44  ;;  %v6974_v14 = vpack.c.bf16 %v639_v51, %v637_v9  ;;  %v6989_v43 = vpack.c.bf16 %v536_v38, %v534_v45  ;;  %v9424_v10 = vrot.slane %v6772_v12, 2  ;;  %v339_v32 = vsel %vm289_vm0, %v337_v0, %v338_v55 }
  0x88   : > { %v642_v63 = vsel %vm569_vm2, %v9423_v41, %v9422_v11  ;;  %v9425_v34 = vmov %v9422_v11  ;;  %v406_v1 = vsel %vm289_vm0, 0.0, %v337_v0  ;;  %v423_v4 = vsel %vm289_vm0, %v338_v55, 0.0 }
  0x89   : > { %v644_v13 = vsel %vm569_vm2, %v9425_v34, %v9424_v10  ;;  %v645_v48 = vrot.slane %v6776_v57, 2  ;;  %v684_v30 = vrot.slane %v406_v1, 1  ;;  %v685_v9 = vrot.slane %v339_v32, 1 }
  0x8a   : > { %v687_v31 = vrot.slane %v423_v4, 1  ;;  %v7006_v12 = vpack.c.bf16 %v644_v13, %v642_v63  ;;  %v7011_v51 = vpack.c.bf16 %v339_v32, %v337_v0  ;;  %v646_v55 = vrot.slane %v6890_v56, 2  ;;  %v5885_v13 = vld [vmem:[%s9337_s1 + $0x230] sm:$0xff]  }
  0x8b   : > { %v686_v23 = vsel %vm456_vm1, %v684_v30, %v685_v9  ;;  %v648_v57 = vrot.slane %v6810_v36, 2  ;;  %v691_v38 = vrot.slane %v406_v1, 2  ;;  %v692_v11 = vrot.slane %v339_v32, 2  ;;  %v5886_v32 = vld [vmem:[%s9337_s1 + $0x228] sm:$0xff]  }
  0x8c   : > { %4320 = vmatmul.mubr.msk.bf16.gmra.mxu0 %vm6270_vm5, %v6837_v47  ;;  %v688_v54 = vsel %vm456_vm1, %v685_v9, %v687_v31  ;;  %v694_v41 = vrot.slane %v423_v4, 2  ;;  %v647_v63 = vsel %vm569_vm2, %v645_v48, %v646_v55 }
  0x8d   : > { %1460 = vmatprep.mubr.bf16.mxu0 %v6886_v62  ;;  %v7015_v45 = vpack.c.bf16 %v688_v54, %v686_v23  ;;  %v649_v0 = vsel %vm569_vm2, %v646_v55, %v648_v57  ;;  %v693_v10 = vsel %vm569_vm2, %v691_v38, %v692_v11 }
  0x8e   : > { %1614 = vmatmul.mubr.bf16.gmra.mxu1 %v6910_v24  ;;  %v695_v56 = vsel %vm569_vm2, %v692_v11, %v694_v41  ;;  %v7030_v34 = vpack.c.bf16 %v649_v0, %v647_v63 }
  0x8f   : > { %4388 = vmatprep.mubr.msk.bf16.mxu1 %vm6270_vm5, %v6915_v25  ;;  %v7028_v36 = vpack.c.bf16 %v695_v56, %v693_v10 }
  0x94   : > { %4324 = vmatmul.mubr.msk.bf16.gmra.mxu0 %vm6270_vm5, %v6873_v44 }
  0x95   : > { %1468 = vmatprep.mubr.bf16.mxu0 %v6926_v21 }
  0x96   : > { %1622 = vmatmul.mubr.bf16.gmra.mxu1 %v6944_v16 }
  0x97   : > { %4392 = vmatprep.mubr.msk.bf16.mxu1 %vm6270_vm5, %v6951_v59 }
  0x9c   : > { %4328 = vmatmul.mubr.msk.bf16.gmra.mxu0 %vm6270_vm5, %v6915_v25 }
  0x9d   : > { %1476 = vmatprep.mubr.bf16.mxu0 %v6956_v6 }
  0x9e   : > { %1630 = vmatmul.mubr.bf16.gmra.mxu1 %v6974_v14 }
  0x9f   : > { %4396 = vmatprep.mubr.msk.bf16.mxu1 %vm6270_vm5, %v6979_v33 }
  0xa4   : > { %4332 = vmatmul.mubr.msk.bf16.gmra.mxu0 %vm6270_vm5, %v6951_v59 }
  0xa5   : > { %1484 = vmatprep.mubr.bf16.mxu0 %v6989_v43 }
  0xa6   : > { %1638 = vmatmul.mubr.bf16.gmra.mxu1 %v7006_v12 }
  0xa7   : > { %4400 = vmatprep.mubr.msk.bf16.mxu1 %vm6270_vm5, %v7011_v51 }
  0xac   : > { %4336 = vmatmul.mubr.msk.bf16.gmra.mxu0 %vm6270_vm5, %v6979_v33 }
  0xad   : > { %1686 = vmatprep.mubr.bf16.mxu0 %v6323_v26  ;;  %v5888_v26 = vld [vmem:[%s9337_s1 + $0x218] sm:$0xff]  }
  0xae   : > { %1646 = vmatmul.mubr.bf16.gmra.mxu1 %v7030_v34 }
  0xaf   : > { %1847 = vmatprep.mubr.bf16.mxu1 %v6337_v35 }
  0xb4   : > { %1687 = vmatmul.mubr.bf16.vlgmr.msra.gmra.mxu0 %v6313_v17  ;;  %v5887_v17 = vld [vmem:[%s9337_s1 + $0x220] sm:$0xff]  }
  0xb5   : > { %5682 = vmatpush3.bf16.msra.mxu0 %v6664_v58  ;;  %1694 = vmatprep.mubr.bf16.mxu0 %v6381_v5  ;;  %v7110_v58 = vld [vmem:[%s9338_s2] ss:$0 sm:$0xff] }
  0xb6   : > { %5683 = vmatprep.subr.bf16.mxu0 %v5885_v13  ;;  %4404 = vmatmul.mubr.msk.bf16.vlgmr.msra.gmra.mxu1 %vm6270_vm5, %v6309_v15  ;;  %v5889_v15 = vld [vmem:[%s9337_s1 + $0x210] sm:$0xff]  }
  0xb7   : > { %1855 = vmatprep.mubr.bf16.mxu1 %v6353_v53 }
  0xb9   : > { %5684 = vmatpush3.bf16.msra.mxu0 %v5885_v13 }
  0xba   : > { %5685 = vmatprep.subr.bf16.mxu0 %v5886_v32 }
  0xbc   : > { %1695 = vmatmul.mubr.bf16.gmra.mxu0 %v6337_v35  ;;  %v5890_v35 = vld [vmem:[%s9337_s1 + $0x208] sm:$0xff]  }
  0xbd   : > { %1702 = vmatprep.mubr.bf16.mxu0 %v6423_v29  ;;  %5686 = vmatpush3.bf16.msra.mxu0 %v5886_v32 }
  0xbe   : > { %5687 = vmatprep.subr.bf16.mxu0 %v5887_v17  ;;  %4408 = vmatmul.mubr.msk.bf16.gmra.mxu1 %vm6270_vm5, %v6342_v40  ;;  %v5891_v40 = vld [vmem:[%s9337_s1 + $0x200] sm:$0xff]  }
  0xbf   : > { %1863 = vmatprep.mubr.bf16.mxu1 %v6405_v19 }
  0xc1   : > { %5688 = vmatpush3.bf16.msra.mxu0 %v5887_v17 }
  0xc2   : > { %5689 = vmatprep.subr.bf16.mxu0 %v5888_v26 }
  0xc4   : > { %1703 = vmatmul.mubr.bf16.gmra.mxu0 %v6353_v53  ;;  %v9426_v53 = vld [vmem:[#allocation9_spill] sm:$0xff] }
  0xc5   : > { %1710 = vmatprep.mubr.bf16.mxu0 %v6481_v2  ;;  %5690 = vmatpush3.bf16.msra.mxu0 %v5888_v26  ;;  %v5892_v26 = vld [vmem:[%s9339_s3 + $0x78] sm:$0xff]  }
  0xc6   : > { %5691 = vmatprep.subr.bf16.mxu0 %v5889_v15  ;;  %4412 = vmatmul.mubr.msk.bf16.gmra.mxu1 %vm6270_vm5, %v6388_v8  ;;  %v9427_v8 = vld [vmem:[#allocation11_spill] sm:$0xff] }
  0xc7   : > { %1871 = vmatprep.mubr.bf16.mxu1 %v6457_v49  ;;  %5209 = vmatprep.subr.bf16.mxu1 %v5892_v26 }
  0xc9   : > { %5692 = vmatpush3.bf16.msra.mxu0 %v5889_v15 }
  0xca   : > { %5693 = vmatprep.subr.bf16.mxu0 %v5890_v35 }
  0xcc   : > { %1711 = vmatmul.mubr.bf16.gmra.mxu0 %v6405_v19  ;;  %v9428_v19 = vld [vmem:[#allocation10_spill] sm:$0xff] }
  0xcd   : > { %1718 = vmatprep.mubr.bf16.mxu0 %v6550_v50  ;;  %5694 = vmatpush3.bf16.msra.mxu0 %v5890_v35 }
  0xce   : > { %5695 = vmatprep.subr.bf16.mxu0 %v5891_v40  ;;  %4416 = vmatmul.mubr.msk.bf16.gmra.mxu1 %vm6270_vm5, %v6436_v37  ;;  %v9429_v37 = vld [vmem:[#allocation12_spill] sm:$0xff] }
  0xcf   : > { %1879 = vmatprep.mubr.bf16.mxu1 %v6508_v22 }
  0xd1   : > { %5696 = vmatpush3.bf16.msra.mxu0 %v5891_v40 }
  0xd4   : > { %1719 = vmatmul.mubr.bf16.gmra.mxu0 %v6457_v49 }
  0xd5   : > { %1726 = vmatprep.mubr.bf16.mxu0 %v6632_v3 }
  0xd6   : > { %4420 = vmatmul.mubr.msk.bf16.gmra.mxu1 %vm6270_vm5, %v6488_v7 }
  0xd7   : > { %1887 = vmatprep.mubr.bf16.mxu1 %v6586_v18 }
  0xdc   : > { %1727 = vmatmul.mubr.bf16.gmra.mxu0 %v6508_v22 }
  0xdd   : > { %1734 = vmatprep.mubr.bf16.mxu0 %v6720_v42 }
  0xde   : > { %4424 = vmatmul.mubr.msk.bf16.gmra.mxu1 %vm6270_vm5, %v9426_v53 }
  0xdf   : > { %1895 = vmatprep.mubr.bf16.mxu1 %v9427_v8 }
  0xe4   : > { %1735 = vmatmul.mubr.bf16.gmra.mxu0 %v6586_v18 }
  0xe5   : > { %1742 = vmatprep.mubr.bf16.mxu0 %v6778_v28 }
  0xe6   : > { %4428 = vmatmul.mubr.msk.bf16.gmra.mxu1 %vm6270_vm5, %v9428_v19 }
  0xe7   : > { %1903 = vmatprep.mubr.bf16.mxu1 %v9429_v37 }
  0xec   : > { %1743 = vmatmul.mubr.bf16.gmra.mxu0 %v9427_v8 }
  0xed   : > { %1750 = vmatprep.mubr.bf16.mxu0 %v6832_v39 }
  0xee   : > { %4432 = vmatmul.mubr.msk.bf16.gmra.mxu1 %vm6270_vm5, %v6725_v52 }
  0xef   : > { %1911 = vmatprep.mubr.bf16.mxu1 %v6814_v61 }
  0xf4   : > { %v4753_v49 = vpop.f32.mrf.mxu0  ;;  %1751 = vmatmul.mubr.bf16.gmra.mxu0 %v9429_v37 }
  0xf5   : > { %1758 = vmatprep.mubr.bf16.mxu0 %v6868_v27 }
  0xf6   : > { %v4754_v7 = vpop.f32.mrf.mxu0  ;;  %v4865_v4 = vpop.f32.mrf.mxu1  ;;  %4436 = vmatmul.mubr.msk.bf16.gmra.mxu1 %vm6270_vm5, %v6782_v20 }
  0xf7   : > { %v4755_v22 = vadd.f32 %v4754_v7, %v4753_v49  ;;  %1919 = vmatprep.mubr.bf16.mxu1 %v6850_v60 }
  0xf8   : > { %v4756_v18 = vpop.f32.mrf.mxu0  ;;  %v4866_v30 = vpop.f32.mrf.mxu1 }
  0xf9   : > { %v1367_v48 = vadd.f32 %v4755_v22, %v7110_v58  ;;  %v4867_v9 = vadd.f32 %v4866_v30, %v4865_v4 }
  0xfa   : > { %v4757_v1 = vpop.f32.mrf.mxu0  ;;  %v4868_v23 = vpop.f32.mrf.mxu1 }
  0xfb   : > { %v4758_v52 = vadd.f32 %v4757_v1, %v4756_v18  ;;  %v7119_v54 = vadd.f32 %v4867_v9, %v1367_v48 }
  0xfc   : > { %v4759_v31 = vpop.f32.mrf.mxu0  ;;  %1759 = vmatmul.mubr.bf16.gmra.mxu0 %v6814_v61  ;;  %v4869_v38 = vpop.f32.mrf.mxu1 }
  0xfd   : > { %1766 = vmatprep.mubr.bf16.mxu0 %v6910_v24  ;;  %v1370_v55 = vadd.f32 %v4758_v52, %v7110_v58  ;;  %v4870_v11 = vadd.f32 %v4869_v38, %v4868_v23 }
  0xfe   : > { %v4760_v57 = vpop.f32.mrf.mxu0  ;;  %v4871_v63 = vpop.f32.mrf.mxu1  ;;  %4440 = vmatmul.mubr.msk.bf16.gmra.mxu1 %vm6270_vm5, %v6837_v47  ;;  %v5893_v47 = vld [vmem:[%s9339_s3 + $0x38] sm:$0xff]  }
  0xff   : > { %v4761_v20 = vadd.f32 %v4760_v57, %v4759_v31  ;;  %v7125_v0 = vadd.f32 %v4870_v11, %v1370_v55  ;;  %1927 = vmatprep.mubr.bf16.mxu1 %v6886_v62  ;;  %5210 = vmatpush3.bf16.msra.mxu1 %v5893_v47 }
 0x100   : > { %v4762_v41 = vpop.f32.mrf.mxu0  ;;  %v4872_v56 = vpop.f32.mrf.mxu1 }
 0x101   : > { %v1375_v61 = vadd.f32 %v4761_v20, %v7110_v58  ;;  %v4873_v32 = vadd.f32 %v4872_v56, %v4871_v63 }
 0x102   : > { %v4763_v10 = vpop.f32.mrf.mxu0  ;;  %v4874_v15 = vpop.f32.mrf.mxu1 }
 0x103   : > { %v4764_v13 = vadd.f32 %v4763_v10, %v4762_v41  ;;  %v7137_v35 = vadd.f32 %v4873_v32, %v1375_v61 }
 0x104   : > { %v4765_v17 = vpop.f32.mrf.mxu0  ;;  %1767 = vmatmul.mubr.bf16.gmra.mxu0 %v6850_v60  ;;  %v4875_v8 = vpop.f32.mrf.mxu1 }
 0x105   : > { %1774 = vmatprep.mubr.bf16.mxu0 %v6944_v16  ;;  %v1378_v40 = vadd.f32 %v4764_v13, %v7110_v58  ;;  %v4876_v60 = vadd.f32 %v4875_v8, %v4874_v15  ;;  %v5894_v13 = vld [vmem:[%s9339_s3 + $0x70] sm:$0xff]  }
 0x106   : > { %v4766_v53 = vpop.f32.mrf.mxu0  ;;  %v4877_v49 = vpop.f32.mrf.mxu1  ;;  %4444 = vmatmul.mubr.msk.bf16.gmra.mxu1 %vm6270_vm5, %v6873_v44  ;;  %5211 = vmatprep.subr.bf16.mxu1 %v5894_v13 }
 0x107   : > { %v4767_v19 = vadd.f32 %v4766_v53, %v4765_v17  ;;  %v7143_v7 = vadd.f32 %v4876_v60, %v1378_v40  ;;  %1935 = vmatprep.mubr.bf16.mxu1 %v6926_v21 }
 0x108   : > { %v4768_v37 = vpop.f32.mrf.mxu0  ;;  %v4878_v1 = vpop.f32.mrf.mxu1 }
 0x109   : > { %v1383_v22 = vadd.f32 %v4767_v19, %v7110_v58  ;;  %v4879_v52 = vadd.f32 %v4878_v1, %v4877_v49 }
 0x10a   : > { %v4769_v18 = vpop.f32.mrf.mxu0  ;;  %v4880_v30 = vpop.f32.mrf.mxu1 }
 0x10b   : > { %v4770_v4 = vadd.f32 %v4769_v18, %v4768_v37  ;;  %v7149_v9 = vadd.f32 %v4879_v52, %v1383_v22 }
 0x10c   : > { %v4771_v48 = vpop.f32.mrf.mxu0  ;;  %1775 = vmatmul.mubr.bf16.gmra.mxu0 %v6886_v62  ;;  %v4881_v23 = vpop.f32.mrf.mxu1 }
 0x10d   : > { %1782 = vmatprep.mubr.bf16.mxu0 %v6974_v14  ;;  %v1386_v44 = vadd.f32 %v4770_v4, %v7110_v58  ;;  %v4882_v57 = vadd.f32 %v4881_v23, %v4880_v30 }
 0x10e   : > { %v4772_v31 = vpop.f32.mrf.mxu0  ;;  %v4883_v20 = vpop.f32.mrf.mxu1  ;;  %4448 = vmatmul.mubr.msk.bf16.gmra.mxu1 %vm6270_vm5, %v6915_v25  ;;  %v5895_v25 = vld [vmem:[%s9339_s3 + $0x30] sm:$0xff]  }
 0x10f   : > { %v4773_v55 = vadd.f32 %v4772_v31, %v4771_v48  ;;  %v7155_v11 = vadd.f32 %v4882_v57, %v1386_v44  ;;  %1943 = vmatprep.mubr.bf16.mxu1 %v6956_v6  ;;  %5212 = vmatpush3.bf16.msra.mxu1 %v5895_v25 }
 0x110   : > { %v4774_v38 = vpop.f32.mrf.mxu0  ;;  %v4884_v63 = vpop.f32.mrf.mxu1 }
 0x111   : > { %v1391_v62 = vadd.f32 %v4773_v55, %v7110_v58  ;;  %v4885_v10 = vadd.f32 %v4884_v63, %v4883_v20 }
 0x112   : > { %v4775_v41 = vpop.f32.mrf.mxu0  ;;  %v4886_v32 = vpop.f32.mrf.mxu1 }
 0x113   : > { %v4776_v61 = vadd.f32 %v4775_v41, %v4774_v38  ;;  %v7167_v17 = vadd.f32 %v4885_v10, %v1391_v62 }
 0x114   : > { %v4777_v56 = vpop.f32.mrf.mxu0  ;;  %1783 = vmatmul.mubr.bf16.gmra.mxu0 %v6926_v21  ;;  %v4887_v15 = vpop.f32.mrf.mxu1 }
 0x115   : > { %1790 = vmatprep.mubr.bf16.mxu0 %v7006_v12  ;;  %v1394_v26 = vadd.f32 %v4776_v61, %v7110_v58  ;;  %v4888_v21 = vadd.f32 %v4887_v15, %v4886_v32  ;;  %v5896_v61 = vld [vmem:[%s9339_s3 + $0x68] sm:$0xff]  }
 0x116   : > { %v4778_v47 = vpop.f32.mrf.mxu0  ;;  %v4889_v8 = vpop.f32.mrf.mxu1  ;;  %4452 = vmatmul.mubr.msk.bf16.gmra.mxu1 %vm6270_vm5, %v6951_v59  ;;  %5213 = vmatprep.subr.bf16.mxu1 %v5896_v61 }
 0x117   : > { %v4779_v40 = vadd.f32 %v4778_v47, %v4777_v56  ;;  %v7173_v19 = vadd.f32 %v4888_v21, %v1394_v26  ;;  %1951 = vmatprep.mubr.bf16.mxu1 %v6989_v43 }
 0x118   : > { %v4780_v53 = vpop.f32.mrf.mxu0  ;;  %v4890_v49 = vpop.f32.mrf.mxu1 }
 0x119   : > { %v1399_v60 = vadd.f32 %v4779_v40, %v7110_v58  ;;  %v4891_v18 = vadd.f32 %v4890_v49, %v4889_v8  ;;  %v9430_v8 = vld [vmem:[#allocation5_spill] sm:$0xff] }
 0x11a   : > { %v4781_v37 = vpop.f32.mrf.mxu0  ;;  %v4892_v4 = vpop.f32.mrf.mxu1 }
 0x11b   : > { %v4782_v22 = vadd.f32 %v4781_v37, %v4780_v53  ;;  %v7179_v52 = vadd.f32 %v4891_v18, %v1399_v60 }
 0x11c   : > { %v4783_v1 = vpop.f32.mrf.mxu0  ;;  %1791 = vmatmul.mubr.bf16.gmra.mxu0 %v6956_v6  ;;  %v4893_v30 = vpop.f32.mrf.mxu1 }
 0x11d   : > { %1798 = vmatprep.mubr.bf16.mxu0 %v7030_v34  ;;  %v1402_v59 = vadd.f32 %v4782_v22, %v7110_v58  ;;  %v4894_v31 = vadd.f32 %v4893_v30, %v4892_v4 }
 0x11e   : > { %v4784_v48 = vpop.f32.mrf.mxu0  ;;  %v4895_v55 = vpop.f32.mrf.mxu1  ;;  %4456 = vmatmul.mubr.msk.bf16.gmra.mxu1 %vm6270_vm5, %v6979_v33  ;;  %v5897_v33 = vld [vmem:[%s9339_s3 + $0x28] sm:$0xff]  }
 0x11f   : > { %v4785_v44 = vadd.f32 %v4784_v48, %v4783_v1  ;;  %v7185_v57 = vadd.f32 %v4894_v31, %v1402_v59  ;;  %1959 = vmatprep.mubr.bf16.mxu1 %v7015_v45  ;;  %5214 = vmatpush3.bf16.msra.mxu1 %v5897_v33 }
 0x120   : > { %v4786_v23 = vpop.f32.mrf.mxu0  ;;  %v4896_v20 = vpop.f32.mrf.mxu1 }
 0x121   : > { %v1407_v6 = vadd.f32 %v4785_v44, %v7110_v58  ;;  %v4897_v41 = vadd.f32 %v4896_v20, %v4895_v55 }
 0x122   : > { %v4787_v38 = vpop.f32.mrf.mxu0  ;;  %v4898_v10 = vpop.f32.mrf.mxu1 }
 0x123   : > { %v4788_v62 = vadd.f32 %v4787_v38, %v4786_v23  ;;  %v7197_v56 = vadd.f32 %v4897_v41, %v1407_v6  ;;  %v9431_v23 = vld [vmem:[#allocation6_spill] sm:$0xff]  ;;  %v5898_v41 = vld [vmem:[%s9339_s3 + $0x60] sm:$0xff]  }
 0x124   : > { %v4789_v63 = vpop.f32.mrf.mxu0  ;;  %1799 = vmatmul.mubr.bf16.gmra.mxu0 %v6989_v43  ;;  %v4899_v32 = vpop.f32.mrf.mxu1  ;;  %5215 = vmatprep.subr.bf16.mxu1 %v5898_v41 }
 0x125   : > { %1806 = vmatprep.mubr.bf16.mxu0 %v7028_v36  ;;  %v1410_v13 = vadd.f32 %v4788_v62, %v7110_v58  ;;  %v4900_v43 = vadd.f32 %v4899_v32, %v4898_v10 }
 0x126   : > { %v4790_v25 = vpop.f32.mrf.mxu0  ;;  %v4901_v15 = vpop.f32.mrf.mxu1  ;;  %4460 = vmatmul.mubr.msk.bf16.gmra.mxu1 %vm6270_vm5, %v7011_v51 }
 0x127   : > { %v4791_v26 = vadd.f32 %v4790_v25, %v4789_v63  ;;  %v7203_v40 = vadd.f32 %v4900_v43, %v1410_v13  ;;  %1967 = vmatprep.mubr.bf16.mxu1 %v9430_v8  ;;  %v5899_v63 = vld [vmem:[%s9339_s3 + $0x20] sm:$0xff]  }
 0x128   : > { %v4792_v47 = vpop.f32.mrf.mxu0  ;;  %v4902_v60 = vpop.f32.mrf.mxu1  ;;  %5216 = vmatpush3.bf16.msra.mxu1 %v5899_v63 }
 0x129   : > { %v1415_v21 = vadd.f32 %v4791_v26, %v7110_v58  ;;  %v4903_v49 = vadd.f32 %v4902_v60, %v4901_v15 }
 0x12a   : > { %v4793_v53 = vpop.f32.mrf.mxu0  ;;  %v4904_v18 = vpop.f32.mrf.mxu1 }
 0x12b   : > { %v4794_v37 = vadd.f32 %v4793_v53, %v4792_v47  ;;  %v7209_v1 = vadd.f32 %v4903_v49, %v1415_v21 }
 0x12c   : > { %v4795_v22 = vpop.f32.mrf.mxu0  ;;  %1807 = vmatmul.mubr.bf16.gmra.mxu0 %v7015_v45  ;;  %v4905_v59 = vpop.f32.mrf.mxu1 }
 0x12d   : > { %5697 = vmatprep.mubr.bf16.mxu0 %v6381_v5  ;;  %v1418_v51 = vadd.f32 %v4794_v37, %v7110_v58  ;;  %v4906_v30 = vadd.f32 %v4905_v59, %v4904_v18 }
 0x12e   : > { %v4796_v4 = vpop.f32.mrf.mxu0  ;;  %v4907_v31 = vpop.f32.mrf.mxu1  ;;  %4464 = vmatmul.mubr.msk.bf16.gmra.mxu1 %vm6270_vm5, %v9431_v23 }
 0x12f   : > { %v4797_v48 = vadd.f32 %v4796_v4, %v4795_v22  ;;  %v7215_v55 = vadd.f32 %v4906_v30, %v1418_v51  ;;  %3248 = vmatprep.mubr.bf16.mxu1 %v9430_v8 }
 0x130   : > { %v4798_v44 = vpop.f32.mrf.mxu0  ;;  %v4908_v5 = vpop.f32.mrf.mxu1 }
 0x131   : > { %v1423_v45 = vadd.f32 %v4797_v48, %v7110_v58  ;;  %v4909_v20 = vadd.f32 %v4908_v5, %v4907_v31 }
 0x132   : > { %v4799_v6 = vpop.f32.mrf.mxu0  ;;  %v4910_v61 = vpop.f32.mrf.mxu1 }
 0x133   : > { %v4800_v38 = vadd.f32 %v4799_v6, %v4798_v44  ;;  %v7227_v33 = vadd.f32 %v4909_v20, %v1423_v45 }
 0x134   : > { %v4801_v62 = vpop.f32.mrf.mxu0  ;;  %5698 = vmatmul.mubr.bf16.vlgmr.msra.gmra.mxu0 %v6423_v29  ;;  %v4911_v25 = vpop.f32.mrf.mxu1 }
 0x135   : > { %5701 = vmatprep.mubr.bf16.mxu0 %v6481_v2  ;;  %v1426_v10 = vadd.f32 %v4800_v38, %v7110_v58  ;;  %v4912_v29 = vadd.f32 %v4911_v25, %v4910_v61 }
 0x136   : > { %v4802_v13 = vpop.f32.mrf.mxu0  ;;  %v4913_v43 = vpop.f32.mrf.mxu1 }
 0x137   : > { %v4803_v32 = vadd.f32 %v4802_v13, %v4801_v62  ;;  %v7230_v47 = vadd.f32 %v4912_v29, %v1426_v10  ;;  %v5901_v62 = vld [vmem:[%s9339_s3 + $0x18] sm:$0xff]  }
 0x138   : > { %v4804_v26 = vpop.f32.mrf.mxu0  ;;  %v4914_v53 = vpop.f32.mrf.mxu1 }
 0x139   : > { %v1431_v15 = vadd.f32 %v4803_v32, %v7110_v58  ;;  %v4915_v2 = vadd.f32 %v4914_v53, %v4913_v43 }
 0x13a   : > { %v4805_v21 = vpop.f32.mrf.mxu0  ;;  %v4916_v49 = vpop.f32.mrf.mxu1 }
 0x13b   : > { %v4806_v60 = vadd.f32 %v4805_v21, %v4804_v26  ;;  %v7235_v22 = vadd.f32 %v4915_v2, %v1431_v15 }
 0x13c   : > { %v4807_v37 = vpop.f32.mrf.mxu0  ;;  %5702 = vmatmul.mubr.bf16.gmra.mxu0 %v6550_v50  ;;  %v4917_v4 = vpop.f32.mrf.mxu1 }
 0x13d   : > { %5705 = vmatprep.mubr.bf16.mxu0 %v6632_v3  ;;  %v1434_v18 = vadd.f32 %v4806_v60, %v7110_v58  ;;  %v4918_v48 = vadd.f32 %v4917_v4, %v4916_v49  ;;  %v5900_v3 = vld [vmem:[%s9339_s3 + $0x58] sm:$0xff]  }
 0x13e   : > { %v4808_v51 = vpop.f32.mrf.mxu0  ;;  %v4919_v44 = vpop.f32.mrf.mxu1  ;;  %5217 = vmatprep.subr.bf16.mxu1 %v5900_v3 }
 0x13f   : > { %v4809_v59 = vadd.f32 %v4808_v51, %v4807_v37  ;;  %v7238_v31 = vadd.f32 %v4918_v48, %v1434_v18  ;;  %5218 = vmatpush3.bf16.msra.mxu1 %v5901_v62 }
 0x140   : > { %v4810_v30 = vpop.f32.mrf.mxu0  ;;  %v4920_v5 = vpop.f32.mrf.mxu1 }
 0x141   : > { %v1439_v45 = vadd.f32 %v4809_v59, %v7110_v58  ;;  %v4921_v38 = vadd.f32 %v4920_v5, %v4919_v44 }
 0x142   : > { %v4811_v6 = vpop.f32.mrf.mxu0  ;;  %v4922_v41 = vpop.f32.mrf.mxu1 }
 0x143   : > { %v4812_v50 = vadd.f32 %v4811_v6, %v4810_v30  ;;  %v7249_v63 = vadd.f32 %v4921_v38, %v1439_v45 }
 0x144   : > { %v4813_v20 = vpop.f32.mrf.mxu0  ;;  %5706 = vmatmul.mubr.bf16.gmra.mxu0 %v6720_v42  ;;  %v4923_v13 = vpop.f32.mrf.mxu1 }
 0x145   : > { %5709 = vmatprep.mubr.bf16.mxu0 %v6778_v28  ;;  %v1442_v61 = vadd.f32 %v4812_v50, %v7110_v58  ;;  %v4924_v42 = vadd.f32 %v4923_v13, %v4922_v41 }
 0x146   : > { %v4814_v10 = vpop.f32.mrf.mxu0  ;;  %v4925_v29 = vpop.f32.mrf.mxu1 }
 0x147   : > { %v4815_v25 = vadd.f32 %v4814_v10, %v4813_v20  ;;  %v7252_v26 = vadd.f32 %v4924_v42, %v1442_v61  ;;  %v5903_v20 = vld [vmem:[%s9339_s3 + $0x10] sm:$0xff]  }
 0x148   : > { %v4816_v32 = vpop.f32.mrf.mxu0  ;;  %v4926_v21 = vpop.f32.mrf.mxu1 }
 0x149   : > { %v1447_v43 = vadd.f32 %v4815_v25, %v7110_v58  ;;  %v4927_v28 = vadd.f32 %v4926_v21, %v4925_v29 }
 0x14a   : > { %v4817_v15 = vpop.f32.mrf.mxu0  ;;  %v4928_v2 = vpop.f32.mrf.mxu1 }
 0x14b   : > { %v4818_v53 = vadd.f32 %v4817_v15, %v4816_v32  ;;  %v7257_v37 = vadd.f32 %v4927_v28, %v1447_v43 }
 0x14c   : > { %v4819_v60 = vpop.f32.mrf.mxu0  ;;  %5710 = vmatmul.mubr.bf16.gmra.mxu0 %v6832_v39  ;;  %v4929_v51 = vpop.f32.mrf.mxu1 }
 0x14d   : > { %5713 = vmatprep.mubr.bf16.mxu0 %v6868_v27  ;;  %v1450_v49 = vadd.f32 %v4818_v53, %v7110_v58  ;;  %v4930_v59 = vadd.f32 %v4929_v51, %v4928_v2  ;;  %v5902_v27 = vld [vmem:[%s9339_s3 + $0x50] sm:$0xff]  }
 0x14e   : > { %v4820_v18 = vpop.f32.mrf.mxu0  ;;  %v4931_v30 = vpop.f32.mrf.mxu1  ;;  %5219 = vmatprep.subr.bf16.mxu1 %v5902_v27 }
 0x14f   : > { %v4821_v4 = vadd.f32 %v4820_v18, %v4819_v60  ;;  %v7260_v44 = vadd.f32 %v4930_v59, %v1450_v49  ;;  %5220 = vmatpush3.bf16.msra.mxu1 %v5903_v20 }
 0x150   : > { %v4822_v48 = vpop.f32.mrf.mxu0  ;;  %v4932_v5 = vpop.f32.mrf.mxu1 }
 0x151   : > { %v1455_v45 = vadd.f32 %v4821_v4, %v7110_v58  ;;  %v4933_v50 = vadd.f32 %v4932_v5, %v4931_v30 }
 0x152   : > { %v4823_v6 = vpop.f32.mrf.mxu0  ;;  %v4934_v3 = vpop.f32.mrf.mxu1 }
 0x153   : > { %v4824_v39 = vadd.f32 %v4823_v6, %v4822_v48  ;;  %v7271_v62 = vadd.f32 %v4933_v50, %v1455_v45 }
 0x154   : > { %v4825_v38 = vpop.f32.mrf.mxu0  ;;  %5714 = vmatmul.mubr.bf16.gmra.mxu0 %v6910_v24  ;;  %v4935_v10 = vpop.f32.mrf.mxu1 }
 0x155   : > { %5717 = vmatprep.mubr.bf16.mxu0 %v6944_v16  ;;  %v1458_v41 = vadd.f32 %v4824_v39, %v7110_v58  ;;  %v4936_v24 = vadd.f32 %v4935_v10, %v4934_v3 }
 0x156   : > { %v4826_v61 = vpop.f32.mrf.mxu0  ;;  %v4937_v42 = vpop.f32.mrf.mxu1 }
 0x157   : > { %v4827_v13 = vadd.f32 %v4826_v61, %v4825_v38  ;;  %v7274_v32 = vadd.f32 %v4936_v24, %v1458_v41  ;;  %v5905_v38 = vld [vmem:[%s9339_s3 + $0x8] sm:$0xff]  }
 0x158   : > { %v4828_v25 = vpop.f32.mrf.mxu0  ;;  %v4938_v15 = vpop.f32.mrf.mxu1 }
 0x159   : > { %v1463_v29 = vadd.f32 %v4827_v13, %v7110_v58  ;;  %v4939_v16 = vadd.f32 %v4938_v15, %v4937_v42  ;;  %v5907_v13 = vld [vmem:[%s9339_s3 + $0xb8] sm:$0xff]   ;;  %v5908_v15 = vld [vmem:[%s9339_s3 + $0xf0] sm:$0xff]  }
 0x15a   : > { %v4829_v43 = vpop.f32.mrf.mxu0  ;;  %v4940_v28 = vpop.f32.mrf.mxu1 }
 0x15b   : > { %v4830_v21 = vadd.f32 %v4829_v43, %v4828_v25  ;;  %v7279_v60 = vadd.f32 %v4939_v16, %v1463_v29 }
 0x15c   : > { %v4831_v53 = vpop.f32.mrf.mxu0  ;;  %5718 = vmatmul.mubr.bf16.gmra.mxu0 %v6974_v14  ;;  %v4941_v18 = vpop.f32.mrf.mxu1 }
 0x15d   : > { %5721 = vmatprep.mubr.bf16.mxu0 %v7006_v12  ;;  %v1466_v2 = vadd.f32 %v4830_v21, %v7110_v58  ;;  %v4942_v4 = vadd.f32 %v4941_v18, %v4940_v28  ;;  %v5904_v12 = vld [vmem:[%s9339_s3 + $0x48] sm:$0xff]  }
 0x15e   : > { %v4832_v49 = vpop.f32.mrf.mxu0  ;;  %v4943_v48 = vpop.f32.mrf.mxu1  ;;  %5221 = vmatprep.subr.bf16.mxu1 %v5904_v12 }
 0x15f   : > { %v4833_v51 = vadd.f32 %v4832_v49, %v4831_v53  ;;  %v7282_v30 = vadd.f32 %v4942_v4, %v1466_v2  ;;  %5222 = vmatpush3.bf16.msra.mxu1 %v5905_v38  ;;  %v5909_v53 = vld [vmem:[%s9339_s3 + $0xb0] sm:$0xff]   ;;  %v9432_v49 = vld [vmem:[#allocation8_spill] sm:$0xff] }
 0x160   : > { %v4834_v59 = vpop.f32.mrf.mxu0  ;;  %v4944_v5 = vpop.f32.mrf.mxu1 }
 0x161   : > { %v1471_v45 = vadd.f32 %v4833_v51, %v7110_v58  ;;  %v4945_v39 = vadd.f32 %v4944_v5, %v4943_v48  ;;  %v5910_v48 = vld [vmem:[%s9339_s3 + $0xe8] sm:$0xff]  }
 0x162   : > { %v4835_v6 = vpop.f32.mrf.mxu0  ;;  %v4946_v27 = vpop.f32.mrf.mxu1  ;;  %v5911_v5 = vld [vmem:[%s9339_s3 + $0xa8] sm:$0xff]  }
 0x163   : > { %v4836_v14 = vadd.f32 %v4835_v6, %v4834_v59  ;;  %v7293_v20 = vadd.f32 %v4945_v39, %v1471_v45 }
 0x164   : > { %v4837_v50 = vpop.f32.mrf.mxu0  ;;  %5722 = vmatmul.mubr.bf16.gmra.mxu0 %v7030_v34  ;;  %v5906_v34 = vld [vmem:[%s9339_s3 + $0xf8] sm:$0xff]   ;;  %v4947_v61 = vpop.f32.mrf.mxu1 }
 0x165   : > { %5725 = vmatprep.mubr.bf16.mxu0 %v7028_v36  ;;  %v1474_v3 = vadd.f32 %v4836_v14, %v7110_v58  ;;  %v4948_v24 = vadd.f32 %v4947_v61, %v4946_v27  ;;  %5321 = vmatprep.subr.bf16.mxu0 %v5906_v34  ;;  %v5915_v61 = vld [vmem:[%s9339_s3 + $0xa0] sm:$0xff]  }
 0x166   : > { %v4838_v41 = vpop.f32.mrf.mxu0  ;;  %v4949_v36 = vpop.f32.mrf.mxu1  ;;  %5322 = vmatpush3.bf16.msra.mxu0 %v5907_v13 }
 0x167   : > { %v4839_v10 = vadd.f32 %v4838_v41, %v4837_v50  ;;  %v7302_v42 = vadd.f32 %v4948_v24, %v1474_v3  ;;  %5323 = vmatprep.subr.bf16.mxu0 %v5908_v15  ;;  %v5914_v3 = vld [vmem:[%s9339_s3 + $0xe0] sm:$0xff]  }
 0x168   : > { %v4840_v25 = vpop.f32.mrf.mxu0  ;;  %v4950_v21 = vpop.f32.mrf.mxu1  ;;  %v5912_v24 = vld [vmem:[%s9339_s3 + $0x40] sm:$0xff]  }
 0x169   : > { %v1479_v29 = vadd.f32 %v4839_v10, %v7110_v58  ;;  %v4951_v28 = vadd.f32 %v4950_v21, %v4949_v36  ;;  %5223 = vmatprep.subr.bf16.mxu1 %v5912_v24  ;;  %v5916_v21 = vld [vmem:[%s9339_s3 + $0xd8] sm:$0xff]   ;;  %v5923_v24 = vld [vmem:[%s9339_s3 + $0xc0] sm:$0xff]  }
 0x16a   : > { %v4841_v43 = vpop.f32.mrf.mxu0  ;;  %v4952_v18 = vpop.f32.mrf.mxu1  ;;  %5324 = vmatpush3.bf16.msra.mxu0 %v5909_v53 }
 0x16b   : > { %v4842_v16 = vadd.f32 %v4841_v43, %v4840_v25  ;;  %v7312_v51 = vadd.f32 %v4951_v28, %v1479_v29  ;;  %5325 = vmatprep.subr.bf16.mxu0 %v5910_v48  ;;  %v5913_v25 = vld [vmem:[%s9339_s3] sm:$0xff]   ;;  %v5917_v28 = vld [vmem:[%s9339_s3 + $0x98] sm:$0xff]  }
 0x16c   : > { %v4843_v2 = vpop.f32.mrf.mxu0  ;;  %5726 = vmatmul.mubr.bf16.gmra.mxu0 %v9432_v49  ;;  %v4953_v45 = vpop.f32.mrf.mxu1  ;;  %5224 = vmatpush3.bf16.msra.mxu1 %v5913_v25 }
 0x16d   : > { %v1482_v4 = vadd.f32 %v4842_v16, %v7110_v58  ;;  %v4954_v14 = vadd.f32 %v4953_v45, %v4952_v18  ;;  %v5918_v45 = vld [vmem:[%s9339_s3 + $0xd0] sm:$0xff]  }
 0x16e   : > { %v4844_v59 = vpop.f32.mrf.mxu0  ;;  %v4955_v50 = vpop.f32.mrf.mxu1  ;;  %5326 = vmatpush3.bf16.msra.mxu0 %v5911_v5 }
 0x16f   : > { %v4845_v6 = vadd.f32 %v4844_v59, %v4843_v2  ;;  %v7321_v12 = vadd.f32 %v4954_v14, %v1482_v4  ;;  %5327 = vmatprep.subr.bf16.mxu0 %v5914_v3  ;;  %4541 = vmatmul.mubr.msk.bf16.vlgmr.msra.gmra.mxu1 %vm6270_vm5, %v9431_v23 }
 0x170   : > { %v4846_v39 = vpop.f32.mrf.mxu0  ;;  %v4956_v41 = vpop.f32.mrf.mxu1 }
 0x171   : > { %v1487_v38 = vadd.f32 %v4845_v6, %v7110_v58  ;;  %v4957_v10 = vadd.f32 %v4956_v41, %v4955_v50 }
 0x172   : > { %v4847_v27 = vpop.f32.mrf.mxu0  ;;  %v4958_v36 = vpop.f32.mrf.mxu1  ;;  %5328 = vmatpush3.bf16.msra.mxu0 %v5915_v61 }
 0x173   : > { %v4848_v34 = vadd.f32 %v4847_v27, %v4846_v39  ;;  %v7336_v29 = vadd.f32 %v4957_v10, %v1487_v38  ;;  %5329 = vmatprep.subr.bf16.mxu0 %v5916_v21  ;;  %v5920_v27 = vld [vmem:[%s9339_s3 + $0xc8] sm:$0xff]  }
 0x174   : > { %v4977_v13 = vpop.f32.mrf.mxu0  ;;  %v4959_v16 = vpop.f32.mrf.mxu1 }
 0x175   : > { %9433 = vst [vmem:[#allocation9_spill] sm:$0xff] %v7336_v29  ;;  %v1490_v43 = vadd.f32 %v4848_v34, %v7110_v58  ;;  %v4960_v2 = vadd.f32 %v4959_v16, %v4958_v36  ;;  %v5921_v34 = vld [vmem:[%s9339_s3 + $0x88] sm:$0xff]  }
 0x176   : > { %v4978_v15 = vpop.f32.mrf.mxu0  ;;  %v7348_v58 = vpop.f32.mrf.mxu1  ;;  %5330 = vmatpush3.bf16.msra.mxu0 %v5917_v28 }
 0x177   : > { %v4979_v53 = vadd.f32 %v4978_v15, %v4977_v13  ;;  %v7350_v59 = vadd.f32 %v4960_v2, %v1490_v43  ;;  %5331 = vmatprep.subr.bf16.mxu0 %v5918_v45  ;;  %v5925_v43 = vld [vmem:[%s9339_s3 + $0x80] sm:$0xff]   ;;  %v5922_v45 = vld [vmem:[%s9339_s3 + $0x178] sm:$0xff]  }
 0x178   : > { %v4980_v18 = vpop.f32.mrf.mxu0  ;;  %v7358_v6 = vpop.f32.mrf.mxu1  ;;  %5433 = vmatprep.subr.bf16.mxu1 %v5922_v45 }
 0x179   : > { %v7346_v4 = vadd.f32 %v4979_v53, %v7119_v54  ;;  %9434 = vst [vmem:[#allocation11_spill] sm:$0xff] %v7350_v59  ;;  %v5919_v54 = vld [vmem:[%s9339_s3 + $0x90] sm:$0xff]  }
 0x17a   : > { %v4981_v48 = vpop.f32.mrf.mxu0  ;;  %v7366_v50 = vpop.f32.mrf.mxu1  ;;  %5332 = vmatpush3.bf16.msra.mxu0 %v5919_v54 }
 0x17b   : > { %v4982_v5 = vadd.f32 %v4981_v48, %v4980_v18  ;;  %5333 = vmatprep.subr.bf16.mxu0 %v5920_v27 }
 0x17c   : > { %v4983_v14 = vpop.f32.mrf.mxu0  ;;  %v7371_v3 = vpop.f32.mrf.mxu1 }
 0x17d   : > { %v7364_v39 = vadd.f32 %v4982_v5, %v7125_v0 }
 0x17e   : > { %v4984_v38 = vpop.f32.mrf.mxu0  ;;  %v7379_v10 = vpop.f32.mrf.mxu1  ;;  %5334 = vmatpush3.bf16.msra.mxu0 %v5921_v34 }
 0x17f   : > { %v4985_v41 = vadd.f32 %v4984_v38, %v4983_v14  ;;  %5335 = vmatprep.subr.bf16.mxu0 %v5923_v24 }
 0x180   : > { %v4986_v61 = vpop.f32.mrf.mxu0  ;;  %v7384_v25 = vpop.f32.mrf.mxu1 }
 0x181   : > { %v7377_v0 = vadd.f32 %v4985_v41, %v7137_v35 }
 0x182   : > { %v4987_v13 = vpop.f32.mrf.mxu0  ;;  %v7392_v21 = vpop.f32.mrf.mxu1  ;;  %5336 = vmatpush3.bf16.msra.mxu0 %v5925_v43 }
 0x183   : > { %v4988_v36 = vadd.f32 %v4987_v13, %v4986_v61 }
 0x184   : > { %v4989_v15 = vpop.f32.mrf.mxu0  ;;  %v7394_v53 = vpop.f32.mrf.mxu1 }
 0x185   : > { %v7390_v35 = vadd.f32 %v4988_v36, %v7143_v7  ;;  %v5924_v7 = vld [vmem:[%s9339_s3 + $0x138] sm:$0xff]  }
 0x186   : > { %v4990_v16 = vpop.f32.mrf.mxu0  ;;  %v7399_v48 = vpop.f32.mrf.mxu1  ;;  %5434 = vmatpush3.bf16.msra.mxu1 %v5924_v7 }
 0x187   : > { %v4991_v28 = vadd.f32 %v4990_v16, %v4989_v15 }
 0x188   : > { %v4992_v2 = vpop.f32.mrf.mxu0  ;;  %v7407_v54 = vpop.f32.mrf.mxu1 }
 0x189   : > { %v7397_v18 = vadd.f32 %v4991_v28, %v7149_v9 }
 0x18a   : > { %v4993_v5 = vpop.f32.mrf.mxu0  ;;  %v7412_v27 = vpop.f32.mrf.mxu1 }
 0x18b   : > { %v4994_v14 = vadd.f32 %v4993_v5, %v4992_v2 }
 0x18c   : > { %v4995_v38 = vpop.f32.mrf.mxu0  ;;  %v7414_v34 = vpop.f32.mrf.mxu1 }
 0x18d   : > { %v7410_v9 = vadd.f32 %v4994_v14, %v7155_v11 }
 0x18e   : > { %v4996_v41 = vpop.f32.mrf.mxu0  ;;  %v7419_v36 = vpop.f32.mrf.mxu1 }
 0x18f   : > { %v4997_v61 = vadd.f32 %v4996_v41, %v4995_v38 }
 0x190   : > { %v4998_v13 = vpop.f32.mrf.mxu0  ;;  %v7421_v15 = vpop.f32.mrf.mxu1 }
 0x191   : > { %v7417_v24 = vadd.f32 %v4997_v61, %v7167_v17 }
 0x192   : > { %v4999_v43 = vpop.f32.mrf.mxu0  ;;  %v7426_v2 = vpop.f32.mrf.mxu1 }
 0x193   : > { %9435 = vst [vmem:[#allocation10_spill] sm:$0xff] %v7417_v24  ;;  %v5000_v16 = vadd.f32 %v4999_v43, %v4998_v13  ;;  %v5927_v43 = vld [vmem:[%s9339_s3 + $0x130] sm:$0xff]  }
 0x194   : > { %v5001_v28 = vpop.f32.mrf.mxu0  ;;  %v7428_v7 = vpop.f32.mrf.mxu1 }
 0x195   : > { %v7424_v11 = vadd.f32 %v5000_v16, %v7173_v19  ;;  %v5926_v19 = vld [vmem:[%s9339_s3 + $0x170] sm:$0xff]  }
 0x196   : > { %v5002_v45 = vpop.f32.mrf.mxu0  ;;  %v7433_v38 = vpop.f32.mrf.mxu1  ;;  %5435 = vmatprep.subr.bf16.mxu1 %v5926_v19 }
 0x197   : > { %9436 = vst [vmem:[#allocation12_spill] sm:$0xff] %v7424_v11  ;;  %v5003_v5 = vadd.f32 %v5002_v45, %v5001_v28  ;;  %5436 = vmatpush3.bf16.msra.mxu1 %v5927_v43 }
 0x198   : > { %v5004_v14 = vpop.f32.mrf.mxu0  ;;  %v7435_v61 = vpop.f32.mrf.mxu1 }
 0x199   : > { %v7431_v17 = vadd.f32 %v5003_v5, %v7179_v52 }
 0x19a   : > { %v5005_v41 = vpop.f32.mrf.mxu0  ;;  %v7446_v52 = vpop.f32.mrf.mxu1 }
 0x19b   : > { %9437 = vst [vmem:[#allocation13_spill] sm:$0xff] %v7431_v17  ;;  %v5006_v13 = vadd.f32 %v5005_v41, %v5004_v14 }
 0x19c   : > { %v5007_v16 = vpop.f32.mrf.mxu0  ;;  %v7448_v5 = vpop.f32.mrf.mxu1 }
 0x19d   : > { %v7444_v28 = vadd.f32 %v5006_v13, %v7185_v57 }
 0x19e   : > { %v5008_v45 = vpop.f32.mrf.mxu0  ;;  %v7453_v8 = vpop.f32.mrf.mxu1 }
 0x19f   : > { %9438 = vst [vmem:[#allocation14_spill] sm:$0xff] %v7444_v28  ;;  %v5009_v14 = vadd.f32 %v5008_v45, %v5007_v16 }
 0x1a0   : > { %v5010_v41 = vpop.f32.mrf.mxu0  ;;  %v7455_v46 = vpop.f32.mrf.mxu1 }
 0x1a1   : > { %v7451_v23 = vadd.f32 %v5009_v14, %v7197_v56 }
 0x1a2   : > { %v5011_v49 = vpop.f32.mrf.mxu0  ;;  %v7460_v19 = vpop.f32.mrf.mxu1 }
 0x1a3   : > { %9439 = vst [vmem:[#allocation15_spill] sm:$0xff] %v7451_v23  ;;  %v5012_v59 = vadd.f32 %v5011_v49, %v5010_v41 }
 0x1a4   : > { %v5013_v57 = vpop.f32.mrf.mxu0  ;;  %v7462_v28 = vpop.f32.mrf.mxu1 }
 0x1a5   : > { %v7458_v13 = vadd.f32 %v5012_v59, %v7203_v40 }
 0x1a6   : > { %v5014_v43 = vpop.f32.mrf.mxu0  ;;  %v7467_v14 = vpop.f32.mrf.mxu1 }
 0x1a7   : > { %9440 = vst [vmem:[#allocation16_spill] sm:$0xff] %v7458_v13  ;;  %v5015_v16 = vadd.f32 %v5014_v43, %v5013_v57  ;;  %v5928_v57 = vld [vmem:[%s9339_s3 + $0x168] sm:$0xff]  }
 0x1a8   : > { %v5016_v45 = vpop.f32.mrf.mxu0  ;;  %v7469_v29 = vpop.f32.mrf.mxu1  ;;  %5437 = vmatprep.subr.bf16.mxu1 %v5928_v57 }
 0x1a9   : > { %v7465_v56 = vadd.f32 %v5015_v16, %v7209_v1  ;;  %v5929_v1 = vld [vmem:[%s9339_s3 + $0x128] sm:$0xff]  }
 0x1aa   : > { %v5017_v23 = vpop.f32.mrf.mxu0  ;;  %v7474_v59 = vpop.f32.mrf.mxu1  ;;  %5438 = vmatpush3.bf16.msra.mxu1 %v5929_v1 }
 0x1ab   : > { %9441 = vst [vmem:[#allocation17_spill] sm:$0xff] %v7465_v56  ;;  %v5018_v49 = vadd.f32 %v5017_v23, %v5016_v45 }
 0x1ac   : > { %v5019_v41 = vpop.f32.mrf.mxu0  ;;  %v7482_v16 = vpop.f32.mrf.mxu1 }
 0x1ad   : > { %v7472_v40 = vadd.f32 %v5018_v49, %v7215_v55  ;;  %9443 = vst [vmem:[#allocation19_spill] sm:$0xff] %v7482_v16 }
 0x1ae   : > { %v5020_v43 = vpop.f32.mrf.mxu0  ;;  %v7487_v45 = vpop.f32.mrf.mxu1 }
 0x1af   : > { %9442 = vst [vmem:[#allocation18_spill] sm:$0xff] %v7472_v40  ;;  %v5021_v56 = vadd.f32 %v5020_v43, %v5019_v41 }
 0x1b0   : > { %v5022_v23 = vpop.f32.mrf.mxu0  ;;  %v7489_v40 = vpop.f32.mrf.mxu1 }
 0x1b1   : > { %v7485_v55 = vadd.f32 %v5021_v56, %v7227_v33 }
 0x1b2   : > { %v5023_v49 = vpop.f32.mrf.mxu0  ;;  %v7494_v24 = vpop.f32.mrf.mxu1 }
 0x1b3   : > { %9444 = vst [vmem:[#allocation20_spill] sm:$0xff] %v7485_v55  ;;  %v5024_v13 = vadd.f32 %v5023_v49, %v5022_v23  ;;  %9446 = vst [vmem:[#allocation22_spill] sm:$0xff] %v7494_v24 }
 0x1b4   : > { %v5025_v17 = vpop.f32.mrf.mxu0  ;;  %v7496_v41 = vpop.f32.mrf.mxu1 }
 0x1b5   : > { %v7492_v11 = vadd.f32 %v5024_v13, %v7230_v47 }
 0x1b6   : > { %v5026_v16 = vpop.f32.mrf.mxu0  ;;  %v7501_v56 = vpop.f32.mrf.mxu1 }
 0x1b7   : > { %9445 = vst [vmem:[#allocation21_spill] sm:$0xff] %v7492_v11  ;;  %v5027_v57 = vadd.f32 %v5026_v16, %v5025_v17  ;;  %v5931_v16 = vld [vmem:[%s9339_s3 + $0x120] sm:$0xff]  }
 0x1b8   : > { %v5028_v1 = vpop.f32.mrf.mxu0  ;;  %v7503_v55 = vpop.f32.mrf.mxu1 }
 0x1b9   : > { %v7499_v33 = vadd.f32 %v5027_v57, %v7235_v22  ;;  %v5930_v22 = vld [vmem:[%s9339_s3 + $0x160] sm:$0xff]  }
 0x1ba   : > { %v5029_v43 = vpop.f32.mrf.mxu0  ;;  %v7508_v13 = vpop.f32.mrf.mxu1  ;;  %5439 = vmatprep.subr.bf16.mxu1 %v5930_v22 }
 0x1bb   : > { %9447 = vst [vmem:[#allocation23_spill] sm:$0xff] %v7499_v33  ;;  %v5030_v23 = vadd.f32 %v5029_v43, %v5028_v1  ;;  %5440 = vmatpush3.bf16.msra.mxu1 %v5931_v16 }
 0x1bc   : > { %v5031_v49 = vpop.f32.mrf.mxu0  ;;  %v7510_v24 = vpop.f32.mrf.mxu1 }
 0x1bd   : > { %v7506_v47 = vadd.f32 %v5030_v23, %v7238_v31  ;;  %9449 = vst [vmem:[#allocation25_spill] sm:$0xff] %v7510_v24 }
 0x1be   : > { %v5032_v11 = vpop.f32.mrf.mxu0  ;;  %v7521_v31 = vpop.f32.mrf.mxu1 }
 0x1bf   : > { %9448 = vst [vmem:[#allocation24_spill] sm:$0xff] %v7506_v47  ;;  %v5033_v17 = vadd.f32 %v5032_v11, %v5031_v49  ;;  %v5932_v49 = vld [vmem:[%s9339_s3 + $0x1f8] sm:$0xff]  }
 0x1c0   : > { %v5034_v57 = vpop.f32.mrf.mxu0  ;;  %v7523_v23 = vpop.f32.mrf.mxu1  ;;  %5545 = vmatprep.subr.bf16.mxu0 %v5932_v49 }
 0x1c1   : > { %v7519_v1 = vadd.f32 %v5033_v17, %v7249_v63  ;;  %9451 = vst [vmem:[#allocation27_spill] sm:$0xff] %v7523_v23 }
 0x1c2   : > { %v5035_v43 = vpop.f32.mrf.mxu0  ;;  %v7531_v24 = vpop.f32.mrf.mxu1 }
 0x1c3   : > { %9450 = vst [vmem:[#allocation26_spill] sm:$0xff] %v7519_v1  ;;  %v5036_v11 = vadd.f32 %v5035_v43, %v5034_v57  ;;  %9453 = vst [vmem:[#allocation29_spill] sm:$0xff] %v7531_v24  ;;  %v5934_v43 = vld [vmem:[%s9339_s3 + $0x158] sm:$0xff]  }
 0x1c4   : > { %v5037_v47 = vpop.f32.mrf.mxu0  ;;  %v7533_v17 = vpop.f32.mrf.mxu1  ;;  %5441 = vmatprep.subr.bf16.mxu1 %v5934_v43 }
 0x1c5   : > { %v7529_v33 = vadd.f32 %v5036_v11, %v7252_v26  ;;  %9454 = vst [vmem:[#allocation30_spill] sm:$0xff] %v7533_v17  ;;  %v5935_v26 = vld [vmem:[%s9339_s3 + $0x118] sm:$0xff]  }
 0x1c6   : > { %v5038_v63 = vpop.f32.mrf.mxu0  ;;  %v7538_v57 = vpop.f32.mrf.mxu1  ;;  %5442 = vmatpush3.bf16.msra.mxu1 %v5935_v26 }
 0x1c7   : > { %9452 = vst [vmem:[#allocation28_spill] sm:$0xff] %v7529_v33  ;;  %v5039_v22 = vadd.f32 %v5038_v63, %v5037_v47  ;;  %9456 = vst [vmem:[#allocation32_spill] sm:$0xff] %v7538_v57 }
 0x1c8   : > { %v5040_v1 = vpop.f32.mrf.mxu0  ;;  %v7546_v49 = vpop.f32.mrf.mxu1 }
 0x1c9   : > { %v7536_v16 = vadd.f32 %v5039_v22, %v7257_v37  ;;  %9457 = vst [vmem:[#allocation33_spill] sm:$0xff] %v7546_v49 }
 0x1ca   : > { %v5041_v11 = vpop.f32.mrf.mxu0  ;;  %v7551_v63 = vpop.f32.mrf.mxu1 }
 0x1cb   : > { %9455 = vst [vmem:[#allocation31_spill] sm:$0xff] %v7536_v16  ;;  %v5042_v33 = vadd.f32 %v5041_v11, %v5040_v1 }
 0x1cc   : > { %v5043_v47 = vpop.f32.mrf.mxu0  ;;  %v7553_v16 = vpop.f32.mrf.mxu1 }
 0x1cd   : > { %v7549_v37 = vadd.f32 %v5042_v33, %v7260_v44 }
 0x1ce   : > { %v5044_v22 = vpop.f32.mrf.mxu0  ;;  %v7558_v23 = vpop.f32.mrf.mxu1 }
 0x1cf   : > { %9458 = vst [vmem:[#allocation34_spill] sm:$0xff] %v7549_v37  ;;  %v5045_v57 = vadd.f32 %v5044_v22, %v5043_v47 }
 0x1d0   : > { %v5046_v17 = vpop.f32.mrf.mxu0  ;;  %v7560_v1 = vpop.f32.mrf.mxu1 }
 0x1d1   : > { %v7556_v24 = vadd.f32 %v5045_v57, %v7271_v62 }
 0x1d2   : > { %v5047_v49 = vpop.f32.mrf.mxu0  ;;  %v7565_v33 = vpop.f32.mrf.mxu1 }
 0x1d3   : > { %9459 = vst [vmem:[#allocation35_spill] sm:$0xff] %v7556_v24  ;;  %v5048_v43 = vadd.f32 %v5047_v49, %v5046_v17  ;;  %9461 = vst [vmem:[#allocation37_spill] sm:$0xff] %v7565_v33  ;;  %v5938_v17 = vld [vmem:[%s9339_s3 + $0x150] sm:$0xff]  }
 0x1d4   : > { %v5049_v26 = vpop.f32.mrf.mxu0  ;;  %v7567_v37 = vpop.f32.mrf.mxu1  ;;  %5443 = vmatprep.subr.bf16.mxu1 %v5938_v17 }
 0x1d5   : > { %v7563_v44 = vadd.f32 %v5048_v43, %v7274_v32  ;;  %9462 = vst [vmem:[#allocation38_spill] sm:$0xff] %v7567_v37  ;;  %v5939_v32 = vld [vmem:[%s9339_s3 + $0x110] sm:$0xff]  }
 0x1d6   : > { %v5050_v11 = vpop.f32.mrf.mxu0  ;;  %v7572_v57 = vpop.f32.mrf.mxu1  ;;  %5444 = vmatpush3.bf16.msra.mxu1 %v5939_v32 }
 0x1d7   : > { %9460 = vst [vmem:[#allocation36_spill] sm:$0xff] %v7563_v44  ;;  %v5051_v47 = vadd.f32 %v5050_v11, %v5049_v26  ;;  %9464 = vst [vmem:[#allocation40_spill] sm:$0xff] %v7572_v57 }
 0x1d8   : > { %v5052_v22 = vpop.f32.mrf.mxu0  ;;  %v7580_v43 = vpop.f32.mrf.mxu1 }
 0x1d9   : > { %v7570_v62 = vadd.f32 %v5051_v47, %v7279_v60  ;;  %9465 = vst [vmem:[#allocation41_spill] sm:$0xff] %v7580_v43 }
 0x1da   : > { %v5053_v49 = vpop.f32.mrf.mxu0  ;;  %v7585_v11 = vpop.f32.mrf.mxu1 }
 0x1db   : > { %9463 = vst [vmem:[#allocation39_spill] sm:$0xff] %v7570_v62  ;;  %v5054_v44 = vadd.f32 %v5053_v49, %v5052_v22 }
 0x1dc   : > { %v5055_v26 = vpop.f32.mrf.mxu0  ;;  %v7587_v62 = vpop.f32.mrf.mxu1 }
 0x1dd   : > { %v7583_v60 = vadd.f32 %v5054_v44, %v7282_v30 }
 0x1de   : > { %v5056_v47 = vpop.f32.mrf.mxu0  ;;  %v7592_v33 = vpop.f32.mrf.mxu1 }
 0x1df   : > { %9466 = vst [vmem:[#allocation42_spill] sm:$0xff] %v7583_v60  ;;  %v5057_v24 = vadd.f32 %v5056_v47, %v5055_v26  ;;  %v5091_v26 = vadd.f32 %v7358_v6, %v7348_v58  ;;  %v5097_v60 = vadd.f32 %v7384_v25, %v7379_v10  ;;  %v5109_v10 = vadd.f32 %v7421_v15, %v7419_v36 }
 0x1e0   : > { %v5058_v57 = vpop.f32.mrf.mxu0  ;;  %v7594_v22 = vpop.f32.mrf.mxu1 }
 0x1e1   : > { %v7590_v37 = vadd.f32 %v5057_v24, %v7293_v20  ;;  %v5094_v24 = vadd.f32 %v7371_v3, %v7366_v50  ;;  %v5942_v50 = vld [vmem:[%s9339_s3 + $0x148] sm:$0xff]  }
 0x1e2   : > { %v5059_v43 = vpop.f32.mrf.mxu0  ;;  %v7599_v44 = vpop.f32.mrf.mxu1  ;;  %v5943_v3 = vld [vmem:[%s9339_s3 + $0x108] sm:$0xff]   ;;  %5445 = vmatprep.subr.bf16.mxu1 %v5942_v50 }
 0x1e3   : > { %v5060_v17 = vadd.f32 %v5059_v43, %v5058_v57  ;;  %v5100_v57 = vadd.f32 %v7394_v53, %v7392_v21  ;;  %v5112_v21 = vadd.f32 %v7428_v7, %v7426_v2  ;;  %v7640_v36 = vadd.f32 %v5094_v24, %v7364_v39  ;;  %5446 = vmatpush3.bf16.msra.mxu1 %v5943_v3  ;;  %v9473_v24 = vld [vmem:[#allocation27_spill] sm:$0xff] }
 0x1e4   : > { %v5061_v32 = vpop.f32.mrf.mxu0  ;;  %v7603_v47 = vpop.f32.mrf.mxu1  ;;  %v5118_v2 = vadd.f32 %v7448_v5, %v7446_v52  ;;  %v5124_v39 = vadd.f32 %v7462_v28, %v7460_v19  ;;  %v9468_v5 = vld [vmem:[#allocation10_spill] sm:$0xff] }
 0x1e5   : > { %v7597_v30 = vadd.f32 %v5060_v17, %v7302_v42  ;;  %v5103_v42 = vadd.f32 %v7407_v54, %v7399_v48  ;;  %v5106_v17 = vadd.f32 %v7414_v34, %v7412_v27  ;;  %v1850_v54 = vadd.f32 %v5091_v26, %v7346_v4  ;;  %v9470_v26 = vld [vmem:[#allocation13_spill] sm:$0xff]  ;;  %v9471_v19 = vld [vmem:[#allocation22_spill] sm:$0xff] }
 0x1e6   : > { %v5062_v49 = vpop.f32.mrf.mxu0  ;;  %v7618_v6 = vpop.f32.mrf.mxu1  ;;  %v1858_v34 = vadd.f32 %v5097_v60, %v7377_v0  ;;  %v5121_v4 = vadd.f32 %v7455_v46, %v7453_v8  ;;  %v7662_v60 = vadd.f32 %v5109_v10, %v9468_v5  ;;  %v5133_v46 = vadd.f32 %v7489_v40, %v7487_v45  ;;  %v9477_v10 = vld [vmem:[#allocation15_spill] sm:$0xff] }
 0x1e7   : > { %v5063_v20 = vadd.f32 %v5062_v49, %v5061_v32  ;;  %v7637_v32 = vadd.f32 %v5100_v57, %v7390_v35  ;;  %v7643_v15 = vadd.f32 %v5103_v42, %v7397_v18  ;;  %v7653_v35 = vadd.f32 %v5106_v17, %v7410_v9  ;;  %v9469_v9 = vld [vmem:[#allocation12_spill] sm:$0xff]  ;;  %v9474_v57 = vld [vmem:[#allocation29_spill] sm:$0xff]  ;;  %v9475_v42 = vld [vmem:[#allocation30_spill] sm:$0xff] }
 0x1e8   : > { %v5064_v43 = vpop.f32.mrf.mxu0  ;;  %v7632_v53 = vpop.f32.mrf.mxu1  ;;  %v5127_v18 = vadd.f32 %v7469_v29, %v7467_v14  ;;  %v7667_v49 = vadd.f32 %v5112_v21, %v9469_v9  ;;  %v5136_v29 = vadd.f32 %v7496_v41, %v9471_v19  ;;  %v5139_v14 = vadd.f32 %v7503_v55, %v7501_v56  ;;  %v9476_v17 = vld [vmem:[#allocation9_spill] sm:$0xff]  ;;  %v9478_v41 = vld [vmem:[#allocation14_spill] sm:$0xff]  ;;  %v9479_v55 = vld [vmem:[#allocation32_spill] sm:$0xff] }
 0x1e9   : > { %v7616_v58 = vadd.f32 %v5063_v20, %v7312_v51  ;;  %v5115_v51 = vadd.f32 %v7435_v61, %v7433_v38  ;;  %v9467_v38 = vld [vmem:[#allocation19_spill] sm:$0xff]  ;;  %v5145_v40 = vadd.f32 %v9473_v24, %v7521_v31  ;;  %v7687_v21 = vadd.f32 %v5118_v2, %v9478_v41  ;;  %v9480_v56 = vld [vmem:[#allocation33_spill] sm:$0xff] }
 0x1ea   : > { %v5065_v25 = vpop.f32.mrf.mxu0  ;;  %v5176_v0 = vpop.f32.mrf.mxu1  ;;  %v5130_v61 = vadd.f32 %v9467_v38, %v7474_v59  ;;  %v9472_v59 = vld [vmem:[#allocation25_spill] sm:$0xff]  ;;  %v5157_v2 = vadd.f32 %v7560_v1, %v7558_v23  ;;  %v9490_v23 = vld [vmem:[#allocation38_spill] sm:$0xff] }
 0x1eb   : > { %v5066_v48 = vadd.f32 %v5065_v25, %v5064_v43  ;;  %v7670_v28 = vadd.f32 %v5115_v51, %v9470_v26  ;;  %v5142_v20 = vadd.f32 %v9472_v59, %v7508_v13  ;;  %v5148_v43 = vadd.f32 %v9475_v42, %v9474_v57  ;;  %v9482_v31 = vld [vmem:[#allocation17_spill] sm:$0xff]  ;;  %v9484_v26 = vld [vmem:[#allocation20_spill] sm:$0xff] }
 0x1ec   : > { %v5067_v27 = vpop.f32.mrf.mxu0  ;;  %v5177_v8 = vpop.f32.mrf.mxu1  ;;  %v7684_v25 = vadd.f32 %v5121_v4, %v9477_v10  ;;  %v5151_v51 = vadd.f32 %v9480_v56, %v9479_v55  ;;  %v7695_v38 = vadd.f32 %v5127_v18, %v9482_v31  ;;  %v5154_v4 = vadd.f32 %v7553_v16, %v7551_v63  ;;  %v9486_v18 = vld [vmem:[#allocation26_spill] sm:$0xff]  ;;  %v9489_v63 = vld [vmem:[#allocation37_spill] sm:$0xff]  ;;  %v9492_v55 = vld [vmem:[#allocation28_spill] sm:$0xff] }
 0x1ed   : > { %v7650_v7 = vadd.f32 %v5066_v48, %v7321_v12  ;;  %v9481_v48 = vld [vmem:[#allocation16_spill] sm:$0xff]  ;;  %v7705_v19 = vadd.f32 %v5133_v46, %v9484_v26  ;;  %v7711_v57 = vadd.f32 %v5145_v40, %v9486_v18  ;;  %v5160_v1 = vadd.f32 %v9490_v23, %v9489_v63  ;;  %v9495_v31 = vld [vmem:[#allocation31_spill] sm:$0xff] }
 0x1ee   : > { %v5068_v52 = vpop.f32.mrf.mxu0  ;;  %v5179_v3 = vpop.f32.mrf.mxu1  ;;  %v7723_v56 = vadd.f32 %v5148_v43, %v9492_v55  ;;  %v9497_v43 = vld [vmem:[#allocation34_spill] sm:$0xff] }
 0x1ef   : > { %v5069_v12 = vadd.f32 %v5068_v52, %v5067_v27  ;;  %v7692_v27 = vadd.f32 %v5124_v39, %v9481_v48  ;;  %v9483_v52 = vld [vmem:[#allocation18_spill] sm:$0xff]  ;;  %v9485_v39 = vld [vmem:[#allocation21_spill] sm:$0xff]  ;;  %v7738_v18 = vadd.f32 %v5154_v4, %v9497_v43 }
 0x1f0   : > { %v5070_v45 = vpop.f32.mrf.mxu0  ;;  %v7698_v5 = vadd.f32 %v5130_v61, %v9483_v52  ;;  %v7708_v24 = vadd.f32 %v5136_v29, %v9485_v39  ;;  %v9487_v61 = vld [vmem:[#allocation23_spill] sm:$0xff]  ;;  %v9493_v29 = vld [vmem:[#allocation40_spill] sm:$0xff]  ;;  %v7732_v52 = vadd.f32 %v5151_v51, %v9495_v31  ;;  %v5946_v4 = vld [vmem:[%s9339_s3 + $0x140] sm:$0xff]  }
 0x1f1   : > { %v1809_v50 = vadd.f32 %v5069_v12, %v9476_v17  ;;  %v5180_v12 = vpop.f32.mrf.mxu1  ;;  %v7714_v42 = vadd.f32 %v5139_v14, %v9487_v61  ;;  %v9488_v17 = vld [vmem:[#allocation24_spill] sm:$0xff]  ;;  %v5166_v14 = vadd.f32 %v7587_v62, %v7585_v11  ;;  %v5172_v61 = vadd.f32 %v7603_v47, %v7599_v44  ;;  %v5947_v44 = vld [vmem:[%s9339_s3 + $0x100] sm:$0xff]   ;;  %5447 = vmatprep.subr.bf16.mxu1 %v5946_v4 }
 0x1f2   : > { %v5071_v13 = vpop.f32.mrf.mxu0  ;;  %v7717_v16 = vadd.f32 %v5142_v20, %v9488_v17  ;;  %v5169_v20 = vadd.f32 %v7594_v22, %v7592_v33  ;;  %v5175_v62 = vadd.f32 %v7632_v53, %v7618_v6  ;;  %v5178_v33 = vadd.f32 %v5177_v8, %v5176_v0  ;;  %v9499_v0 = vld [vmem:[#allocation39_spill] sm:$0xff]  ;;  %5448 = vmatpush3.bf16.msra.mxu1 %v5947_v44 }
 0x1f3   : > { %v5072_v9 = vadd.f32 %v5071_v13, %v5070_v45  ;;  %v9491_v45 = vld [vmem:[#allocation11_spill] sm:$0xff]  ;;  %v5182_v46 = vpop.f32.mrf.mxu1  ;;  %v9494_v13 = vld [vmem:[#allocation41_spill] sm:$0xff]  ;;  %v5181_v11 = vadd.f32 %v5180_v12, %v5179_v3 }
 0x1f4   : > { %v5699_v59 = vpop.f32.mrf.mxu0  ;;  %v5163_v40 = vadd.f32 %v9494_v13, %v9493_v29  ;;  %v7755_v53 = vadd.f32 %v5169_v20, %v7590_v37  ;;  %v7773_v55 = vadd.f32 %v5175_v62, %v7616_v58  ;;  %v7776_v29 = vadd.f32 %v5178_v33, %v7650_v7 }
 0x1f5   : > { %v1812_v10 = vadd.f32 %v5072_v9, %v9491_v45  ;;  %v2019_v41 = vadd.f32 %v5699_v59, %v1858_v34  ;;  %v5183_v26 = vpop.f32.mrf.mxu1  ;;  %v9496_v34 = vld [vmem:[#allocation35_spill] sm:$0xff]  ;;  %v7770_v37 = vadd.f32 %v5181_v11, %v1809_v50 }
 0x1f6   : > { %v2010_v48 = vpop.f32.mrf.mxu0  ;;  %v7735_v59 = vadd.f32 %v5157_v2, %v9496_v34  ;;  %v5184_v47 = vadd.f32 %v5183_v26, %v5182_v46  ;;  %v7758_v8 = vadd.f32 %v5163_v40, %v9499_v0  ;;  %v7768_v46 = vadd.f32 %v5172_v61, %v7597_v30 }
 0x1f7   : > { %v2139_v9 = vmax.f32 %v2019_v41, 0.0  ;;  %v2011_v39 = vadd.f32 %v2010_v48, %v1850_v54  ;;  %v9498_v54 = vld [vmem:[#allocation36_spill] sm:$0xff] }
 0x1f8   : > { %v5700_v22 = vpop.f32.mrf.mxu0  ;;  %v7746_v23 = vadd.f32 %v5160_v1, %v9498_v54  ;;  %v7785_v58 = vadd.f32 %v5184_v47, %v1812_v10 }
 0x1f9   : > { %v2204_v51 = vrot.slane %v2139_v9, 7  ;;  %v2137_v17 = vmax.f32 %v2011_v39, 0.0  ;;  %v2022_v63 = vadd.f32 %v5700_v22, %v7637_v32  ;;  %v9500_v32 = vld [vmem:[#allocation42_spill] sm:$0xff] }
 0x1fa   : > { %v2013_v6 = vpop.f32.mrf.mxu0  ;;  %v7761_v3 = vadd.f32 %v5166_v14, %v9500_v32 }
 0x1fb   : > { %v7764_v2 = vsel %vm289_vm0, 0.0, %v2204_v51  ;;  %v2201_v12 = vrot.slane %v2137_v17, 7  ;;  %v2140_v1 = vmax.f32 %v2022_v63, 0.0  ;;  %v2014_v45 = vadd.f32 %v2013_v6, %v7640_v36 }
 0x1fc   : > { %v5703_v41 = vpop.f32.mrf.mxu0  ;;  %v2364_v20 = vrot.slane %v7764_v2, 1 }
 0x1fd   : > { %v7779_v13 = vsel %vm289_vm0, 0.0, %v2201_v12  ;;  %v2205_v40 = vrot.slane %v2140_v1, 7  ;;  %v2138_v14 = vmax.f32 %v2014_v45, 0.0  ;;  %v2035_v36 = vadd.f32 %v5703_v41, %v7662_v60 }
 0x1fe   : > { %v2359_v50 = vrot.slane %v7779_v13, 1  ;;  %v2026_v48 = vpop.f32.mrf.mxu0  ;;  %v2464_v39 = vrot.slane %v7779_v13, 2 }
 0x1ff   : > { %v7788_v7 = vsel %vm289_vm0, %v2204_v51, %v2205_v40  ;;  %v7791_v31 = vsel %vm289_vm0, %v2205_v40, 0.0  ;;  %v2202_v26 = vrot.slane %v2138_v14, 7  ;;  %v2143_v9 = vmax.f32 %v2035_v36, 0.0 }
 0x200   : > { %v2365_v60 = vrot.slane %v7788_v7, 1  ;;  %v2367_v34 = vrot.slane %v7791_v31, 1  ;;  %v5704_v61 = vpop.f32.mrf.mxu0  ;;  %v2027_v11 = vadd.f32 %v2026_v48, %v7643_v15  ;;  %v5933_v15 = vld [vmem:[%s9339_s3 + $0x1b8] sm:$0xff]   ;;  %v7824_v41 = vpack.c.bf16 %v7788_v7, %v2204_v51 }
 0x201   : > { %v7798_v10 = vsel %vm289_vm0, %v2201_v12, %v2202_v26  ;;  %v7801_v62 = vsel %vm289_vm0, %v2202_v26, 0.0  ;;  %v7803_v33 = vrot.slane %v2143_v9, 7  ;;  %v2038_v54 = vadd.f32 %v5704_v61, %v7667_v49  ;;  %v9503_v9 = vld [vmem:[#allocation8_spill] sm:$0xff] }
 0x202   : > { %v2362_v17 = vrot.slane %v7801_v62, 1  ;;  %v2465_v63 = vrot.slane %v7798_v10, 2  ;;  %v2029_v4 = vpop.f32.mrf.mxu0  ;;  %v2141_v47 = vmax.f32 %v2027_v11, 0.0  ;;  %v7816_v0 = vpack.c.bf16 %v7798_v10, %v2201_v12  ;;  %9501 = vst [vmem:[#allocation19_spill] sm:$0xff] %v7824_v41 }
 0x203   : > { %v7812_v44 = vsel %vm289_vm0, 0.0, %v7803_v33  ;;  %v2030_v6 = vadd.f32 %v2029_v4, %v7653_v35  ;;  %v2467_v32 = vrot.slane %v7801_v62, 2  ;;  %v2144_v49 = vmax.f32 %v2038_v54, 0.0  ;;  %v5936_v35 = vld [vmem:[%s9339_s3 + $0x1f0] sm:$0xff]  }
 0x204   : > { %v5707_v45 = vpop.f32.mrf.mxu0  ;;  %v7829_v40 = vrot.slane %v2141_v47, 7  ;;  %4605 = vmatprep.mubr.msk.bf16.mxu0 %vm6270_vm5, %v7816_v0  ;;  %v2360_v48 = vrot.slane %v7798_v10, 1  ;;  %v2366_v61 = vsel %vm456_vm1, %v2364_v20, %v2365_v60  ;;  %v2368_v11 = vsel %vm456_vm1, %v2365_v60, %v2367_v34  ;;  %v5937_v20 = vld [vmem:[%s9339_s3 + $0x1b0] sm:$0xff]   ;;  %v7872_v60 = vld [vmem:[%s9339_s3 + $0x238] sm:$0xff]  }
 0x205   : > { %v2142_v12 = vmax.f32 %v2030_v6, 0.0  ;;  %v2051_v14 = vadd.f32 %v5707_v45, %v7684_v25  ;;  %v2211_v26 = vrot.slane %v2144_v49, 7  ;;  %3410 = vmatmul.mubr.bf16.vlgmr.msra.gmra.mxu0 %v9503_v9  ;;  %v2466_v54 = vsel %vm569_vm2, %v2464_v39, %v2465_v63  ;;  %5729 = vmatprep.subr.bf16.mxu1 %v7872_v60 }
 0x206   : > { %v2042_v51 = vpop.f32.mrf.mxu0  ;;  %v7844_v25 = vsel %vm289_vm0, 0.0, %v7829_v40  ;;  %4609 = vmatprep.mubr.msk.bf16.mxu0 %vm6270_vm5, %v7824_v41  ;;  %5546 = vmatpush3.bf16.msra.mxu0 %v5933_v15  ;;  %v5940_v15 = vld [vmem:[%s9339_s3 + $0x1e8] sm:$0xff]   ;;  %v2361_v30 = vsel %vm456_vm1, %v2359_v50, %v2360_v48  ;;  %v5944_v50 = vld [vmem:[%s9339_s3 + $0x1e0] sm:$0xff]   ;;  %v7908_v39 = vpack.c.bf16 %v2368_v11, %v2366_v61 }
 0x207   : > { %v2208_v4 = vrot.slane %v2142_v12, 7  ;;  %v2147_v47 = vmax.f32 %v2051_v14, 0.0  ;;  %v2043_v6 = vadd.f32 %v2042_v51, %v7670_v28  ;;  %v7857_v34 = vsel %vm289_vm0, %v7803_v33, %v2211_v26  ;;  %5547 = vmatprep.subr.bf16.mxu0 %v5936_v35 }
 0x208   : > { %v7860_v49 = vsel %vm289_vm0, %v2211_v26, 0.0  ;;  %v5708_v28 = vpop.f32.mrf.mxu0  ;;  %v2363_v14 = vsel %vm456_vm1, %v2360_v48, %v2362_v17 }
 0x209   : > { %v7876_v35 = vsel %vm289_vm0, %v7829_v40, %v2208_v4  ;;  %v7879_v26 = vsel %vm289_vm0, %v2208_v4, 0.0  ;;  %v7881_v1 = vrot.slane %v2147_v47, 7  ;;  %v2145_v45 = vmax.f32 %v2043_v6, 0.0  ;;  %v5941_v4 = vld [vmem:[%s9339_s3 + $0x1a8] sm:$0xff]  }
 0x20a   : > { %v2045_v12 = vpop.f32.mrf.mxu0  ;;  %5548 = vmatpush3.bf16.msra.mxu0 %v5937_v20  ;;  %v2054_v22 = vadd.f32 %v5708_v28, %v7692_v27  ;;  %v7906_v51 = vpack.c.bf16 %v2363_v14, %v2361_v30  ;;  %v2468_v30 = vsel %vm569_vm2, %v2465_v63, %v2467_v32  ;;  %v7939_v63 = vpack.c.bf16 %v7876_v35, %v7829_v40 }
 0x20b   : > { %v7895_v47 = vsel %vm289_vm0, 0.0, %v7881_v1  ;;  %v7897_v6 = vrot.slane %v2145_v45, 7  ;;  %5549 = vmatprep.subr.bf16.mxu0 %v5940_v15  ;;  %v2046_v27 = vadd.f32 %v2045_v12, %v7687_v21  ;;  %v5945_v21 = vld [vmem:[%s9339_s3 + $0x1a0] sm:$0xff]   ;;  %v7931_v12 = vpack.c.bf16 %v2468_v30, %v2466_v54 }
 0x20c   : > { %v5711_v13 = vpop.f32.mrf.mxu0  ;;  %v2148_v17 = vmax.f32 %v2054_v22, 0.0  ;;  %3256 = vmatprep.mubr.bf16.mxu1 %v7906_v51  ;;  %9504 = vst [vmem:[#allocation10_spill] sm:$0xff] %v7939_v63  ;;  %v9506_v15 = vrot.slane %v7879_v26, 1  ;;  %v9518_v9 = vrot.slane %v7876_v35, 2 }
 0x20d   : > { %v7912_v45 = vsel %vm289_vm0, 0.0, %v7897_v6  ;;  %v2067_v48 = vadd.f32 %v5711_v13, %v7705_v19  ;;  %4545 = vmatmul.mubr.msk.bf16.gmra.mxu1 %vm6270_vm5, %v7816_v0  ;;  %v2146_v22 = vmax.f32 %v2046_v27, 0.0  ;;  %v2370_v0 = vrot.slane %v7876_v35, 1  ;;  %3418 = vmatmul.mubr.bf16.gmra.mxu0 %v7931_v12 }
 0x20e   : > { %v2058_v28 = vpop.f32.mrf.mxu0  ;;  %5550 = vmatpush3.bf16.msra.mxu0 %v5941_v4  ;;  %v2217_v19 = vrot.slane %v2148_v17, 7  ;;  %3264 = vmatprep.mubr.bf16.mxu1 %v7908_v39  ;;  %v9508_v17 = vrot.slane %v7788_v7, 2 }
 0x20f   : > { %v2059_v61 = vadd.f32 %v2058_v28, %v7695_v38  ;;  %v2151_v11 = vmax.f32 %v2067_v48, 0.0  ;;  %5551 = vmatprep.subr.bf16.mxu0 %v5944_v50  ;;  %v5948_v38 = vld [vmem:[%s9339_s3 + $0x1d8] sm:$0xff]   ;;  %v2214_v4 = vrot.slane %v2146_v22, 7  ;;  %4613 = vmatprep.mubr.msk.bf16.mxu0 %vm6270_vm5, %v7939_v63 }
 0x210   : > { %v5712_v62 = vpop.f32.mrf.mxu0  ;;  %v7945_v54 = vsel %vm289_vm0, %v7881_v1, %v2217_v19  ;;  %v7948_v14 = vsel %vm289_vm0, %v2217_v19, 0.0  ;;  %v5949_v48 = vld [vmem:[%s9339_s3 + $0x198] sm:$0xff]  }
 0x211   : > { %v2149_v10 = vmax.f32 %v2059_v61, 0.0  ;;  %v2070_v32 = vadd.f32 %v5712_v62, %v7708_v24  ;;  %v7950_v13 = vrot.slane %v2151_v11, 7  ;;  %v7965_v28 = vsel %vm289_vm0, %v7897_v6, %v2214_v4 }
 0x212   : > { %v2061_v50 = vpop.f32.mrf.mxu0  ;;  %5552 = vmatpush3.bf16.msra.mxu0 %v5945_v21  ;;  %v7968_v30 = vsel %vm289_vm0, %v2214_v4, 0.0  ;;  %v5950_v21 = vld [vmem:[%s9339_s3 + $0x1d0] sm:$0xff]   ;;  %v2373_v4 = vsel %vm456_vm1, %v2370_v0, %v9506_v15  ;;  %v9509_v15 = vrot.slane %v7764_v2, 2  ;;  %v8022_v2 = vpack.c.bf16 %v7857_v34, %v7803_v33 }
 0x213   : > { %v7972_v61 = vsel %vm289_vm0, 0.0, %v7950_v13  ;;  %v7974_v19 = vrot.slane %v2149_v10, 7  ;;  %5553 = vmatprep.subr.bf16.mxu0 %v5948_v38  ;;  %v2152_v40 = vmax.f32 %v2070_v32, 0.0  ;;  %v9505_v38 = vrot.slane %v7844_v25, 1  ;;  %v5951_v32 = vld [vmem:[%s9339_s3 + $0x190] sm:$0xff]  }
 0x214   : > { %v5715_v22 = vpop.f32.mrf.mxu0  ;;  %v2062_v27 = vadd.f32 %v2061_v50, %v7698_v5  ;;  %v2471_v5 = vsel %vm569_vm2, %v9509_v15, %v9508_v17  ;;  %v5952_v50 = vld [vmem:[%s9339_s3 + $0x1c8] sm:$0xff]   ;;  %9512 = vst [vmem:[#allocation13_spill] sm:$0xff] %v8022_v2 }
 0x215   : > { %v7986_v10 = vsel %vm289_vm0, 0.0, %v7974_v19  ;;  %v2371_v24 = vsel %vm456_vm1, %v9505_v38, %v2370_v0  ;;  %v2223_v62 = vrot.slane %v2152_v40, 7  ;;  %4549 = vmatmul.mubr.msk.bf16.gmra.mxu1 %vm6270_vm5, %v7824_v41  ;;  %v2083_v11 = vadd.f32 %v5715_v22, %v7711_v57 }
 0x216   : > { %v2074_v43 = vpop.f32.mrf.mxu0  ;;  %5554 = vmatpush3.bf16.msra.mxu0 %v5949_v48  ;;  %v8003_v38 = vpack.c.bf16 %v2373_v4, %v2371_v24  ;;  %v2150_v40 = vmax.f32 %v2062_v27, 0.0  ;;  %v9510_v48 = vrot.slane %v7791_v31, 2  ;;  %v9511_v24 = vmov %v9508_v17 }
 0x217   : > { %5555 = vmatprep.subr.bf16.mxu0 %v5950_v21  ;;  %v2075_v57 = vadd.f32 %v2074_v43, %v7714_v42  ;;  %v8026_v17 = vsel %vm289_vm0, %v7950_v13, %v2223_v62  ;;  %v8029_v22 = vsel %vm289_vm0, %v2223_v62, 0.0  ;;  %v2155_v31 = vmax.f32 %v2083_v11, 0.0  ;;  %v5953_v62 = vld [vmem:[%s9339_s3 + $0x188] sm:$0xff]  }
 0x218   : > { %9507 = vst [vmem:[#allocation12_spill] sm:$0xff] %v8003_v38  ;;  %v5716_v0 = vpop.f32.mrf.mxu0  ;;  %v2473_v4 = vsel %vm569_vm2, %v9511_v24, %v9510_v48  ;;  %3272 = vmatprep.mubr.bf16.mxu1 %v8003_v38  ;;  %v2220_v15 = vrot.slane %v2150_v40, 7  ;;  %v9514_v40 = vrot.slane %v7812_v44, 1 }
 0x219   : > { %v8032_v27 = vpack.c.bf16 %v2473_v4, %v2471_v5  ;;  %v8041_v48 = vrot.slane %v2155_v31, 7  ;;  %v2153_v11 = vmax.f32 %v2075_v57, 0.0  ;;  %v2086_v5 = vadd.f32 %v5716_v0, %v7723_v56  ;;  %v5955_v4 = vld [vmem:[%s9339_s3 + $0x1c0] sm:$0xff]  }
 0x21a   : > { %v2077_v7 = vpop.f32.mrf.mxu0  ;;  %5556 = vmatpush3.bf16.msra.mxu0 %v5951_v32  ;;  %v9513_v32 = vrot.slane %v7857_v34, 1  ;;  %v9515_v57 = vrot.slane %v7860_v49, 1  ;;  %v8065_v21 = vsel %vm289_vm0, %v7974_v19, %v2220_v15  ;;  %v8068_v43 = vsel %vm289_vm0, %v2220_v15, 0.0  ;;  %v5956_v15 = vld [vmem:[%s9339_s3 + $0x180] sm:$0xff]  }
 0x21b   : > { %3426 = vmatmul.mubr.bf16.gmra.mxu0 %v8032_v27  ;;  %5557 = vmatprep.subr.bf16.mxu0 %v5952_v50  ;;  %v2078_v50 = vadd.f32 %v2077_v7, %v7717_v16 }
 0x21c   : > { %v5719_v24 = vpop.f32.mrf.mxu0  ;;  %4617 = vmatprep.mubr.msk.bf16.mxu0 %vm6270_vm5, %v8022_v2  ;;  %v2376_v31 = vsel %vm456_vm1, %v9514_v40, %v9513_v32  ;;  %v9516_v56 = vmov %v9513_v32  ;;  %v8072_v32 = vsel %vm289_vm0, 0.0, %v8041_v48  ;;  %v8074_v40 = vrot.slane %v2153_v11, 7 }
 0x21d   : > { %v2378_v0 = vsel %vm456_vm1, %v9516_v56, %v9515_v57  ;;  %v2099_v33 = vadd.f32 %v5719_v24, %v7735_v59  ;;  %v2156_v56 = vmax.f32 %v2086_v5, 0.0  ;;  %4553 = vmatmul.mubr.msk.bf16.gmra.mxu1 %vm6270_vm5, %v7939_v63  ;;  %v2154_v16 = vmax.f32 %v2078_v50, 0.0 }
 0x21e   : > { %v2090_v42 = vpop.f32.mrf.mxu0  ;;  %5558 = vmatpush3.bf16.msra.mxu0 %v5953_v62  ;;  %v8086_v11 = vsel %vm289_vm0, 0.0, %v8074_v40  ;;  %v8091_v57 = vpack.c.bf16 %v2378_v0, %v2376_v31  ;;  %v9519_v5 = vrot.slane %v7844_v25, 2  ;;  %v9520_v31 = vrot.slane %v7879_v26, 2 }
 0x21f   : > { %5559 = vmatprep.subr.bf16.mxu0 %v5955_v4  ;;  %v2159_v20 = vmax.f32 %v2099_v33, 0.0  ;;  %v2229_v24 = vrot.slane %v2156_v56, 7  ;;  %v9521_v0 = vmov %v9518_v9  ;;  %v2091_v62 = vadd.f32 %v2090_v42, %v7732_v52 }
 0x220   : > { %9517 = vst [vmem:[#allocation22_spill] sm:$0xff] %v8091_v57  ;;  %v5720_v59 = vpop.f32.mrf.mxu0  ;;  %3280 = vmatprep.mubr.bf16.mxu1 %v8091_v57  ;;  %v2476_v38 = vsel %vm569_vm2, %v9519_v5, %v9518_v9  ;;  %v2478_v4 = vsel %vm569_vm2, %v9521_v0, %v9520_v31  ;;  %v2226_v50 = vrot.slane %v2154_v16, 7  ;;  %v8113_v57 = vpack.c.bf16 %v7965_v28, %v7897_v6 }
 0x221   : > { %v8107_v33 = vrot.slane %v2159_v20, 7  ;;  %v8109_v56 = vpack.c.bf16 %v2478_v4, %v2476_v38  ;;  %v8117_v9 = vsel %vm289_vm0, %v8041_v48, %v2229_v24  ;;  %v8120_v25 = vsel %vm289_vm0, %v2229_v24, 0.0 }
 0x222   : > { %v2093_v7 = vpop.f32.mrf.mxu0  ;;  %9523 = vst [vmem:[#allocation27_spill] sm:$0xff] %v8113_v57  ;;  %5560 = vmatpush3.bf16.msra.mxu0 %v5956_v15  ;;  %v2157_v35 = vmax.f32 %v2091_v62, 0.0  ;;  %v2102_v52 = vadd.f32 %v5720_v59, %v7746_v23  ;;  %v8130_v16 = vsel %vm289_vm0, %v8074_v40, %v2226_v50  ;;  %v8133_v15 = vsel %vm289_vm0, %v2226_v50, 0.0 }
 0x223   : > { %9522 = vst [vmem:[#allocation25_spill] sm:$0xff] %v8109_v56  ;;  %3434 = vmatmul.mubr.bf16.gmra.mxu0 %v8109_v56  ;;  %v8137_v23 = vsel %vm289_vm0, 0.0, %v8107_v33  ;;  %v2380_v6 = vrot.slane %v7965_v28, 1  ;;  %v2094_v0 = vadd.f32 %v2093_v7, %v7738_v18  ;;  %v9524_v38 = vrot.slane %v7912_v45, 1 }
 0x224   : > { %v5723_v26 = vpop.f32.mrf.mxu0  ;;  %v8139_v59 = vrot.slane %v2157_v35, 7  ;;  %4621 = vmatprep.mubr.msk.bf16.mxu0 %vm6270_vm5, %v8113_v57  ;;  %v2160_v35 = vmax.f32 %v2102_v52, 0.0  ;;  %v9525_v5 = vrot.slane %v7968_v30, 1  ;;  %v9526_v63 = vrot.slane %v7857_v34, 2 }
 0x225   : > { %4557 = vmatmul.mubr.msk.bf16.gmra.mxu1 %vm6270_vm5, %v8022_v2  ;;  %v2115_v4 = vadd.f32 %v5723_v26, %v7755_v53  ;;  %v2381_v52 = vsel %vm456_vm1, %v9524_v38, %v2380_v6  ;;  %v9527_v56 = vrot.slane %v7812_v44, 2  ;;  %v2158_v18 = vmax.f32 %v2094_v0, 0.0 }
 0x226   : > { %v2106_v24 = vpop.f32.mrf.mxu0  ;;  %v8151_v50 = vsel %vm289_vm0, 0.0, %v8139_v59  ;;  %v2235_v42 = vrot.slane %v2160_v35, 7  ;;  %v2383_v2 = vsel %vm456_vm1, %v2380_v6, %v9525_v5  ;;  %v9528_v7 = vrot.slane %v7860_v49, 2 }
 0x227   : > { %v2481_v20 = vsel %vm569_vm2, %v9527_v56, %v9526_v63  ;;  %v8172_v41 = vpack.c.bf16 %v2383_v2, %v2381_v52  ;;  %v2163_v53 = vmax.f32 %v2115_v4, 0.0  ;;  %v9529_v26 = vmov %v9526_v63 }
 0x228   : > { %v5724_v62 = vpop.f32.mrf.mxu0  ;;  %v2483_v38 = vsel %vm569_vm2, %v9529_v26, %v9528_v7  ;;  %v8181_v6 = vsel %vm289_vm0, %v8107_v33, %v2235_v42  ;;  %v8184_v5 = vsel %vm289_vm0, %v2235_v42, 0.0  ;;  %v2107_v63 = vadd.f32 %v2106_v24, %v7758_v8 }
 0x229   : > { %v8186_v44 = vpack.c.bf16 %v2483_v38, %v2481_v20  ;;  %3288 = vmatprep.mubr.bf16.mxu1 %v8172_v41  ;;  %v2232_v4 = vrot.slane %v2158_v18, 7  ;;  %v8194_v35 = vrot.slane %v2163_v53, 7  ;;  %v8199_v8 = vpack.c.bf16 %v7945_v54, %v7881_v1 }
 0x22a   : > { %v2109_v31 = vpop.f32.mrf.mxu0  ;;  %v2161_v20 = vmax.f32 %v2107_v63, 0.0  ;;  %v2118_v42 = vadd.f32 %v5724_v62, %v7768_v46  ;;  %v9531_v24 = vrot.slane %v7945_v54, 1  ;;  %v9532_v52 = vrot.slane %v7895_v47, 1 }
 0x22b   : > { %3442 = vmatmul.mubr.bf16.gmra.mxu0 %v8186_v44  ;;  %9530 = vst [vmem:[#allocation29_spill] sm:$0xff] %v8199_v8  ;;  %v9533_v26 = vrot.slane %v7948_v14, 1  ;;  %v2110_v38 = vadd.f32 %v2109_v31, %v7761_v3  ;;  %v8215_v1 = vsel %vm289_vm0, %v8139_v59, %v2232_v4  ;;  %v8218_v46 = vsel %vm289_vm0, %v2232_v4, 0.0 }
 0x22c   : > { %v5727_v2 = vpop.f32.mrf.mxu0  ;;  %v2386_v7 = vsel %vm456_vm1, %v9532_v52, %v9531_v24  ;;  %v9534_v18 = vmov %v9531_v24  ;;  %v8222_v62 = vsel %vm289_vm0, 0.0, %v8194_v35  ;;  %v8224_v24 = vrot.slane %v2161_v20, 7  ;;  %4625 = vmatprep.mubr.msk.bf16.mxu0 %vm6270_vm5, %v8199_v8 }
 0x22d   : > { %v2388_v53 = vsel %vm456_vm1, %v9534_v18, %v9533_v26  ;;  %4561 = vmatmul.mubr.msk.bf16.gmra.mxu1 %vm6270_vm5, %v8113_v57  ;;  %v2164_v18 = vmax.f32 %v2118_v42, 0.0  ;;  %v2162_v3 = vmax.f32 %v2110_v38, 0.0  ;;  %v2131_v31 = vadd.f32 %v5727_v2, %v7770_v37 }
 0x22e   : > { %v2122_v63 = vpop.f32.mrf.mxu0  ;;  %v8239_v20 = vsel %vm289_vm0, 0.0, %v8224_v24  ;;  %v8241_v0 = vpack.c.bf16 %v2388_v53, %v2386_v7  ;;  %v9536_v26 = vrot.slane %v7965_v28, 2  ;;  %v9537_v52 = vrot.slane %v7912_v45, 2 }
 0x22f   : > { %v2241_v4 = vrot.slane %v2164_v18, 7  ;;  %v9538_v42 = vrot.slane %v7968_v30, 2  ;;  %v2123_v38 = vadd.f32 %v2122_v63, %v7773_v55  ;;  %v2238_v56 = vrot.slane %v2162_v3, 7 }
 0x230   : > { %9535 = vst [vmem:[#allocation30_spill] sm:$0xff] %v8241_v0  ;;  %v5728_v49 = vpop.f32.mrf.mxu0  ;;  %3296 = vmatprep.mubr.bf16.mxu1 %v8241_v0  ;;  %v2486_v57 = vsel %vm569_vm2, %v9537_v52, %v9536_v26  ;;  %v9539_v7 = vmov %v9536_v26  ;;  %v2167_v37 = vmax.f32 %v2131_v31, 0.0  ;;  %v8262_v18 = vpack.c.bf16 %v8065_v21, %v7974_v19 }
 0x231   : > { %v2488_v53 = vsel %vm569_vm2, %v9539_v7, %v9538_v42  ;;  %v8266_v45 = vsel %vm289_vm0, %v8194_v35, %v2241_v4  ;;  %v8269_v30 = vsel %vm289_vm0, %v2241_v4, 0.0  ;;  %v2165_v28 = vmax.f32 %v2123_v38, 0.0 }
 0x232   : > { %v8258_v2 = vpack.c.bf16 %v2488_v53, %v2486_v57  ;;  %v2134_v52 = vadd.f32 %v5728_v49, %v7785_v58  ;;  %v2125_v19 = vpop.f32.mrf.mxu0  ;;  %v8279_v31 = vsel %vm289_vm0, %v8224_v24, %v2238_v56  ;;  %v8282_v4 = vsel %vm289_vm0, %v2238_v56, 0.0 }
 0x233   : > { %v8284_v26 = vrot.slane %v2167_v37, 7  ;;  %v8286_v58 = vrot.slane %v2165_v28, 7  ;;  %v2390_v37 = vrot.slane %v8065_v21, 1  ;;  %v2126_v28 = vadd.f32 %v2125_v19, %v7776_v29 }
 0x234   : > { %3450 = vmatmul.mubr.bf16.gmra.mxu0 %v8258_v2  ;;  %v2168_v56 = vmax.f32 %v2134_v52, 0.0  ;;  %v2527_v3 = vrot.slane %v8282_v4, 2  ;;  %v9540_v57 = vrot.slane %v7986_v10, 1  ;;  %v9541_v42 = vrot.slane %v8068_v43, 1 }
 0x235   : > { %4629 = vmatprep.mubr.msk.bf16.mxu0 %vm6270_vm5, %v8262_v18  ;;  %4565 = vmatmul.mubr.msk.bf16.gmra.mxu1 %vm6270_vm5, %v8199_v8  ;;  %v8299_v53 = vsel %vm289_vm0, 0.0, %v8284_v26  ;;  %v8303_v38 = vsel %vm289_vm0, 0.0, %v8286_v58  ;;  %v2166_v8 = vmax.f32 %v2126_v28, 0.0  ;;  %v9542_v29 = vrot.slane %v7945_v54, 2 }
 0x236   : > { %v2247_v7 = vrot.slane %v2168_v56, 7  ;;  %v2391_v63 = vsel %vm456_vm1, %v9540_v57, %v2390_v37  ;;  %v2393_v34 = vsel %vm456_vm1, %v2390_v37, %v9541_v42  ;;  %v9543_v19 = vrot.slane %v7895_v47, 2 }
 0x237   : > { %v8317_v0 = vpack.c.bf16 %v2393_v34, %v2391_v63  ;;  %v9544_v52 = vrot.slane %v7948_v14, 2  ;;  %v9545_v56 = vmov %v9542_v29  ;;  %v8331_v57 = vpack.c.bf16 %v8026_v17, %v7950_v13 }
 0x238   : > { %v2491_v49 = vsel %vm569_vm2, %v9543_v19, %v9542_v29  ;;  %v8335_v34 = vsel %vm289_vm0, %v8284_v26, %v2247_v7  ;;  %v8338_v63 = vsel %vm289_vm0, %v2247_v7, 0.0  ;;  %v2244_v47 = vrot.slane %v2166_v8, 7 }
 0x239   : > { %v2493_v55 = vsel %vm569_vm2, %v9545_v56, %v9544_v52  ;;  %3304 = vmatprep.mubr.bf16.mxu1 %v8317_v0  ;;  %v9546_v8 = vrot.slane %v8026_v17, 1  ;;  %v9548_v52 = vrot.slane %v8029_v22, 1  ;;  %v8388_v28 = vpack.c.bf16 %v8130_v16, %v8074_v40 }
 0x23a   : > { %v8340_v42 = vpack.c.bf16 %v2493_v55, %v2491_v49  ;;  %v8349_v13 = vsel %vm289_vm0, %v8286_v58, %v2244_v47  ;;  %v8352_v7 = vsel %vm289_vm0, %v2244_v47, 0.0  ;;  %v9547_v55 = vrot.slane %v7972_v61, 1 }
 0x23b   : > { %v9549_v29 = vmov %v9546_v8  ;;  %v2432_v56 = vrot.slane %v8352_v7, 1  ;;  %v2400_v47 = vrot.slane %v8130_v16, 1  ;;  %v8406_v40 = vpack.c.bf16 %v8117_v9, %v8041_v48 }
 0x23c   : > { %3458 = vmatmul.mubr.bf16.gmra.mxu0 %v8340_v42  ;;  %v2396_v49 = vsel %vm456_vm1, %v9547_v55, %v9546_v8  ;;  %v2398_v19 = vsel %vm456_vm1, %v9549_v29, %v9548_v52  ;;  %v9550_v8 = vrot.slane %v8065_v21, 2  ;;  %v9551_v55 = vrot.slane %v7986_v10, 2 }
 0x23d   : > { %4569 = vmatmul.mubr.msk.bf16.gmra.mxu1 %vm6270_vm5, %v8262_v18  ;;  %4633 = vmatprep.mubr.msk.bf16.mxu0 %vm6270_vm5, %v8331_v57  ;;  %v8374_v37 = vpack.c.bf16 %v2398_v19, %v2396_v49  ;;  %v9552_v52 = vrot.slane %v8068_v43, 2  ;;  %v9554_v10 = vrot.slane %v8026_v17, 2  ;;  %v9555_v19 = vrot.slane %v7972_v61, 2 }
 0x23e   : > { %v2496_v54 = vsel %vm569_vm2, %v9551_v55, %v9550_v8  ;;  %v9553_v29 = vmov %v9550_v8  ;;  %v9556_v21 = vrot.slane %v8029_v22, 2  ;;  %v9560_v22 = vrot.slane %v8117_v9, 1 }
 0x23f   : > { %v2498_v14 = vsel %vm569_vm2, %v9553_v29, %v9552_v52  ;;  %3312 = vmatprep.mubr.bf16.mxu1 %v8374_v37  ;;  %v2501_v43 = vsel %vm569_vm2, %v9555_v19, %v9554_v10  ;;  %v9557_v8 = vmov %v9554_v10  ;;  %v9558_v52 = vrot.slane %v8086_v11, 1 }
 0x240   : > { %v8392_v49 = vpack.c.bf16 %v2498_v14, %v2496_v54  ;;  %v2503_v55 = vsel %vm569_vm2, %v9557_v8, %v9556_v21  ;;  %v9559_v54 = vrot.slane %v8133_v15, 1  ;;  %v9561_v17 = vrot.slane %v8072_v32, 1 }
 0x241   : > { %v2401_v14 = vsel %vm456_vm1, %v9558_v52, %v2400_v47  ;;  %v8414_v29 = vpack.c.bf16 %v2503_v55, %v2501_v43  ;;  %v9562_v48 = vrot.slane %v8120_v25, 1  ;;  %v9563_v21 = vmov %v9560_v22 }
 0x242   : > { %v2403_v61 = vsel %vm456_vm1, %v2400_v47, %v9559_v54  ;;  %v2406_v10 = vsel %vm456_vm1, %v9561_v17, %v9560_v22  ;;  %v9564_v52 = vrot.slane %v8130_v16, 2  ;;  %v9565_v47 = vrot.slane %v8086_v11, 2 }
 0x243   : > { %v8421_v19 = vpack.c.bf16 %v2403_v61, %v2401_v14  ;;  %v2408_v8 = vsel %vm456_vm1, %v9563_v21, %v9562_v48  ;;  %v9566_v55 = vrot.slane %v8133_v15, 2  ;;  %v8444_v17 = vpack.c.bf16 %v8215_v1, %v8139_v59 }
 0x244   : > { %v2506_v43 = vsel %vm569_vm2, %v9565_v47, %v9564_v52  ;;  %v9567_v54 = vmov %v9564_v52  ;;  %v8438_v14 = vpack.c.bf16 %v2408_v8, %v2406_v10  ;;  %v2410_v48 = vrot.slane %v8215_v1, 1  ;;  %3466 = vmatmul.mubr.bf16.gmra.mxu0 %v8392_v49 }
 0x245   : > { %v2508_v22 = vsel %vm569_vm2, %v9567_v54, %v9566_v55  ;;  %v9568_v11 = vrot.slane %v8117_v9, 2  ;;  %v9569_v21 = vrot.slane %v8072_v32, 2  ;;  %v9570_v16 = vrot.slane %v8120_v25, 2  ;;  %4573 = vmatmul.mubr.msk.bf16.gmra.mxu1 %vm6270_vm5, %v8331_v57  ;;  %4637 = vmatprep.mubr.msk.bf16.mxu0 %vm6270_vm5, %v8388_v28 }
 0x246   : > { %v8440_v61 = vpack.c.bf16 %v2508_v22, %v2506_v43  ;;  %v8459_v8 = vpack.c.bf16 %v8181_v6, %v8107_v33  ;;  %v9572_v59 = vrot.slane %v8181_v6, 1  ;;  %v9573_v47 = vrot.slane %v8137_v23, 1  ;;  %3320 = vmatprep.mubr.bf16.mxu1 %v8421_v19 }
 0x247   : > { %v2511_v15 = vsel %vm569_vm2, %v9569_v21, %v9568_v11  ;;  %v9571_v52 = vmov %v9568_v11  ;;  %v9574_v32 = vrot.slane %v8151_v50, 1  ;;  %v9575_v25 = vrot.slane %v8218_v46, 1 }
 0x248   : > { %v2513_v10 = vsel %vm569_vm2, %v9571_v52, %v9570_v16  ;;  %v2416_v43 = vsel %vm456_vm1, %v9573_v47, %v9572_v59  ;;  %v2420_v54 = vrot.slane %v8279_v31, 1  ;;  %v9576_v11 = vrot.slane %v8184_v5, 1 }
 0x249   : > { %v2411_v9 = vsel %vm456_vm1, %v9574_v32, %v2410_v48  ;;  %v2413_v33 = vsel %vm456_vm1, %v2410_v48, %v9575_v25  ;;  %v8476_v55 = vpack.c.bf16 %v2513_v10, %v2511_v15  ;;  %v9577_v21 = vmov %v9572_v59 }
 0x24a   : > { %v8483_v22 = vpack.c.bf16 %v2413_v33, %v2411_v9  ;;  %v2418_v16 = vsel %vm456_vm1, %v9577_v21, %v9576_v11  ;;  %v9578_v48 = vrot.slane %v8215_v1, 2  ;;  %v9579_v15 = vrot.slane %v8151_v50, 2 }
 0x24b   : > { %v2430_v10 = vrot.slane %v8349_v13, 1  ;;  %v8496_v59 = vpack.c.bf16 %v2418_v16, %v2416_v43  ;;  %v9580_v47 = vrot.slane %v8218_v46, 2  ;;  %v8505_v25 = vpack.c.bf16 %v8279_v31, %v8224_v24 }
 0x24c   : > { %v2516_v52 = vsel %vm569_vm2, %v9579_v15, %v9578_v48  ;;  %v9581_v32 = vmov %v9578_v48  ;;  %v9582_v33 = vrot.slane %v8239_v20, 1  ;;  %v9583_v21 = vrot.slane %v8282_v4, 1  ;;  %3474 = vmatmul.mubr.bf16.gmra.mxu0 %v8414_v29 }
 0x24d   : > { %v2518_v9 = vsel %vm569_vm2, %v9581_v32, %v9580_v47  ;;  %v9584_v46 = vrot.slane %v8181_v6, 2  ;;  %v9585_v1 = vrot.slane %v8137_v23, 2  ;;  %v9586_v48 = vrot.slane %v8184_v5, 2  ;;  %4577 = vmatmul.mubr.msk.bf16.gmra.mxu1 %vm6270_vm5, %v8388_v28  ;;  %4641 = vmatprep.mubr.msk.bf16.mxu0 %vm6270_vm5, %v8406_v40 }
 0x24e   : > { %v2421_v50 = vsel %vm456_vm1, %v9582_v33, %v2420_v54  ;;  %v8510_v11 = vpack.c.bf16 %v2518_v9, %v2516_v52  ;;  %v2423_v43 = vsel %vm456_vm1, %v2420_v54, %v9583_v21  ;;  %v8531_v32 = vpack.c.bf16 %v8266_v45, %v8194_v35  ;;  %v5225_v33 = vpop.f32.mrf.mxu1  ;;  %3328 = vmatprep.mubr.bf16.mxu1 %v8438_v14 }
 0x24f   : > { %v2521_v16 = vsel %vm569_vm2, %v9585_v1, %v9584_v46  ;;  %v9587_v24 = vmov %v9584_v46  ;;  %v8525_v47 = vpack.c.bf16 %v2423_v43, %v2421_v50  ;;  %v9588_v54 = vrot.slane %v8266_v45, 1 }
 0x250   : > { %v2523_v15 = vsel %vm569_vm2, %v9587_v24, %v9586_v48  ;;  %v9589_v23 = vrot.slane %v8222_v62, 1  ;;  %v9590_v5 = vrot.slane %v8269_v30, 1  ;;  %v9592_v21 = vrot.slane %v8279_v31, 2 }
 0x251   : > { %v8527_v52 = vpack.c.bf16 %v2523_v15, %v2521_v16  ;;  %v9591_v6 = vmov %v9588_v54  ;;  %v9593_v43 = vrot.slane %v8239_v20, 2  ;;  %v8555_v16 = vpack.c.bf16 %v8349_v13, %v8286_v58 }
 0x252   : > { %v2426_v9 = vsel %vm456_vm1, %v9589_v23, %v9588_v54  ;;  %v2428_v50 = vsel %vm456_vm1, %v9591_v6, %v9590_v5  ;;  %v9594_v46 = vmov %v9592_v21  ;;  %v9595_v15 = vrot.slane %v8303_v38, 1 }
 0x253   : > { %v2526_v35 = vsel %vm569_vm2, %v9593_v43, %v9592_v21  ;;  %v2528_v1 = vsel %vm569_vm2, %v9594_v46, %v2527_v3  ;;  %v8557_v48 = vpack.c.bf16 %v2428_v50, %v2426_v9  ;;  %v2433_v4 = vsel %vm456_vm1, %v2430_v10, %v2432_v56  ;;  %v5226_v43 = vpop.f32.mrf.mxu1 }
 0x254   : > { %v8559_v24 = vpack.c.bf16 %v2528_v1, %v2526_v35  ;;  %v2431_v20 = vsel %vm456_vm1, %v9595_v15, %v2430_v10  ;;  %v9596_v3 = vrot.slane %v8266_v45, 2  ;;  %v9597_v31 = vrot.slane %v8222_v62, 2  ;;  %3482 = vmatmul.mubr.bf16.gmra.mxu0 %v8440_v61 }
 0x255   : > { %v8567_v54 = vpack.c.bf16 %v2433_v4, %v2431_v20  ;;  %v9598_v23 = vrot.slane %v8269_v30, 2  ;;  %v8581_v6 = vpack.c.bf16 %v8335_v34, %v8284_v26  ;;  %v2578_v56 = vrot.slane %v8299_v53, 2  ;;  %4581 = vmatmul.mubr.msk.bf16.gmra.mxu1 %vm6270_vm5, %v8406_v40  ;;  %4645 = vmatprep.mubr.msk.bf16.mxu0 %vm6270_vm5, %v8444_v17 }
 0x256   : > { %v2531_v58 = vsel %vm569_vm2, %v9597_v31, %v9596_v3  ;;  %v9599_v9 = vmov %v9596_v3  ;;  %v9600_v30 = vrot.slane %v8349_v13, 2  ;;  %v9601_v45 = vrot.slane %v8303_v38, 2  ;;  %3336 = vmatprep.mubr.bf16.mxu1 %v8483_v22 }
 0x257   : > { %v2533_v5 = vsel %vm569_vm2, %v9599_v9, %v9598_v23  ;;  %v9602_v50 = vrot.slane %v8352_v7, 2  ;;  %v8606_v46 = vadd.f32 %v5226_v43, %v5225_v33  ;;  %v9604_v38 = vrot.slane %v8335_v34, 1  ;;  %v9611_v9 = vld [vmem:[#allocation19_spill] sm:$0xff]  ;;  %v9619_v43 = vld [vmem:[#allocation29_spill] sm:$0xff] }
 0x258   : > { %v8588_v62 = vpack.c.bf16 %v2533_v5, %v2531_v58  ;;  %v2536_v10 = vsel %vm569_vm2, %v9601_v45, %v9600_v30  ;;  %v9603_v26 = vmov %v9600_v30  ;;  %v9605_v1 = vrot.slane %v8299_v53, 1  ;;  %v5960_v5 = vld [vmem:[%s9339_s3 + $0x218] sm:$0xff]   ;;  %v9614_v30 = vld [vmem:[#allocation10_spill] sm:$0xff] }
 0x259   : > { %v2538_v21 = vsel %vm569_vm2, %v9603_v26, %v9602_v50  ;;  %v9606_v13 = vrot.slane %v8338_v63, 1  ;;  %v9607_v15 = vmov %v9604_v38  ;;  %v9608_v4 = vrot.slane %v8335_v34, 2  ;;  %v5957_v34 = vld [vmem:[%s9339_s3 + $0x230] sm:$0xff]   ;;  %v5962_v45 = vld [vmem:[%s9339_s3 + $0x208] sm:$0xff]   ;;  %v9616_v50 = vld [vmem:[#allocation13_spill] sm:$0xff] }
 0x25a   : > { %v8604_v35 = vpack.c.bf16 %v2538_v21, %v2536_v10  ;;  %v2573_v7 = vsel %vm456_vm1, %v9605_v1, %v9604_v38  ;;  %v9609_v31 = vrot.slane %v8338_v63, 2  ;;  %v5958_v63 = vld [vmem:[%s9339_s3 + $0x228] sm:$0xff]   ;;  %v5963_v10 = vld [vmem:[%s9339_s3 + $0x200] sm:$0xff]   ;;  %v9617_v26 = vld [vmem:[#allocation27_spill] sm:$0xff] }
 0x25b   : > { %v2575_v20 = vsel %vm456_vm1, %v9607_v15, %v9606_v13  ;;  %v2580_v3 = vsel %vm569_vm2, %v2578_v56, %v9608_v4  ;;  %v9610_v33 = vmov %v9608_v4  ;;  %v5961_v56 = vld [vmem:[%s9339_s3 + $0x210] sm:$0xff]   ;;  %v9618_v21 = vld [vmem:[#allocation30_spill] sm:$0xff] }
 0x25c   : > { %v2582_v58 = vsel %vm569_vm2, %v9610_v33, %v9609_v31  ;;  %v8626_v23 = vpack.c.bf16 %v2575_v20, %v2573_v7  ;;  %3490 = vmatmul.mubr.bf16.gmra.mxu0 %v8476_v55 }
 0x25d   : > { %v8628_v53 = vpack.c.bf16 %v2582_v58, %v2580_v3  ;;  %4585 = vmatmul.mubr.msk.bf16.gmra.mxu1 %vm6270_vm5, %v8444_v17  ;;  %4649 = vmatprep.mubr.msk.bf16.mxu0 %vm6270_vm5, %v8459_v8 }
 0x25e   : > { %3344 = vmatprep.mubr.bf16.mxu1 %v8496_v59 }
 0x264   : > { %3498 = vmatmul.mubr.bf16.gmra.mxu0 %v8510_v11 }
 0x265   : > { %4589 = vmatmul.mubr.msk.bf16.gmra.mxu1 %vm6270_vm5, %v8459_v8  ;;  %4653 = vmatprep.mubr.msk.bf16.mxu0 %vm6270_vm5, %v8505_v25 }
 0x266   : > { %3352 = vmatprep.mubr.bf16.mxu1 %v8525_v47 }
 0x26c   : > { %3506 = vmatmul.mubr.bf16.gmra.mxu0 %v8527_v52 }
 0x26d   : > { %4593 = vmatmul.mubr.msk.bf16.gmra.mxu1 %vm6270_vm5, %v8505_v25  ;;  %4657 = vmatprep.mubr.msk.bf16.mxu0 %vm6270_vm5, %v8531_v32 }
 0x26e   : > { %3360 = vmatprep.mubr.bf16.mxu1 %v8557_v48 }
 0x274   : > { %3514 = vmatmul.mubr.bf16.gmra.mxu0 %v8559_v24 }
 0x275   : > { %4597 = vmatmul.mubr.msk.bf16.gmra.mxu1 %vm6270_vm5, %v8531_v32  ;;  %4661 = vmatprep.mubr.msk.bf16.mxu0 %vm6270_vm5, %v8555_v16 }
 0x276   : > { %3368 = vmatprep.mubr.bf16.mxu1 %v8567_v54 }
 0x27c   : > { %3522 = vmatmul.mubr.bf16.gmra.mxu0 %v8588_v62 }
 0x27d   : > { %4601 = vmatmul.mubr.msk.bf16.gmra.mxu1 %vm6270_vm5, %v8555_v16  ;;  %4665 = vmatprep.mubr.msk.bf16.mxu0 %vm6270_vm5, %v8581_v6 }
 0x27e   : > { %3570 = vmatprep.mubr.bf16.mxu1 %v7931_v12  ;;  %v5959_v12 = vld [vmem:[%s9339_s3 + $0x220] sm:$0xff]  }
 0x284   : > { %3530 = vmatmul.mubr.bf16.gmra.mxu0 %v8604_v35 }
 0x285   : > { %3571 = vmatmul.mubr.bf16.vlgmr.msra.gmra.mxu1 %v7906_v51  ;;  %3731 = vmatprep.mubr.bf16.mxu0 %v7908_v39  ;;  %v9612_v51 = vld [vmem:[#allocation12_spill] sm:$0xff] }
 0x286   : > { %3578 = vmatprep.mubr.bf16.mxu1 %v8032_v27  ;;  %5730 = vmatpush3.bf16.msra.mxu1 %v7872_v60  ;;  %v9613_v60 = vld [vmem:[#allocation25_spill] sm:$0xff] }
 0x287   : > { %5731 = vmatprep.subr.bf16.mxu1 %v5957_v34 }
 0x28a   : > { %5732 = vmatpush3.bf16.msra.mxu1 %v5957_v34 }
 0x28b   : > { %5733 = vmatprep.subr.bf16.mxu1 %v5958_v63 }
 0x28c   : > { %4669 = vmatmul.mubr.msk.bf16.vlgmr.msra.gmra.mxu0 %vm6270_vm5, %v9611_v9 }
 0x28d   : > { %3579 = vmatmul.mubr.bf16.gmra.mxu1 %v7908_v39  ;;  %3739 = vmatprep.mubr.bf16.mxu0 %v9612_v51  ;;  %v9615_v39 = vld [vmem:[#allocation22_spill] sm:$0xff] }
 0x28e   : > { %3586 = vmatprep.mubr.bf16.mxu1 %v9613_v60  ;;  %5734 = vmatpush3.bf16.msra.mxu1 %v5958_v63 }
 0x28f   : > { %5735 = vmatprep.subr.bf16.mxu1 %v5959_v12 }
 0x292   : > { %5736 = vmatpush3.bf16.msra.mxu1 %v5959_v12 }
 0x293   : > { %5737 = vmatprep.subr.bf16.mxu1 %v5960_v5 }
 0x294   : > { %4673 = vmatmul.mubr.msk.bf16.gmra.mxu0 %vm6270_vm5, %v9614_v30 }
 0x295   : > { %3587 = vmatmul.mubr.bf16.gmra.mxu1 %v9612_v51  ;;  %3747 = vmatprep.mubr.bf16.mxu0 %v9615_v39 }
 0x296   : > { %3594 = vmatprep.mubr.bf16.mxu1 %v8186_v44  ;;  %5738 = vmatpush3.bf16.msra.mxu1 %v5960_v5 }
 0x297   : > { %5739 = vmatprep.subr.bf16.mxu1 %v5961_v56 }
 0x29a   : > { %5740 = vmatpush3.bf16.msra.mxu1 %v5961_v56 }
 0x29b   : > { %5741 = vmatprep.subr.bf16.mxu1 %v5962_v45 }
 0x29c   : > { %4677 = vmatmul.mubr.msk.bf16.gmra.mxu0 %vm6270_vm5, %v9616_v50 }
 0x29d   : > { %3595 = vmatmul.mubr.bf16.gmra.mxu1 %v9615_v39  ;;  %3755 = vmatprep.mubr.bf16.mxu0 %v8172_v41 }
 0x29e   : > { %3602 = vmatprep.mubr.bf16.mxu1 %v8258_v2  ;;  %5742 = vmatpush3.bf16.msra.mxu1 %v5962_v45 }
 0x29f   : > { %5743 = vmatprep.subr.bf16.mxu1 %v5963_v10 }
 0x2a2   : > { %5744 = vmatpush3.bf16.msra.mxu1 %v5963_v10 }
 0x2a4   : > { %4681 = vmatmul.mubr.msk.bf16.gmra.mxu0 %vm6270_vm5, %v9617_v26 }
 0x2a5   : > { %3603 = vmatmul.mubr.bf16.gmra.mxu1 %v8172_v41  ;;  %3763 = vmatprep.mubr.bf16.mxu0 %v9618_v21  ;;  %v5228_v41 = vpop.f32.mrf.mxu1 }
 0x2a6   : > { %3610 = vmatprep.mubr.bf16.mxu1 %v8340_v42 }
 0x2ac   : > { %4685 = vmatmul.mubr.msk.bf16.gmra.mxu0 %vm6270_vm5, %v9619_v43 }
 0x2ad   : > { %3611 = vmatmul.mubr.bf16.gmra.mxu1 %v9618_v21  ;;  %3771 = vmatprep.mubr.bf16.mxu0 %v8317_v0 }
 0x2ae   : > { %3618 = vmatprep.mubr.bf16.mxu1 %v8392_v49 }
 0x2b4   : > { %4689 = vmatmul.mubr.msk.bf16.gmra.mxu0 %vm6270_vm5, %v8262_v18  ;;  %v8749_v18 = vld [vmem:[%s9340_s4] ss:$0 sm:$0xff] }
 0x2b5   : > { %3619 = vmatmul.mubr.bf16.gmra.mxu1 %v8317_v0  ;;  %3779 = vmatprep.mubr.bf16.mxu0 %v8374_v37  ;;  %v5229_v0 = vpop.f32.mrf.mxu1 }
 0x2b6   : > { %3626 = vmatprep.mubr.bf16.mxu1 %v8414_v29  ;;  %v5230_v1 = vadd.f32 %v5229_v0, %v5228_v41 }
 0x2b8   : > { %v3254_v4 = vadd.f32 %v5230_v1, %v8749_v18 }
 0x2bc   : > { %4693 = vmatmul.mubr.msk.bf16.gmra.mxu0 %vm6270_vm5, %v8331_v57 }
 0x2bd   : > { %3627 = vmatmul.mubr.bf16.gmra.mxu1 %v8374_v37  ;;  %3787 = vmatprep.mubr.bf16.mxu0 %v8421_v19  ;;  %v3251_v37 = vadd.f32 %v8606_v46, %v8749_v18 }
 0x2be   : > { %3634 = vmatprep.mubr.bf16.mxu1 %v8440_v61 }
 0x2c4   : > { %4697 = vmatmul.mubr.msk.bf16.gmra.mxu0 %vm6270_vm5, %v8388_v28 }
 0x2c5   : > { %v5337_v38 = vpop.f32.mrf.mxu0  ;;  %3635 = vmatmul.mubr.bf16.gmra.mxu1 %v8421_v19  ;;  %3795 = vmatprep.mubr.bf16.mxu0 %v8438_v14 }
 0x2c6   : > { %3642 = vmatprep.mubr.bf16.mxu1 %v8476_v55 }
 0x2c7   : > { %v5338_v57 = vpop.f32.mrf.mxu0 }
 0x2c8   : > { %v5339_v7 = vadd.f32 %v5338_v57, %v5337_v38 }
 0x2c9   : > { %v5340_v13 = vpop.f32.mrf.mxu0 }
 0x2ca   : > { %v8759_v15 = vadd.f32 %v5339_v7, %v3251_v37 }
 0x2cb   : > { %v5341_v20 = vpop.f32.mrf.mxu0 }
 0x2cc   : > { %v5342_v3 = vadd.f32 %v5341_v20, %v5340_v13  ;;  %4701 = vmatmul.mubr.msk.bf16.gmra.mxu0 %vm6270_vm5, %v8406_v40 }
 0x2cd   : > { %v5231_v19 = vpop.f32.mrf.mxu1  ;;  %3643 = vmatmul.mubr.bf16.gmra.mxu1 %v8438_v14  ;;  %3803 = vmatprep.mubr.bf16.mxu0 %v8483_v22  ;;  %v5343_v31 = vpop.f32.mrf.mxu0 }
 0x2ce   : > { %v8762_v28 = vadd.f32 %v5342_v3, %v3254_v4  ;;  %3650 = vmatprep.mubr.bf16.mxu1 %v8510_v11 }
 0x2cf   : > { %v5232_v46 = vpop.f32.mrf.mxu1  ;;  %v5344_v34 = vpop.f32.mrf.mxu0 }
 0x2d0   : > { %v5233_v33 = vadd.f32 %v5232_v46, %v5231_v19  ;;  %v5345_v12 = vadd.f32 %v5344_v34, %v5343_v31 }
 0x2d1   : > { %v5234_v58 = vpop.f32.mrf.mxu1  ;;  %v5346_v51 = vpop.f32.mrf.mxu0 }
 0x2d2   : > { %v3259_v63 = vadd.f32 %v5233_v33, %v8749_v18 }
 0x2d3   : > { %v5235_v9 = vpop.f32.mrf.mxu1  ;;  %v5347_v14 = vpop.f32.mrf.mxu0 }
 0x2d4   : > { %v5236_v5 = vadd.f32 %v5235_v9, %v5234_v58  ;;  %v8771_v56 = vadd.f32 %v5345_v12, %v3259_v63  ;;  %4705 = vmatmul.mubr.msk.bf16.gmra.mxu0 %vm6270_vm5, %v8444_v17  ;;  %v5348_v39 = vadd.f32 %v5347_v14, %v5346_v51 }
 0x2d5   : > { %v5237_v40 = vpop.f32.mrf.mxu1  ;;  %3651 = vmatmul.mubr.bf16.gmra.mxu1 %v8483_v22  ;;  %3811 = vmatprep.mubr.bf16.mxu0 %v8496_v59 }
 0x2d6   : > { %v3262_v30 = vadd.f32 %v5236_v5, %v8749_v18  ;;  %3658 = vmatprep.mubr.bf16.mxu1 %v8527_v52 }
 0x2d7   : > { %v5238_v45 = vpop.f32.mrf.mxu1 }
 0x2d8   : > { %v5239_v10 = vadd.f32 %v5238_v45, %v5237_v40  ;;  %v8780_v50 = vadd.f32 %v5348_v39, %v3262_v30 }
 0x2d9   : > { %v5240_v26 = vpop.f32.mrf.mxu1 }
 0x2da   : > { %v3267_v17 = vadd.f32 %v5239_v10, %v8749_v18 }
 0x2db   : > { %v5349_v21 = vpop.f32.mrf.mxu0  ;;  %v5241_v43 = vpop.f32.mrf.mxu1 }
 0x2dc   : > { %v5242_v0 = vadd.f32 %v5241_v43, %v5240_v26  ;;  %4709 = vmatmul.mubr.msk.bf16.gmra.mxu0 %vm6270_vm5, %v8459_v8 }
 0x2dd   : > { %v5350_v41 = vpop.f32.mrf.mxu0  ;;  %v5243_v38 = vpop.f32.mrf.mxu1  ;;  %3659 = vmatmul.mubr.bf16.gmra.mxu1 %v8496_v59  ;;  %3819 = vmatprep.mubr.bf16.mxu0 %v8525_v47 }
 0x2de   : > { %v5351_v22 = vadd.f32 %v5350_v41, %v5349_v21  ;;  %3666 = vmatprep.mubr.bf16.mxu1 %v8559_v24  ;;  %v3270_v13 = vadd.f32 %v5242_v0, %v8749_v18 }
 0x2df   : > { %v5352_v57 = vpop.f32.mrf.mxu0  ;;  %v5244_v1 = vpop.f32.mrf.mxu1 }
 0x2e0   : > { %v8788_v37 = vadd.f32 %v5351_v22, %v3267_v17  ;;  %v5245_v20 = vadd.f32 %v5244_v1, %v5243_v38 }
 0x2e1   : > { %v5353_v7 = vpop.f32.mrf.mxu0  ;;  %v5246_v3 = vpop.f32.mrf.mxu1 }
 0x2e2   : > { %v5354_v4 = vadd.f32 %v5353_v7, %v5352_v57  ;;  %v3275_v33 = vadd.f32 %v5245_v20, %v8749_v18 }
 0x2e3   : > { %v5355_v8 = vpop.f32.mrf.mxu0  ;;  %v5247_v46 = vpop.f32.mrf.mxu1 }
 0x2e4   : > { %v8792_v19 = vadd.f32 %v5354_v4, %v3270_v13  ;;  %v5248_v31 = vadd.f32 %v5247_v46, %v5246_v3  ;;  %4713 = vmatmul.mubr.msk.bf16.gmra.mxu0 %vm6270_vm5, %v8505_v25 }
 0x2e5   : > { %v5356_v59 = vpop.f32.mrf.mxu0  ;;  %v5249_v34 = vpop.f32.mrf.mxu1  ;;  %3667 = vmatmul.mubr.bf16.gmra.mxu1 %v8525_v47  ;;  %3827 = vmatprep.mubr.bf16.mxu0 %v8557_v48 }
 0x2e6   : > { %v5357_v58 = vadd.f32 %v5356_v59, %v5355_v8  ;;  %3674 = vmatprep.mubr.bf16.mxu1 %v8588_v62  ;;  %v3278_v40 = vadd.f32 %v5248_v31, %v8749_v18 }
 0x2e7   : > { %v5358_v63 = vpop.f32.mrf.mxu0  ;;  %v5250_v9 = vpop.f32.mrf.mxu1 }
 0x2e8   : > { %v8801_v12 = vadd.f32 %v5357_v58, %v3275_v33  ;;  %v5251_v51 = vadd.f32 %v5250_v9, %v5249_v34 }
 0x2e9   : > { %v5359_v5 = vpop.f32.mrf.mxu0  ;;  %v5252_v30 = vpop.f32.mrf.mxu1 }
 0x2ea   : > { %v5360_v14 = vadd.f32 %v5359_v5, %v5358_v63  ;;  %v3283_v21 = vadd.f32 %v5251_v51, %v8749_v18 }
 0x2eb   : > { %v5361_v25 = vpop.f32.mrf.mxu0  ;;  %v5253_v45 = vpop.f32.mrf.mxu1 }
 0x2ec   : > { %v8804_v39 = vadd.f32 %v5360_v14, %v3278_v40  ;;  %v5254_v10 = vadd.f32 %v5253_v45, %v5252_v30  ;;  %4717 = vmatmul.mubr.msk.bf16.gmra.mxu0 %vm6270_vm5, %v8531_v32  ;;  %v9620_v30 = vld [vmem:[#allocation5_spill] sm:$0xff] }
 0x2ed   : > { %v5362_v47 = vpop.f32.mrf.mxu0  ;;  %v5255_v26 = vpop.f32.mrf.mxu1  ;;  %3675 = vmatmul.mubr.bf16.gmra.mxu1 %v8557_v48  ;;  %3835 = vmatprep.mubr.bf16.mxu0 %v8567_v54 }
 0x2ee   : > { %v5363_v43 = vadd.f32 %v5362_v47, %v5361_v25  ;;  %3682 = vmatprep.mubr.bf16.mxu1 %v8604_v35  ;;  %v3286_v32 = vadd.f32 %v5254_v10, %v8749_v18 }
 0x2ef   : > { %v5364_v41 = vpop.f32.mrf.mxu0  ;;  %v5256_v17 = vpop.f32.mrf.mxu1 }
 0x2f0   : > { %v8813_v0 = vadd.f32 %v5363_v43, %v3283_v21  ;;  %v5257_v22 = vadd.f32 %v5256_v17, %v5255_v26 }
 0x2f1   : > { %v5365_v38 = vpop.f32.mrf.mxu0  ;;  %v5258_v57 = vpop.f32.mrf.mxu1 }
 0x2f2   : > { %v5366_v1 = vadd.f32 %v5365_v38, %v5364_v41  ;;  %v3291_v8 = vadd.f32 %v5257_v22, %v8749_v18 }
 0x2f3   : > { %v5259_v7 = vpop.f32.mrf.mxu1 }
 0x2f4   : > { %v8816_v13 = vadd.f32 %v5366_v1, %v3286_v32  ;;  %v5367_v48 = vpop.f32.mrf.mxu0  ;;  %v5260_v20 = vadd.f32 %v5259_v7, %v5258_v57  ;;  %4721 = vmatmul.mubr.msk.bf16.gmra.mxu0 %vm6270_vm5, %v8555_v16 }
 0x2f5   : > { %v5261_v4 = vpop.f32.mrf.mxu1  ;;  %3683 = vmatmul.mubr.bf16.gmra.mxu1 %v8567_v54  ;;  %3843 = vmatprep.mubr.bf16.mxu0 %v8626_v23 }
 0x2f6   : > { %v5368_v3 = vpop.f32.mrf.mxu0  ;;  %3690 = vmatprep.mubr.bf16.mxu1 %v8628_v53  ;;  %v3294_v16 = vadd.f32 %v5260_v20, %v8749_v18 }
 0x2f7   : > { %v5369_v46 = vadd.f32 %v5368_v3, %v5367_v48  ;;  %v5262_v31 = vpop.f32.mrf.mxu1 }
 0x2f8   : > { %v5370_v59 = vpop.f32.mrf.mxu0  ;;  %v5263_v33 = vadd.f32 %v5262_v31, %v5261_v4 }
 0x2f9   : > { %v8825_v58 = vadd.f32 %v5369_v46, %v3291_v8  ;;  %v5264_v34 = vpop.f32.mrf.mxu1 }
 0x2fa   : > { %v5371_v63 = vpop.f32.mrf.mxu0  ;;  %v3299_v10 = vadd.f32 %v5263_v33, %v8749_v18 }
 0x2fb   : > { %v5372_v9 = vadd.f32 %v5371_v63, %v5370_v59  ;;  %v5265_v51 = vpop.f32.mrf.mxu1 }
 0x2fc   : > { %v5266_v54 = vadd.f32 %v5265_v51, %v5264_v34  ;;  %v5373_v40 = vpop.f32.mrf.mxu0  ;;  %4725 = vmatmul.mubr.msk.bf16.gmra.mxu0 %vm6270_vm5, %v8581_v6 }
 0x2fd   : > { %v8828_v5 = vadd.f32 %v5372_v9, %v3294_v16  ;;  %v5267_v14 = vpop.f32.mrf.mxu1  ;;  %3691 = vmatmul.mubr.bf16.gmra.mxu1 %v8626_v23  ;;  %3851 = vmatprep.mubr.bf16.mxu0 %v9620_v30 }
 0x2fe   : > { %5745 = vmatprep.mubr.bf16.mxu1 %v8032_v27  ;;  %v5374_v25 = vpop.f32.mrf.mxu0  ;;  %v3302_v6 = vadd.f32 %v5266_v54, %v8749_v18  ;;  %v9621_v27 = vld [vmem:[#allocation6_spill] sm:$0xff] }
 0x2ff   : > { %v5268_v45 = vpop.f32.mrf.mxu1  ;;  %v5375_v47 = vadd.f32 %v5374_v25, %v5373_v40 }
 0x300   : > { %v5269_v26 = vadd.f32 %v5268_v45, %v5267_v14  ;;  %v5376_v21 = vpop.f32.mrf.mxu0 }
 0x301   : > { %v5270_v43 = vpop.f32.mrf.mxu1  ;;  %v8837_v41 = vadd.f32 %v5375_v47, %v3299_v10 }
 0x302   : > { %v5377_v17 = vpop.f32.mrf.mxu0  ;;  %v3307_v20 = vadd.f32 %v5269_v26, %v8749_v18 }
 0x303   : > { %v5271_v22 = vpop.f32.mrf.mxu1  ;;  %v5378_v38 = vadd.f32 %v5377_v17, %v5376_v21 }
 0x304   : > { %v5272_v23 = vadd.f32 %v5271_v22, %v5270_v43  ;;  %v5379_v57 = vpop.f32.mrf.mxu0  ;;  %4729 = vmatmul.mubr.msk.bf16.gmra.mxu0 %vm6270_vm5, %v9621_v27 }
 0x305   : > { %v5273_v32 = vpop.f32.mrf.mxu1  ;;  %5746 = vmatmul.mubr.bf16.vlgmr.msra.gmra.mxu1 %v9613_v60  ;;  %v8844_v1 = vadd.f32 %v5378_v38, %v3302_v6 }
 0x306   : > { %5749 = vmatprep.mubr.bf16.mxu1 %v8186_v44  ;;  %v5380_v7 = vpop.f32.mrf.mxu0  ;;  %v3310_v33 = vadd.f32 %v5272_v23, %v8749_v18 }
 0x307   : > { %v5274_v48 = vpop.f32.mrf.mxu1  ;;  %v5381_v4 = vadd.f32 %v5380_v7, %v5379_v57 }
 0x308   : > { %v5275_v3 = vadd.f32 %v5274_v48, %v5273_v32  ;;  %v5382_v8 = vpop.f32.mrf.mxu0 }
 0x309   : > { %v5276_v46 = vpop.f32.mrf.mxu1  ;;  %v8848_v31 = vadd.f32 %v5381_v4, %v3307_v20 }
 0x30a   : > { %v5383_v59 = vpop.f32.mrf.mxu0  ;;  %v3315_v54 = vadd.f32 %v5275_v3, %v8749_v18 }
 0x30b   : > { %v5277_v36 = vpop.f32.mrf.mxu1  ;;  %v5384_v34 = vadd.f32 %v5383_v59, %v5382_v8 }
 0x30c   : > { %v5278_v60 = vadd.f32 %v5277_v36, %v5276_v46  ;;  %v5385_v63 = vpop.f32.mrf.mxu0 }
 0x30d   : > { %v5279_v16 = vpop.f32.mrf.mxu1  ;;  %5750 = vmatmul.mubr.bf16.gmra.mxu1 %v8258_v2  ;;  %v8852_v44 = vadd.f32 %v5384_v34, %v3310_v33 }
 0x30e   : > { %5753 = vmatprep.mubr.bf16.mxu1 %v8340_v42  ;;  %v5386_v9 = vpop.f32.mrf.mxu0  ;;  %v3318_v26 = vadd.f32 %v5278_v60, %v8749_v18 }
 0x30f   : > { %v5280_v51 = vpop.f32.mrf.mxu1  ;;  %v5387_v40 = vadd.f32 %v5386_v9, %v5385_v63 }
 0x310   : > { %v5281_v14 = vadd.f32 %v5280_v51, %v5279_v16  ;;  %v5388_v30 = vpop.f32.mrf.mxu0 }
 0x311   : > { %v5282_v25 = vpop.f32.mrf.mxu1  ;;  %v8856_v45 = vadd.f32 %v5387_v40, %v3315_v54 }
 0x312   : > { %v5389_v10 = vpop.f32.mrf.mxu0  ;;  %v3323_v38 = vadd.f32 %v5281_v14, %v8749_v18 }
 0x313   : > { %v5283_v47 = vpop.f32.mrf.mxu1  ;;  %v5390_v21 = vadd.f32 %v5389_v10, %v5388_v30 }
 0x314   : > { %v5284_v2 = vadd.f32 %v5283_v47, %v5282_v25  ;;  %v5391_v43 = vpop.f32.mrf.mxu0 }
 0x315   : > { %v5285_v17 = vpop.f32.mrf.mxu1  ;;  %5754 = vmatmul.mubr.bf16.gmra.mxu1 %v8392_v49  ;;  %v8860_v42 = vadd.f32 %v5390_v21, %v3318_v26 }
 0x316   : > { %5757 = vmatprep.mubr.bf16.mxu1 %v8414_v29  ;;  %v5392_v22 = vpop.f32.mrf.mxu0  ;;  %v3326_v4 = vadd.f32 %v5284_v2, %v8749_v18 }
 0x317   : > { %v5286_v6 = vpop.f32.mrf.mxu1  ;;  %v5393_v23 = vadd.f32 %v5392_v22, %v5391_v43 }
 0x318   : > { %v5287_v57 = vadd.f32 %v5286_v6, %v5285_v17  ;;  %v5394_v27 = vpop.f32.mrf.mxu0 }
 0x319   : > { %v5288_v32 = vpop.f32.mrf.mxu1  ;;  %v8864_v7 = vadd.f32 %v5393_v23, %v3323_v38 }
 0x31a   : > { %v5395_v48 = vpop.f32.mrf.mxu0  ;;  %v3331_v33 = vadd.f32 %v5287_v57, %v8749_v18 }
 0x31b   : > { %v5289_v20 = vpop.f32.mrf.mxu1  ;;  %v5396_v3 = vadd.f32 %v5395_v48, %v5394_v27 }
 0x31c   : > { %v5290_v49 = vadd.f32 %v5289_v20, %v5288_v32  ;;  %v5397_v8 = vpop.f32.mrf.mxu0 }
 0x31d   : > { %v5291_v46 = vpop.f32.mrf.mxu1  ;;  %5758 = vmatmul.mubr.bf16.gmra.mxu1 %v8440_v61  ;;  %v8868_v29 = vadd.f32 %v5396_v3, %v3326_v4 }
 0x31e   : > { %5761 = vmatprep.mubr.bf16.mxu1 %v8476_v55  ;;  %v5398_v59 = vpop.f32.mrf.mxu0  ;;  %v3334_v40 = vadd.f32 %v5290_v49, %v8749_v18 }
 0x31f   : > { %v5292_v36 = vpop.f32.mrf.mxu1  ;;  %v5399_v34 = vadd.f32 %v5398_v59, %v5397_v8 }
 0x320   : > { %v5293_v60 = vadd.f32 %v5292_v36, %v5291_v46  ;;  %v5400_v63 = vpop.f32.mrf.mxu0 }
 0x321   : > { %v5294_v16 = vpop.f32.mrf.mxu1  ;;  %v8872_v9 = vadd.f32 %v5399_v34, %v3331_v33 }
 0x322   : > { %v5401_v51 = vpop.f32.mrf.mxu0  ;;  %v3339_v26 = vadd.f32 %v5293_v60, %v8749_v18 }
 0x323   : > { %v5295_v54 = vpop.f32.mrf.mxu1  ;;  %v5402_v14 = vadd.f32 %v5401_v51, %v5400_v63 }
 0x324   : > { %v5296_v61 = vadd.f32 %v5295_v54, %v5294_v16  ;;  %v5403_v30 = vpop.f32.mrf.mxu0 }
 0x325   : > { %v5297_v25 = vpop.f32.mrf.mxu1  ;;  %5762 = vmatmul.mubr.bf16.gmra.mxu1 %v8510_v11  ;;  %v8876_v55 = vadd.f32 %v5402_v14, %v3334_v40 }
 0x326   : > { %5765 = vmatprep.mubr.bf16.mxu1 %v8527_v52  ;;  %v5404_v10 = vpop.f32.mrf.mxu0  ;;  %v3342_v23 = vadd.f32 %v5296_v61, %v8749_v18 }
 0x327   : > { %v5298_v47 = vpop.f32.mrf.mxu1  ;;  %v5405_v21 = vadd.f32 %v5404_v10, %v5403_v30 }
 0x328   : > { %v5299_v2 = vadd.f32 %v5298_v47, %v5297_v25  ;;  %v5406_v43 = vpop.f32.mrf.mxu0 }
 0x329   : > { %v5300_v17 = vpop.f32.mrf.mxu1  ;;  %v8880_v22 = vadd.f32 %v5405_v21, %v3339_v26 }
 0x32a   : > { %v5407_v6 = vpop.f32.mrf.mxu0  ;;  %v3347_v4 = vadd.f32 %v5299_v2, %v8749_v18 }
 0x32b   : > { %v5301_v38 = vpop.f32.mrf.mxu1  ;;  %v5408_v57 = vadd.f32 %v5407_v6, %v5406_v43  ;;  %v9622_v6 = vld [vmem:[#allocation8_spill] sm:$0xff] }
 0x32c   : > { %v5302_v11 = vadd.f32 %v5301_v38, %v5300_v17  ;;  %v5409_v27 = vpop.f32.mrf.mxu0 }
 0x32d   : > { %v5303_v32 = vpop.f32.mrf.mxu1  ;;  %5766 = vmatmul.mubr.bf16.gmra.mxu1 %v8559_v24  ;;  %v8884_v52 = vadd.f32 %v5408_v57, %v3342_v23 }
 0x32e   : > { %5769 = vmatprep.mubr.bf16.mxu1 %v8588_v62  ;;  %v5410_v48 = vpop.f32.mrf.mxu0  ;;  %v3350_v34 = vadd.f32 %v5302_v11, %v8749_v18 }
 0x32f   : > { %v5304_v20 = vpop.f32.mrf.mxu1  ;;  %v5411_v3 = vadd.f32 %v5410_v48, %v5409_v27 }
 0x330   : > { %v5305_v49 = vadd.f32 %v5304_v20, %v5303_v32  ;;  %v5412_v8 = vpop.f32.mrf.mxu0 }
 0x331   : > { %v5306_v46 = vpop.f32.mrf.mxu1  ;;  %v8888_v59 = vadd.f32 %v5411_v3, %v3347_v4 }
 0x332   : > { %v5413_v36 = vpop.f32.mrf.mxu0  ;;  %v3355_v40 = vadd.f32 %v5305_v49, %v8749_v18 }
 0x333   : > { %v5307_v33 = vpop.f32.mrf.mxu1  ;;  %v5414_v60 = vadd.f32 %v5413_v36, %v5412_v8 }
 0x334   : > { %v5308_v24 = vadd.f32 %v5307_v33, %v5306_v46  ;;  %v5415_v63 = vpop.f32.mrf.mxu0 }
 0x335   : > { %v5309_v16 = vpop.f32.mrf.mxu1  ;;  %5770 = vmatmul.mubr.bf16.gmra.mxu1 %v8604_v35  ;;  %v8892_v62 = vadd.f32 %v5414_v60, %v3350_v34 }
 0x336   : > { %5773 = vmatprep.mubr.bf16.mxu1 %v8628_v53  ;;  %v5416_v51 = vpop.f32.mrf.mxu0  ;;  %v3358_v21 = vadd.f32 %v5308_v24, %v8749_v18 }
 0x337   : > { %v5310_v54 = vpop.f32.mrf.mxu1  ;;  %v5417_v14 = vadd.f32 %v5416_v51, %v5415_v63 }
 0x338   : > { %v5311_v61 = vadd.f32 %v5310_v54, %v5309_v16  ;;  %v5418_v30 = vpop.f32.mrf.mxu0 }
 0x339   : > { %v5312_v25 = vpop.f32.mrf.mxu1  ;;  %v8896_v10 = vadd.f32 %v5417_v14, %v3355_v40 }
 0x33a   : > { %v5419_v47 = vpop.f32.mrf.mxu0  ;;  %v3363_v57 = vadd.f32 %v5311_v61, %v8749_v18 }
 0x33b   : > { %v5313_v26 = vpop.f32.mrf.mxu1  ;;  %v5420_v2 = vadd.f32 %v5419_v47, %v5418_v30 }
 0x33c   : > { %v5314_v35 = vadd.f32 %v5313_v26, %v5312_v25  ;;  %v5421_v43 = vpop.f32.mrf.mxu0 }
 0x33d   : > { %v5315_v17 = vpop.f32.mrf.mxu1  ;;  %5774 = vmatmul.mubr.bf16.gmra.mxu1 %v9622_v6  ;;  %v8900_v53 = vadd.f32 %v5420_v2, %v3358_v21 }
 0x33e   : > { %v5422_v38 = vpop.f32.mrf.mxu0  ;;  %v3366_v49 = vadd.f32 %v5314_v35, %v8749_v18 }
 0x33f   : > { %v5316_v23 = vpop.f32.mrf.mxu1  ;;  %v5423_v11 = vadd.f32 %v5422_v38, %v5421_v43 }
 0x340   : > { %v5317_v27 = vadd.f32 %v5316_v23, %v5315_v17  ;;  %v5424_v32 = vpop.f32.mrf.mxu0 }
 0x341   : > { %v5318_v48 = vpop.f32.mrf.mxu1  ;;  %v8903_v20 = vadd.f32 %v5423_v11, %v3363_v57 }
 0x342   : > { %v5425_v4 = vpop.f32.mrf.mxu0  ;;  %v3371_v63 = vadd.f32 %v5317_v27, %v8749_v18 }
 0x343   : > { %v5319_v3 = vpop.f32.mrf.mxu1  ;;  %v5426_v8 = vadd.f32 %v5425_v4, %v5424_v32 }
 0x344   : > { %v5320_v46 = vadd.f32 %v5319_v3, %v5318_v48  ;;  %v5427_v36 = vpop.f32.mrf.mxu0 }
 0x345   : > { %v5449_v33 = vpop.f32.mrf.mxu1  ;;  %v8906_v34 = vadd.f32 %v5426_v8, %v3366_v49 }
 0x346   : > { %v5428_v60 = vpop.f32.mrf.mxu0  ;;  %v3374_v47 = vadd.f32 %v5320_v46, %v8749_v18 }
 0x347   : > { %v5450_v24 = vpop.f32.mrf.mxu1  ;;  %v5429_v16 = vadd.f32 %v5428_v60, %v5427_v36 }
 0x348   : > { %v5451_v51 = vadd.f32 %v5450_v24, %v5449_v33  ;;  %v5430_v54 = vpop.f32.mrf.mxu0 }
 0x349   : > { %v5452_v40 = vpop.f32.mrf.mxu1  ;;  %v8909_v14 = vadd.f32 %v5429_v16, %v3371_v63 }
 0x34a   : > { %v3573_v61 = vadd.f32 %v5451_v51, %v8759_v15  ;;  %v5431_v30 = vpop.f32.mrf.mxu0 }
 0x34b   : > { %9623 = vst [vmem:[#allocation9_spill] sm:$0xff] %v8909_v14  ;;  %v5453_v25 = vpop.f32.mrf.mxu1  ;;  %v5432_v26 = vadd.f32 %v5431_v30, %v5430_v54 }
 0x34c   : > { %v5454_v21 = vadd.f32 %v5453_v25, %v5452_v40  ;;  %v5561_v2 = vpop.f32.mrf.mxu0 }
 0x34d   : > { %v5455_v35 = vpop.f32.mrf.mxu1  ;;  %v8913_v43 = vadd.f32 %v5432_v26, %v3374_v47 }
 0x34e   : > { %v3576_v17 = vadd.f32 %v5454_v21, %v8762_v28  ;;  %v5562_v6 = vpop.f32.mrf.mxu0 }
 0x34f   : > { %9624 = vst [vmem:[#allocation15_spill] sm:$0xff] %v8913_v43  ;;  %v5456_v38 = vpop.f32.mrf.mxu1  ;;  %v5563_v23 = vadd.f32 %v5562_v6, %v5561_v2 }
 0x350   : > { %v5457_v57 = vadd.f32 %v5456_v38, %v5455_v35  ;;  %v5564_v11 = vpop.f32.mrf.mxu0 }
 0x351   : > { %v5458_v27 = vpop.f32.mrf.mxu1  ;;  %v8919_v32 = vadd.f32 %v5563_v23, %v3573_v61 }
 0x352   : > { %v8917_v15 = vadd.f32 %v5457_v57, %v8771_v56  ;;  %v5565_v18 = vpop.f32.mrf.mxu0 }
 0x353   : > { %v5459_v48 = vpop.f32.mrf.mxu1  ;;  %v5566_v4 = vadd.f32 %v5565_v18, %v5564_v11 }
 0x354   : > { %v5460_v3 = vadd.f32 %v5459_v48, %v5458_v27  ;;  %v8921_v49 = vpop.f32.mrf.mxu0 }
 0x355   : > { %v5461_v8 = vpop.f32.mrf.mxu1  ;;  %v8926_v46 = vadd.f32 %v5566_v4, %v3576_v17 }
 0x356   : > { %v8924_v28 = vadd.f32 %v5460_v3, %v8780_v50  ;;  %v8928_v36 = vpop.f32.mrf.mxu0 }
 0x357   : > { %v5462_v33 = vpop.f32.mrf.mxu1 }
 0x358   : > { %v5463_v60 = vadd.f32 %v5462_v33, %v5461_v8  ;;  %v8930_v56 = vpop.f32.mrf.mxu0 }
 0x359   : > { %v5464_v24 = vpop.f32.mrf.mxu1 }
 0x35a   : > { %v8933_v63 = vadd.f32 %v5463_v60, %v8788_v37  ;;  %v8935_v16 = vpop.f32.mrf.mxu0 }
 0x35b   : > { %v5465_v51 = vpop.f32.mrf.mxu1 }
 0x35c   : > { %v5466_v54 = vadd.f32 %v5465_v51, %v5464_v24  ;;  %v8937_v40 = vpop.f32.mrf.mxu0 }
 0x35d   : > { %v5467_v50 = vpop.f32.mrf.mxu1 }
 0x35e   : > { %v8940_v61 = vadd.f32 %v5466_v54, %v8792_v19  ;;  %v8942_v30 = vpop.f32.mrf.mxu0 }
 0x35f   : > { %v5468_v25 = vpop.f32.mrf.mxu1 }
 0x360   : > { %v5469_v47 = vadd.f32 %v5468_v25, %v5467_v50  ;;  %v8944_v26 = vpop.f32.mrf.mxu0 }
 0x361   : > { %v5470_v21 = vpop.f32.mrf.mxu1 }
 0x362   : > { %v8947_v37 = vadd.f32 %v5469_v47, %v8801_v12  ;;  %v8949_v2 = vpop.f32.mrf.mxu0 }
 0x363   : > { %v5471_v35 = vpop.f32.mrf.mxu1 }
 0x364   : > { %v5472_v17 = vadd.f32 %v5471_v35, %v5470_v21  ;;  %v8951_v6 = vpop.f32.mrf.mxu0 }
 0x365   : > { %v5473_v38 = vpop.f32.mrf.mxu1 }
 0x366   : > { %v8954_v19 = vadd.f32 %v5472_v17, %v8804_v39  ;;  %v8956_v23 = vpop.f32.mrf.mxu0 }
 0x367   : > { %v5474_v57 = vpop.f32.mrf.mxu1 }
 0x368   : > { %v5475_v11 = vadd.f32 %v5474_v57, %v5473_v38  ;;  %v8958_v27 = vpop.f32.mrf.mxu0 }
 0x369   : > { %v5476_v18 = vpop.f32.mrf.mxu1 }
 0x36a   : > { %v8961_v12 = vadd.f32 %v5475_v11, %v8813_v0  ;;  %v8963_v48 = vpop.f32.mrf.mxu0 }
 0x36b   : > { %v5477_v4 = vpop.f32.mrf.mxu1 }
 0x36c   : > { %v5478_v3 = vadd.f32 %v5477_v4, %v5476_v18  ;;  %v8965_v8 = vpop.f32.mrf.mxu0 }
 0x36d   : > { %v5479_v33 = vpop.f32.mrf.mxu1 }
 0x36e   : > { %v8968_v39 = vadd.f32 %v5478_v3, %v8816_v13  ;;  %v8970_v60 = vpop.f32.mrf.mxu0 }
 0x36f   : > { %v5480_v24 = vpop.f32.mrf.mxu1 }
 0x370   : > { %v5481_v51 = vadd.f32 %v5480_v24, %v5479_v33  ;;  %v8972_v54 = vpop.f32.mrf.mxu0 }
 0x371   : > { %v5482_v50 = vpop.f32.mrf.mxu1 }
 0x372   : > { %v8975_v0 = vadd.f32 %v5481_v51, %v8825_v58  ;;  %v8977_v25 = vpop.f32.mrf.mxu0 }
 0x373   : > { %v5483_v47 = vpop.f32.mrf.mxu1 }
 0x374   : > { %v5484_v21 = vadd.f32 %v5483_v47, %v5482_v50  ;;  %v8979_v35 = vpop.f32.mrf.mxu0 }
 0x375   : > { %v5485_v17 = vpop.f32.mrf.mxu1 }
 0x376   : > { %v8982_v13 = vadd.f32 %v5484_v21, %v8828_v5  ;;  %v8984_v38 = vpop.f32.mrf.mxu0 }
 0x377   : > { %v5486_v57 = vpop.f32.mrf.mxu1 }
 0x378   : > { %v5487_v11 = vadd.f32 %v5486_v57, %v5485_v17  ;;  %v8986_v18 = vpop.f32.mrf.mxu0 }
 0x379   : > { %v5488_v4 = vpop.f32.mrf.mxu1 }
 0x37a   : > { %v8989_v58 = vadd.f32 %v5487_v11, %v8837_v41  ;;  %v8991_v3 = vpop.f32.mrf.mxu0 }
 0x37b   : > { %v5489_v33 = vpop.f32.mrf.mxu1 }
 0x37c   : > { %9625 = vst [vmem:[#allocation14_spill] sm:$0xff] %v8989_v58  ;;  %v5490_v24 = vadd.f32 %v5489_v33, %v5488_v4  ;;  %v8993_v51 = vpop.f32.mrf.mxu0 }
 0x37d   : > { %v5491_v50 = vpop.f32.mrf.mxu1 }
 0x37e   : > { %v8996_v5 = vadd.f32 %v5490_v24, %v8844_v1  ;;  %v8998_v47 = vpop.f32.mrf.mxu0 }
 0x37f   : > { %v5492_v21 = vpop.f32.mrf.mxu1 }
 0x380   : > { %9626 = vst [vmem:[#allocation32_spill] sm:$0xff] %v8996_v5  ;;  %v5493_v17 = vadd.f32 %v5492_v21, %v5491_v50  ;;  %v9000_v57 = vpop.f32.mrf.mxu0 }
 0x381   : > { %9627 = vst [vmem:[#allocation33_spill] sm:$0xff] %v9000_v57  ;;  %v5494_v43 = vpop.f32.mrf.mxu1 }
 0x382   : > { %v9003_v41 = vadd.f32 %v5493_v17, %v8848_v31  ;;  %v9005_v11 = vpop.f32.mrf.mxu0 }
 0x383   : > { %9629 = vst [vmem:[#allocation17_spill] sm:$0xff] %v9005_v11  ;;  %v5495_v14 = vpop.f32.mrf.mxu1 }
 0x384   : > { %9628 = vst [vmem:[#allocation16_spill] sm:$0xff] %v9003_v41  ;;  %v5496_v4 = vadd.f32 %v5495_v14, %v5494_v43  ;;  %v9007_v33 = vpop.f32.mrf.mxu0 }
 0x385   : > { %v5497_v58 = vpop.f32.mrf.mxu1 }
 0x386   : > { %v9010_v1 = vadd.f32 %v5496_v4, %v8852_v44  ;;  %v9012_v24 = vpop.f32.mrf.mxu0 }
 0x387   : > { %v5498_v5 = vpop.f32.mrf.mxu1 }
 0x388   : > { %9630 = vst [vmem:[#allocation18_spill] sm:$0xff] %v9010_v1  ;;  %v5499_v50 = vadd.f32 %v5498_v5, %v5497_v58  ;;  %v9014_v21 = vpop.f32.mrf.mxu0 }
 0x389   : > { %9631 = vst [vmem:[#allocation20_spill] sm:$0xff] %v9014_v21  ;;  %v5500_v57 = vpop.f32.mrf.mxu1 }
 0x38a   : > { %v9017_v31 = vadd.f32 %v5499_v50, %v8856_v45  ;;  %v9019_v17 = vpop.f32.mrf.mxu0 }
 0x38b   : > { %v5501_v11 = vpop.f32.mrf.mxu1 }
 0x38c   : > { %9632 = vst [vmem:[#allocation21_spill] sm:$0xff] %v9017_v31  ;;  %v5502_v14 = vadd.f32 %v5501_v11, %v5500_v57  ;;  %v9021_v43 = vpop.f32.mrf.mxu0 }
 0x38d   : > { %9633 = vst [vmem:[#allocation26_spill] sm:$0xff] %v9021_v43  ;;  %v5503_v41 = vpop.f32.mrf.mxu1 }
 0x38e   : > { %v9024_v44 = vadd.f32 %v5502_v14, %v8860_v42  ;;  %v9026_v4 = vpop.f32.mrf.mxu0 }
 0x38f   : > { %9635 = vst [vmem:[#allocation24_spill] sm:$0xff] %v9026_v4  ;;  %v5504_v1 = vpop.f32.mrf.mxu1 }
 0x390   : > { %9634 = vst [vmem:[#allocation23_spill] sm:$0xff] %v9024_v44  ;;  %v5505_v58 = vadd.f32 %v5504_v1, %v5503_v41  ;;  %v9028_v5 = vpop.f32.mrf.mxu0 }
 0x391   : > { %9636 = vst [vmem:[#allocation37_spill] sm:$0xff] %v9028_v5  ;;  %v5506_v21 = vpop.f32.mrf.mxu1 }
 0x392   : > { %v9031_v45 = vadd.f32 %v5505_v58, %v8864_v7  ;;  %v9033_v50 = vpop.f32.mrf.mxu0 }
 0x393   : > { %9638 = vst [vmem:[#allocation11_spill] sm:$0xff] %v9033_v50  ;;  %v5507_v31 = vpop.f32.mrf.mxu1 }
 0x394   : > { %9637 = vst [vmem:[#allocation38_spill] sm:$0xff] %v9031_v45  ;;  %v5508_v57 = vadd.f32 %v5507_v31, %v5506_v21  ;;  %v9035_v11 = vpop.f32.mrf.mxu0 }
 0x395   : > { %v5509_v43 = vpop.f32.mrf.mxu1 }
 0x396   : > { %v9038_v42 = vadd.f32 %v5508_v57, %v8868_v29  ;;  %v9040_v14 = vpop.f32.mrf.mxu0 }
 0x397   : > { %v5510_v44 = vpop.f32.mrf.mxu1 }
 0x398   : > { %9639 = vst [vmem:[#allocation28_spill] sm:$0xff] %v9038_v42  ;;  %v5511_v41 = vadd.f32 %v5510_v44, %v5509_v43  ;;  %v9042_v1 = vpop.f32.mrf.mxu0 }
 0x399   : > { %v5512_v5 = vpop.f32.mrf.mxu1 }
 0x39a   : > { %v9045_v7 = vadd.f32 %v5511_v41, %v8872_v9  ;;  %v9047_v58 = vpop.f32.mrf.mxu0 }
 0x39b   : > { %9641 = vst [vmem:[#allocation41_spill] sm:$0xff] %v9047_v58  ;;  %v5513_v50 = vpop.f32.mrf.mxu1 }
 0x39c   : > { %9640 = vst [vmem:[#allocation40_spill] sm:$0xff] %v9045_v7  ;;  %v5514_v21 = vadd.f32 %v5513_v50, %v5512_v5  ;;  %v9049_v31 = vpop.f32.mrf.mxu0 }
 0x39d   : > { %9642 = vst [vmem:[#allocation31_spill] sm:$0xff] %v9049_v31  ;;  %v5515_v45 = vpop.f32.mrf.mxu1 }
 0x39e   : > { %v9052_v29 = vadd.f32 %v5514_v21, %v8876_v55  ;;  %v9054_v4 = vpop.f32.mrf.mxu0 }
 0x39f   : > { %v5516_v57 = vpop.f32.mrf.mxu1 }
 0x3a0   : > { %9643 = vst [vmem:[#allocation35_spill] sm:$0xff] %v9052_v29  ;;  %v5517_v42 = vadd.f32 %v5516_v57, %v5515_v45  ;;  %v9059_v7 = vpop.f32.mrf.mxu0 }
 0x3a1   : > { %v5518_v43 = vpop.f32.mrf.mxu1  ;;  %9644 = vst [vmem:[#allocation34_spill] sm:$0xff] %v9059_v7 }
 0x3a2   : > { %v9057_v44 = vadd.f32 %v5517_v42, %v8880_v22  ;;  %v9064_v55 = vpop.f32.mrf.mxu0 }
 0x3a3   : > { %v5519_v9 = vpop.f32.mrf.mxu1 }
 0x3a4   : > { %v5520_v41 = vadd.f32 %v5519_v9, %v5518_v43  ;;  %v9069_v22 = vpop.f32.mrf.mxu0 }
 0x3a5   : > { %v5521_v58 = vpop.f32.mrf.mxu1 }
 0x3a6   : > { %v9062_v5 = vadd.f32 %v5520_v41, %v8884_v52  ;;  %v9074_v52 = vpop.f32.mrf.mxu0 }
 0x3a7   : > { %v5522_v50 = vpop.f32.mrf.mxu1 }
 0x3a8   : > { %9645 = vst [vmem:[#allocation36_spill] sm:$0xff] %v9062_v5  ;;  %v5523_v31 = vadd.f32 %v5522_v50, %v5521_v58 }
 0x3a9   : > { %v5524_v21 = vpop.f32.mrf.mxu1 }
 0x3aa   : > { %v9067_v45 = vadd.f32 %v5523_v31, %v8888_v59  ;;  %v9079_v59 = vpop.f32.mrf.mxu0 }
 0x3ab   : > { %v5525_v57 = vpop.f32.mrf.mxu1 }
 0x3ac   : > { %v5526_v29 = vadd.f32 %v5525_v57, %v5524_v21 }
 0x3ad   : > { %v5527_v42 = vpop.f32.mrf.mxu1 }
 0x3ae   : > { %v9072_v43 = vadd.f32 %v5526_v29, %v8892_v62  ;;  %v9084_v29 = vpop.f32.mrf.mxu0 }
 0x3af   : > { %v5528_v9 = vpop.f32.mrf.mxu1 }
 0x3b0   : > { %9646 = vst [vmem:[#allocation39_spill] sm:$0xff] %v9072_v43  ;;  %v5529_v7 = vadd.f32 %v5528_v9, %v5527_v42  ;;  %v9089_v43 = vpop.f32.mrf.mxu0 }
 0x3b1   : > { %v5530_v41 = vpop.f32.mrf.mxu1 }
 0x3b2   : > { %v9077_v58 = vadd.f32 %v5529_v7, %v8896_v10 }
 0x3b3   : > { %v5531_v50 = vpop.f32.mrf.mxu1 }
 0x3b4   : > { %v5532_v5 = vadd.f32 %v5531_v50, %v5530_v41  ;;  %v5569_v50 = vadd.f32 %v8928_v36, %v8921_v49  ;;  %v5581_v49 = vadd.f32 %v8956_v23, %v8951_v6 }
 0x3b5   : > { %v5533_v31 = vpop.f32.mrf.mxu1 }
 0x3b6   : > { %v9082_v21 = vadd.f32 %v5532_v5, %v8900_v53  ;;  %v3758_v23 = vadd.f32 %v5581_v49, %v8947_v37 }
 0x3b7   : > { %v5534_v57 = vpop.f32.mrf.mxu1 }
 0x3b8   : > { %9647 = vst [vmem:[#allocation42_spill] sm:$0xff] %v9082_v21  ;;  %v5535_v62 = vadd.f32 %v5534_v57, %v5533_v31  ;;  %v9100_v31 = vpop.f32.mrf.mxu0  ;;  %v5965_v21 = vld [vmem:[%s6264_s7] sm:$0xff] }
 0x3b9   : > { %v5536_v42 = vpop.f32.mrf.mxu1 }
 0x3ba   : > { %v9087_v9 = vadd.f32 %v5535_v62, %v8903_v20  ;;  %v5572_v62 = vadd.f32 %v8935_v16, %v8930_v56 }
 0x3bb   : > { %v5537_v10 = vpop.f32.mrf.mxu1 }
 0x3bc   : > { %9648 = vst [vmem:[#allocation7_spill] sm:$0xff] %v9087_v9  ;;  %v5538_v7 = vadd.f32 %v5537_v10, %v5536_v42  ;;  %v3742_v42 = vadd.f32 %v5569_v50, %v8917_v15  ;;  %v3745_v56 = vadd.f32 %v5572_v62, %v8924_v28  ;;  %v5575_v50 = vadd.f32 %v8942_v30, %v8937_v40  ;;  %v5966_v28 = vld [vmem:[%s6264_s7 + $0x18] sm:$0xff] }
 0x3bd   : > { %v9091_v41 = vpop.f32.mrf.mxu1 }
 0x3be   : > { %v9094_v53 = vadd.f32 %v5538_v7, %v8906_v34  ;;  %v9110_v34 = vpop.f32.mrf.mxu0 }
 0x3bf   : > { %v9096_v5 = vpop.f32.mrf.mxu1 }
 0x3c0   : > { %9649 = vst [vmem:[#allocation19_spill] sm:$0xff] %v9094_v53  ;;  %v5964_v53 = vld [vmem:[%s6264_s7 + $0x10] sm:$0xff]  ;;  %v9119_v16 = vpop.f32.mrf.mxu0 }
 0x3c1   : > { %v9102_v20 = vpop.f32.mrf.mxu1 }
 0x3c2   : > { %9650 = vst [vmem:[#allocation12_spill] sm:$0xff] %v9102_v20 }
 0x3c3   : > { %v9104_v57 = vpop.f32.mrf.mxu1 }
 0x3c4   : > { %9651 = vst [vmem:[#allocation25_spill] sm:$0xff] %v9104_v57 }
 0x3c5   : > { %v5747_v10 = vpop.f32.mrf.mxu1 }
 0x3c6   : > { %v3903_v7 = vadd.f32 %v5747_v10, %v3742_v42 }
 0x3c7   : > { %v3894_v36 = vpop.f32.mrf.mxu1 }
 0x3c8   : > { %v4023_v9 = vadd.f32 %v5964_v53, %v3903_v7  ;;  %v3895_v57 = vadd.f32 %v3894_v36, %v8919_v32  ;;  %v5584_v53 = vadd.f32 %v8963_v48, %v8958_v27  ;;  %v5967_v48 = vld [vmem:[%s6264_s7 + $0x8] sm:$0xff]  ;;  %v5593_v7 = vadd.f32 %v8984_v38, %v8979_v35  ;;  %v5968_v36 = vld [vmem:[%s6264_s7 + $0x30] sm:$0xff]  ;;  %v5969_v38 = vld [vmem:[%s6264_s7 + $0x20] sm:$0xff] }
 0x3c9   : > { %v5748_v15 = vpop.f32.mrf.mxu1 }
 0x3ca   : > { %v4055_v20 = vmax.f32 %v4023_v9, 0.0  ;;  %v4021_v42 = vadd.f32 %v5965_v21, %v3895_v57  ;;  %v3906_v10 = vadd.f32 %v5748_v15, %v3745_v56  ;;  %v5578_v21 = vadd.f32 %v8949_v2, %v8944_v26  ;;  %v9134_v9 = vpop.f32.mrf.mxu0 }
 0x3cb   : > { %v3897_v6 = vpop.f32.mrf.mxu1  ;;  %v3761_v56 = vadd.f32 %v5584_v53, %v8954_v19  ;;  %v5596_v19 = vadd.f32 %v8991_v3, %v8986_v18  ;;  %v5605_v3 = vadd.f32 %v9012_v24, %v9007_v33  ;;  %v5973_v24 = vld [vmem:[%s6264_s7 + $0x40] sm:$0xff] }
 0x3cc   : > { %4087 = vst [vmem:[%s9127_s15 + $0x10] sm:$0xff] %v4055_v20  ;;  %v4053_v32 = vmax.f32 %v4021_v42, 0.0  ;;  %v4024_v40 = vadd.f32 %v5966_v28, %v3906_v10  ;;  %v3898_v30 = vadd.f32 %v3897_v6, %v8926_v46  ;;  %v3750_v20 = vadd.f32 %v5575_v50, %v8933_v63  ;;  %v9144_v15 = vpop.f32.mrf.mxu0 }
 0x3cd   : > { %v5751_v37 = vpop.f32.mrf.mxu1  ;;  %v3753_v10 = vadd.f32 %v5578_v21, %v8940_v61  ;;  %v5587_v63 = vadd.f32 %v8970_v60, %v8965_v8  ;;  %v5970_v61 = vld [vmem:[%s6264_s7 + $0x38] sm:$0xff]  ;;  %v5590_v60 = vadd.f32 %v8977_v25, %v8972_v54 }
 0x3ce   : > { %4085 = vst [vmem:[%s9127_s15] sm:$0xff] %v4053_v32  ;;  %v4056_v27 = vmax.f32 %v4024_v40, 0.0  ;;  %v4022_v57 = vadd.f32 %v5967_v48, %v3898_v30  ;;  %v3919_v62 = vadd.f32 %v5751_v37, %v3758_v23  ;;  %v3774_v32 = vadd.f32 %v5593_v7, %v8975_v0  ;;  %v9158_v40 = vpop.f32.mrf.mxu0  ;;  %v5971_v37 = vld [vmem:[%s6264_s7 + $0x28] sm:$0xff] }
 0x3cf   : > { %v3910_v49 = vpop.f32.mrf.mxu1  ;;  %v3766_v18 = vadd.f32 %v5587_v63, %v8961_v12  ;;  %v5599_v12 = vadd.f32 %v8998_v47, %v8993_v51  ;;  %v9654_v47 = vld [vmem:[#allocation33_spill] sm:$0xff] }
 0x3d0   : > { %4088 = vst [vmem:[%s9127_s15 + $0x18] sm:$0xff] %v4056_v27  ;;  %v4054_v46 = vmax.f32 %v4022_v57, 0.0  ;;  %v4027_v26 = vadd.f32 %v5968_v36, %v3919_v62  ;;  %v3911_v2 = vadd.f32 %v3910_v49, %v3750_v20  ;;  %v5972_v62 = vld [vmem:[%s6264_s7 + $0x50] sm:$0xff]  ;;  %v3777_v20 = vadd.f32 %v5596_v19, %v8982_v13  ;;  %v9168_v7 = vpop.f32.mrf.mxu0  ;;  %v5975_v19 = vld [vmem:[%s6264_s7 + $0x48] sm:$0xff] }
 0x3d1   : > { %v5752_v42 = vpop.f32.mrf.mxu1 }
 0x3d2   : > { %4086 = vst [vmem:[%s9127_s15 + $0x8] sm:$0xff] %v4054_v46  ;;  %v4059_v35 = vmax.f32 %v4027_v26, 0.0  ;;  %v4025_v50 = vadd.f32 %v5969_v38, %v3911_v2  ;;  %v3922_v6 = vadd.f32 %v5752_v42, %v3761_v56  ;;  %v3769_v46 = vadd.f32 %v5590_v60, %v8968_v39  ;;  %v9652_v56 = vld [vmem:[#allocation16_spill] sm:$0xff]  ;;  %v9655_v38 = vld [vmem:[#allocation17_spill] sm:$0xff] }
 0x3d3   : > { %v3913_v23 = vpop.f32.mrf.mxu1  ;;  %v3790_v42 = vadd.f32 %v5605_v3, %v9652_v56  ;;  %v5974_v39 = vld [vmem:[%s6264_s7 + $0x58] sm:$0xff] }
 0x3d4   : > { %4091 = vst [vmem:[%s9127_s15 + $0x30] sm:$0xff] %v4059_v35  ;;  %v4057_v53 = vmax.f32 %v4025_v50, 0.0  ;;  %v4028_v28 = vadd.f32 %v5970_v61, %v3922_v6  ;;  %v3914_v8 = vadd.f32 %v3913_v23, %v3753_v10  ;;  %v9653_v10 = vld [vmem:[#allocation20_spill] sm:$0xff]  ;;  %v5602_v50 = vadd.f32 %v9655_v38, %v9654_v47  ;;  %v9182_v6 = vpop.f32.mrf.mxu0  ;;  %v5979_v38 = vld [vmem:[%s6264_s7 + $0x68] sm:$0xff] }
 0x3d5   : > { %v5755_v30 = vpop.f32.mrf.mxu1  ;;  %v5608_v13 = vadd.f32 %v9019_v17, %v9653_v10  ;;  %v9656_v17 = vld [vmem:[#allocation14_spill] sm:$0xff]  ;;  %v5978_v56 = vld [vmem:[%s6264_s7 + $0x78] sm:$0xff] }
 0x3d6   : > { %4089 = vst [vmem:[%s9127_s15 + $0x20] sm:$0xff] %v4057_v53  ;;  %v4060_v21 = vmax.f32 %v4028_v28, 0.0  ;;  %v4026_v0 = vadd.f32 %v5971_v37, %v3914_v8  ;;  %v3935_v27 = vadd.f32 %v5755_v30, %v3774_v32  ;;  %v3782_v28 = vadd.f32 %v5599_v12, %v9656_v17  ;;  %v9192_v3 = vpop.f32.mrf.mxu0  ;;  %v5980_v17 = vld [vmem:[%s6264_s7 + $0x90] sm:$0xff] }
 0x3d7   : > { %v3926_v48 = vpop.f32.mrf.mxu1  ;;  %v5617_v8 = vadd.f32 %v9040_v14, %v9035_v11  ;;  %v5977_v14 = vld [vmem:[%s6264_s7 + $0x60] sm:$0xff] }
 0x3d8   : > { %4092 = vst [vmem:[%s9127_s15 + $0x38] sm:$0xff] %v4060_v21  ;;  %v4058_v57 = vmax.f32 %v4026_v0, 0.0  ;;  %v4031_v54 = vadd.f32 %v5972_v62, %v3935_v27  ;;  %v3927_v25 = vadd.f32 %v3926_v48, %v3766_v18  ;;  %v5976_v21 = vld [vmem:[%s6264_s7 + $0x70] sm:$0xff]  ;;  %v9657_v27 = vld [vmem:[#allocation18_spill] sm:$0xff] }
 0x3d9   : > { %v5756_v49 = vpop.f32.mrf.mxu1  ;;  %v3793_v18 = vadd.f32 %v5608_v13, %v9657_v27  ;;  %v9663_v13 = vld [vmem:[#allocation37_spill] sm:$0xff] }
 0x3da   : > { %4090 = vst [vmem:[%s9127_s15 + $0x28] sm:$0xff] %v4058_v57  ;;  %v4063_v33 = vmax.f32 %v4031_v54, 0.0  ;;  %v4029_v36 = vadd.f32 %v5973_v24, %v3927_v25  ;;  %v3938_v26 = vadd.f32 %v5756_v49, %v3777_v20  ;;  %v9658_v57 = vld [vmem:[#allocation32_spill] sm:$0xff]  ;;  %v9659_v54 = vld [vmem:[#allocation26_spill] sm:$0xff] }
 0x3db   : > { %v3929_v2 = vpop.f32.mrf.mxu1  ;;  %v3785_v62 = vadd.f32 %v5602_v50, %v9658_v57  ;;  %v9660_v25 = vld [vmem:[#allocation24_spill] sm:$0xff] }
 0x3dc   : > { %4095 = vst [vmem:[%s9127_s15 + $0x50] sm:$0xff] %v4063_v33  ;;  %v4061_v63 = vmax.f32 %v4029_v36, 0.0  ;;  %v4032_v35 = vadd.f32 %v5974_v39, %v3938_v26  ;;  %v3930_v51 = vadd.f32 %v3929_v2, %v3769_v46  ;;  %v5611_v20 = vadd.f32 %v9660_v25, %v9659_v54  ;;  %v9661_v33 = vld [vmem:[#allocation38_spill] sm:$0xff]  ;;  %v9662_v36 = vld [vmem:[#allocation41_spill] sm:$0xff] }
 0x3dd   : > { %v5759_v23 = vpop.f32.mrf.mxu1  ;;  %v3806_v24 = vadd.f32 %v5617_v8, %v9661_v33  ;;  %v5620_v26 = vadd.f32 %v9662_v36, %v9042_v1  ;;  %v9665_v1 = vld [vmem:[#allocation21_spill] sm:$0xff] }
 0x3de   : > { %4093 = vst [vmem:[%s9127_s15 + $0x40] sm:$0xff] %v4061_v63  ;;  %v4064_v32 = vmax.f32 %v4032_v35, 0.0  ;;  %v4030_v53 = vadd.f32 %v5975_v19, %v3930_v51  ;;  %v3951_v61 = vadd.f32 %v5759_v23, %v3790_v42  ;;  %v9664_v63 = vld [vmem:[#allocation11_spill] sm:$0xff]  ;;  %v9206_v35 = vpop.f32.mrf.mxu0  ;;  %v5629_v19 = vadd.f32 %v9074_v52, %v9069_v22  ;;  %v5981_v52 = vld [vmem:[%s6264_s7 + $0x80] sm:$0xff] }
 0x3df   : > { %v3942_v60 = vpop.f32.mrf.mxu1  ;;  %v5614_v39 = vadd.f32 %v9664_v63, %v9663_v13  ;;  %v5984_v13 = vld [vmem:[%s6264_s7 + $0xb0] sm:$0xff] }
 0x3e0   : > { %4096 = vst [vmem:[%s9127_s15 + $0x58] sm:$0xff] %v4064_v32  ;;  %v4062_v30 = vmax.f32 %v4030_v53, 0.0  ;;  %v4035_v37 = vadd.f32 %v5976_v21, %v3951_v61  ;;  %v3943_v0 = vadd.f32 %v3942_v60, %v3782_v28  ;;  %v3798_v32 = vadd.f32 %v5611_v20, %v9665_v1  ;;  %v9666_v60 = vld [vmem:[#allocation28_spill] sm:$0xff]  ;;  %v9216_v21 = vpop.f32.mrf.mxu0 }
 0x3e1   : > { %v5760_v48 = vpop.f32.mrf.mxu1  ;;  %v3822_v25 = vadd.f32 %v5629_v19, %v9057_v44  ;;  %v5632_v20 = vadd.f32 %v9084_v29, %v9079_v59  ;;  %v5641_v29 = vadd.f32 %v9144_v15, %v9134_v9  ;;  %v5635_v1 = vadd.f32 %v9100_v31, %v9089_v43  ;;  %v5985_v9 = vld [vmem:[%s6264_s7 + $0xa0] sm:$0xff] }
 0x3e2   : > { %4094 = vst [vmem:[%s9127_s15 + $0x48] sm:$0xff] %v4062_v30  ;;  %v4067_v11 = vmax.f32 %v4035_v37, 0.0  ;;  %v4033_v49 = vadd.f32 %v5977_v14, %v3943_v0  ;;  %v3954_v46 = vadd.f32 %v5760_v48, %v3793_v18  ;;  %v3809_v30 = vadd.f32 %v5620_v26, %v9666_v60  ;;  %v9667_v0 = vld [vmem:[#allocation23_spill] sm:$0xff]  ;;  %v5982_v14 = vld [vmem:[%s6264_s7 + $0x98] sm:$0xff]  ;;  %v5651_v33 = vpop.f32.mrf.mxu0  ;;  %v5983_v26 = vld [vmem:[%s6264_s7 + $0x88] sm:$0xff] }
 0x3e3   : > { %v3945_v12 = vpop.f32.mrf.mxu1  ;;  %v3801_v27 = vadd.f32 %v5614_v39, %v9667_v0  ;;  %v9668_v18 = vld [vmem:[#allocation31_spill] sm:$0xff]  ;;  %v9671_v39 = vld [vmem:[#allocation36_spill] sm:$0xff]  ;;  %v5638_v31 = vadd.f32 %v9119_v16, %v9110_v34 }
 0x3e4   : > { %4099 = vst [vmem:[%s9127_s15 + $0x70] sm:$0xff] %v4067_v11  ;;  %v4065_v2 = vmax.f32 %v4033_v49, 0.0  ;;  %v4036_v42 = vadd.f32 %v5978_v56, %v3954_v46  ;;  %v3946_v10 = vadd.f32 %v3945_v12, %v3785_v62  ;;  %v5623_v48 = vadd.f32 %v9054_v4, %v9668_v18  ;;  %v9669_v46 = vld [vmem:[#allocation34_spill] sm:$0xff]  ;;  %v9670_v56 = vld [vmem:[#allocation40_spill] sm:$0xff] }
 0x3e5   : > { %v5763_v51 = vpop.f32.mrf.mxu1  ;;  %v5626_v12 = vadd.f32 %v9064_v55, %v9669_v46 }
 0x3e6   : > { %4097 = vst [vmem:[%s9127_s15 + $0x60] sm:$0xff] %v4065_v2  ;;  %v4068_v47 = vmax.f32 %v4036_v42, 0.0  ;;  %v4034_v50 = vadd.f32 %v5979_v38, %v3946_v10  ;;  %v3967_v23 = vadd.f32 %v5763_v51, %v3806_v24  ;;  %v3814_v59 = vadd.f32 %v5623_v48, %v9670_v56 }
 0x3e7   : > { %v3958_v53 = vpop.f32.mrf.mxu1  ;;  %v3825_v51 = vadd.f32 %v5632_v20, %v9671_v39 }
 0x3e8   : > { %4100 = vst [vmem:[%s9127_s15 + $0x78] sm:$0xff] %v4068_v47  ;;  %v4066_v61 = vmax.f32 %v4034_v50, 0.0  ;;  %v4039_v28 = vadd.f32 %v5980_v17, %v3967_v23  ;;  %v3959_v8 = vadd.f32 %v3958_v53, %v3798_v32  ;;  %v5652_v47 = vpop.f32.mrf.mxu0  ;;  %v9672_v50 = vld [vmem:[#allocation35_spill] sm:$0xff]  ;;  %v5644_v17 = vadd.f32 %v9168_v7, %v9158_v40 }
 0x3e9   : > { %v5764_v37 = vpop.f32.mrf.mxu1  ;;  %v3817_v23 = vadd.f32 %v5626_v12, %v9672_v50  ;;  %v3830_v7 = vadd.f32 %v5635_v1, %v9067_v45  ;;  %v5653_v48 = vadd.f32 %v5652_v47, %v5651_v33  ;;  %v9675_v45 = vld [vmem:[#allocation39_spill] sm:$0xff]  ;;  %v5989_v33 = vld [vmem:[%s6264_s7 + $0xc0] sm:$0xff] }
 0x3ea   : > { %4098 = vst [vmem:[%s9127_s15 + $0x68] sm:$0xff] %v4066_v61  ;;  %v4071_v22 = vmax.f32 %v4039_v28, 0.0  ;;  %v4037_v57 = vadd.f32 %v5981_v52, %v3959_v8  ;;  %v3970_v62 = vadd.f32 %v5764_v37, %v3809_v30  ;;  %v3838_v61 = vadd.f32 %v5641_v29, %v9077_v58  ;;  %v5986_v8 = vld [vmem:[%s6264_s7 + $0xb8] sm:$0xff]  ;;  %v5654_v37 = vpop.f32.mrf.mxu0  ;;  %v5992_v1 = vld [vmem:[%s6264_s7 + $0xf0] sm:$0xff] }
 0x3eb   : > { %v3961_v54 = vpop.f32.mrf.mxu1  ;;  %v5541_v30 = vadd.f32 %v9096_v5, %v9091_v41  ;;  %v5647_v5 = vadd.f32 %v9192_v3, %v9182_v6  ;;  %v5650_v29 = vadd.f32 %v9216_v21, %v9206_v35 }
 0x3ec   : > { %4103 = vst [vmem:[%s9127_s15 + $0x90] sm:$0xff] %v4071_v22  ;;  %v4069_v11 = vmax.f32 %v4037_v57, 0.0  ;;  %v4040_v49 = vadd.f32 %v5982_v14, %v3970_v62  ;;  %v3962_v4 = vadd.f32 %v3961_v54, %v3801_v27  ;;  %v5987_v27 = vld [vmem:[%s6264_s7 + $0xa8] sm:$0xff]  ;;  %v5988_v57 = vld [vmem:[%s6264_s7 + $0xd0] sm:$0xff]  ;;  %v9674_v54 = vld [vmem:[#allocation9_spill] sm:$0xff]  ;;  %v5655_v20 = vpop.f32.mrf.mxu0  ;;  %v3833_v14 = vadd.f32 %v5638_v31, %v9675_v45 }
 0x3ed   : > { %v5767_v24 = vpop.f32.mrf.mxu1  ;;  %v9673_v62 = vld [vmem:[#allocation42_spill] sm:$0xff]  ;;  %v5656_v6 = vadd.f32 %v5655_v20, %v5654_v37 }
 0x3ee   : > { %4101 = vst [vmem:[%s9127_s15 + $0x80] sm:$0xff] %v4069_v11  ;;  %v4072_v36 = vmax.f32 %v4040_v49, 0.0  ;;  %v4038_v44 = vadd.f32 %v5983_v26, %v3962_v4  ;;  %v3983_v2 = vadd.f32 %v5767_v24, %v3822_v25  ;;  %v3841_v41 = vadd.f32 %v5644_v17, %v9673_v62  ;;  %v9676_v49 = vld [vmem:[#allocation12_spill] sm:$0xff]  ;;  %v9677_v4 = vld [vmem:[#allocation25_spill] sm:$0xff]  ;;  %v9680_v17 = vld [vmem:[#allocation19_spill] sm:$0xff] }
 0x3ef   : > { %v3974_v42 = vpop.f32.mrf.mxu1  ;;  %v3693_v25 = vadd.f32 %v5541_v30, %v9674_v54  ;;  %v5544_v46 = vadd.f32 %v9677_v4, %v9676_v49 }
 0x3f0   : > { %4104 = vst [vmem:[%s9127_s15 + $0x98] sm:$0xff] %v4072_v36  ;;  %v4070_v10 = vmax.f32 %v4038_v44, 0.0  ;;  %v4043_v55 = vadd.f32 %v5984_v13, %v3983_v2  ;;  %v3975_v63 = vadd.f32 %v3974_v42, %v3814_v59  ;;  %v5990_v2 = vld [vmem:[%s6264_s7 + $0xd8] sm:$0xff] }
 0x3f1   : > { %v5768_v38 = vpop.f32.mrf.mxu1  ;;  %v3854_v44 = vadd.f32 %v5653_v48, %v3693_v25 }
 0x3f2   : > { %4102 = vst [vmem:[%s9127_s15 + $0x88] sm:$0xff] %v4070_v10  ;;  %v4075_v32 = vmax.f32 %v4043_v55, 0.0  ;;  %v4041_v15 = vadd.f32 %v5985_v9, %v3975_v63  ;;  %v3986_v19 = vadd.f32 %v5768_v38, %v3825_v51  ;;  %v9678_v10 = vld [vmem:[#allocation7_spill] sm:$0xff]  ;;  %v5991_v51 = vld [vmem:[%s6264_s7 + $0xc8] sm:$0xff] }
 0x3f3   : > { %v3977_v53 = vpop.f32.mrf.mxu1  ;;  %v3846_v13 = vadd.f32 %v5647_v5, %v9678_v10  ;;  %v9679_v55 = vld [vmem:[#allocation15_spill] sm:$0xff] }
 0x3f4   : > { %4107 = vst [vmem:[%s9127_s15 + $0xb0] sm:$0xff] %v4075_v32  ;;  %v4073_v28 = vmax.f32 %v4041_v15, 0.0  ;;  %v4044_v60 = vadd.f32 %v5986_v8, %v3986_v19  ;;  %v3978_v43 = vadd.f32 %v3977_v53, %v3817_v23  ;;  %v3696_v63 = vadd.f32 %v5544_v46, %v9679_v55  ;;  %v5993_v19 = vld [vmem:[%s6264_s7 + $0xe0] sm:$0xff] }
 0x3f5   : > { %v5771_v0 = vpop.f32.mrf.mxu1 }
 0x3f6   : > { %4105 = vst [vmem:[%s9127_s15 + $0xa0] sm:$0xff] %v4073_v28  ;;  %v4076_v58 = vmax.f32 %v4044_v60, 0.0  ;;  %v4042_v18 = vadd.f32 %v5987_v27, %v3978_v43  ;;  %v3999_v40 = vadd.f32 %v5771_v0, %v3838_v61  ;;  %v3857_v21 = vadd.f32 %v5656_v6, %v3696_v63  ;;  %v5994_v43 = vld [vmem:[%s6264_s7 + $0xf8] sm:$0xff]  ;;  %v5995_v0 = vld [vmem:[%s6264_s7 + $0xe8] sm:$0xff]  ;;  %s6060_s7 = smov [#allocation2]  }
 0x3f7   : > { %v3990_v22 = vpop.f32.mrf.mxu1  ;;  %v3849_v28 = vadd.f32 %v5650_v29, %v9680_v17  ;;  %s6000_s6 = sshll.u32 %s6060_s7, 4  ;;  %s6001_s6 = int_to_ptr.vmem [resolvable:$false] %s6000_s6 }
 0x3f8   : > { %4108 = vst [vmem:[%s9127_s15 + $0xb8] sm:$0xff] %v4076_v58  ;;  %v4074_v52 = vmax.f32 %v4042_v18, 0.0  ;;  %v4047_v34 = vadd.f32 %v5988_v57, %v3999_v40  ;;  %v3991_v16 = vadd.f32 %v3990_v22, %v3830_v7  ;;  %s6002_s8 = scalar_lea.vmem %s6001_s6, 8192  ;;  %p6003_p0 = scmp.lt.s32.totalorder %s9290_s17, %s6001_s6 }
 0x3f9   : > { %v5772_v11 = vpop.f32.mrf.mxu1  ;;  %p6004_p1 = scmp.lt.s32.totalorder %s6002_s8, %s5996_s30 }
 0x3fa   : > { %4106 = vst [vmem:[%s9127_s15 + $0xa8] sm:$0xff] %v4074_v52  ;;  %v4079_v12 = vmax.f32 %v4047_v34, 0.0  ;;  %v4045_v24 = vadd.f32 %v5989_v33, %v3991_v16  ;;  %v4002_v36 = vadd.f32 %v5772_v11, %v3841_v41 }
 0x3fb   : > { %v3993_v26 = vpop.f32.mrf.mxu1  ;;  %p6005_p2 = por %p6004_p1, %p6003_p0 }
 0x3fc   : > { %4111 = vst [vmem:[%s9127_s15 + $0xd0] sm:$0xff] %v4079_v12  ;;  %v4077_v3 = vmax.f32 %v4045_v24, 0.0  ;;  %v4048_v56 = vadd.f32 %v5990_v2, %v4002_v36  ;;  %v3994_v59 = vadd.f32 %v3993_v26, %v3833_v14 }
 0x3fd   : > { %v5775_v42 = vpop.f32.mrf.mxu1  ;;  %p6006_p3 = pnand %p6005_p2, %p5999_p13 }
 0x3fe   : > { %4109 = vst [vmem:[%s9127_s15 + $0xc0] sm:$0xff] %v4077_v3  ;;  %v4080_v39 = vmax.f32 %v4048_v56, 0.0  ;;  %v4046_v47 = vadd.f32 %v5991_v51, %v3994_v59  ;;  %v4015_v38 = vadd.f32 %v5775_v42, %v3854_v44 }
 0x3ff   : > { %v4006_v50 = vpop.f32.mrf.mxu1 }
 0x400   : > { %4112 = vst [vmem:[%s9127_s15 + $0xd8] sm:$0xff] %v4080_v39  ;;  %v4078_v23 = vmax.f32 %v4046_v47, 0.0  ;;  %v4051_v32 = vadd.f32 %v5992_v1, %v4015_v38  ;;  %v4007_v35 = vadd.f32 %v4006_v50, %v3846_v13 }
 0x401   : > { %v5776_v9 = vpop.f32.mrf.mxu1 }
 0x402   : > { %4110 = vst [vmem:[%s9127_s15 + $0xc8] sm:$0xff] %v4078_v23  ;;  %v4083_v15 = vmax.f32 %v4051_v32, 0.0  ;;  %v4049_v53 = vadd.f32 %v5993_v19, %v4007_v35  ;;  %v4018_v61 = vadd.f32 %v5776_v9, %v3857_v21 }
 0x403   : > { %v4009_v8 = vpop.f32.mrf.mxu1 }
 0x404   : > { %4115 = vst [vmem:[%s9127_s15 + $0xf0] sm:$0xff] %v4083_v15  ;;  %v4081_v60 = vmax.f32 %v4049_v53, 0.0  ;;  %v4052_v31 = vadd.f32 %v5994_v43, %v4018_v61  ;;  %v4010_v30 = vadd.f32 %v4009_v8, %v3849_v28 }
 0x406   : > { %4113 = vst [vmem:[%s9127_s15 + $0xe0] sm:$0xff] %v4081_v60  ;;  %v4084_v37 = vmax.f32 %v4052_v31, 0.0  ;;  %v4050_v58 = vadd.f32 %v5995_v0, %v4010_v30 }
 0x408   : > { %4116 = vst [vmem:[%s9127_s15 + $0xf8] sm:$0xff] %v4084_v37  ;;  %v4082_v27 = vmax.f32 %v4050_v58, 0.0 }
 0x40a   : > { %4114 = vst [vmem:[%s9127_s15 + $0xe8] sm:$0xff] %v4082_v27 }
 0x40b   : > { %6009 = shalt.err (!%p6006_p3)
}
 0x40c   : > { %s6010_s9 = scalar_lea.hbm %s9288_s26, 4096  ;;  %s6014_s12 = scalar_lea.hbm %s9341_s5, 16384 }
 0x40d   : > { %p6011_p4 = scmp.ne.s32.totalorder %s9288_s26, %s6010_s9  ;;  %p6015_p9 = scmp.lt.s32.totalorder %s9288_s26, %s9341_s5 }
 0x40e   : > { %p6016_p10 = scmp.lt.s32.totalorder %s6014_s12, %s6010_s9 }
 0x40f   : > { %p6012_p7 = pnand %p6011_p4, %p6131_p5 }
 0x410   : > { %p6017_p11 = por %p6016_p10, %p6015_p9 }
 0x411   : > { %p6013_p8 = pneg %p6012_p7 }
 0x413   : > { %p6018_p12 = pnand %p6017_p11, %p6013_p8 }
 0x415   : > { %6021 = shalt.err (!%p6018_p12)
}
 0x416   : > { %s6061_s15 = smov 128   ;;  %s6062_s16 = smov 8  }
 0x417   : > { %5777 = dma.vmem_to_hbm [thread:$0]  (%p6131_p5), %s9290_s17, 4096, %s9288_s26, %s9296_s22, %s6061_s15, %s6061_s15, %s6062_s16  }
 0x418 PF: > { %p5783_p13 = scmp.ge.s32.totalorder %s6056_s21, 2  ;;  %s4146_s23 = sand.u32 1, %s6044_s18  }
 0x419   : > { %s4147_s25 = scalar_lea.sflag [#allocation3], %s4146_s23 }
 0x41a   : > { %p5780_p0 = pnand %p5783_p13, %p6135_p6 }
 0x41c   : > { %p5781_p1 = pneg %p5780_p0 }
 0x41e   : > { %6039 = dma.done.wait (%p5781_p1), %s4147_s25, 4096  }
 0x41f   : > { %6041 = vsyncadd (%p5781_p1), %s4147_s25, 4294963200  ;;  %p15_p2 = scmp.ge.s32.totalorder %s6118_s24, 6   ;;  %s9681_s18 = smov %s6048_s19 }
 0x420   : > { %s9682_s19 = smov %s6052_s20  ;;  %s9683_s20 = smov %s6129_s27 }
 0x421   : > { %s9684_s21 = smov %s6118_s24  ;;  %17 = sbr.rel (!%p15_p2) target bundleno = 3 (0x3), region = 75 }
 0x426   :  { %4152 = vsyncpa [#allocation3], 1 }
 0x427   :  { %4154 = vsyncpa [#allocation3 + $0x1], 1 }

</bundles_post_ra>
